<compile_context>
chip_gen: v7x
topology: tpu7x:2x2x1
jax: 0.10.0
libtpu: 0.0.40
codegen_flags: <defaults>
</compile_context>

<pallas_src>
import functools

import jax
import jax.numpy as jnp
from jax.experimental import pallas as pl
from jax.experimental.pallas import tpu as pltpu


def _round_up(x, m):
    return ((x + m - 1) // m) * m


def _hs_dnn_kernel(num_layers, s_ref, wl_ref, bl_ref, ow1_ref, ob1_ref,
                   ow2_ref, ob2_ref, e_ref):
    """Full hs_dnn forward for one batch tile, transposed layout, all in VMEM.

    s_ref  : (P, TB)       f32   spin configurations, features x batch
    wl_ref : (L, 4, P, P)  bf16  stacked [ef_w1, ef_w2, qp_w1, qp_w2] per layer
    bl_ref : (L, 4, P, 1)  f32   stacked biases (columns)
    ow1_ref: (P, P) bf16, ob1_ref: (P, 1) f32     output-layer first Linear
    ow2_ref: (8, P) bf16 (row 0 = Linear(N,1) weights, rest zero)
    ob2_ref: (1, 1) f32
    e_ref  : (1, TB)       f32   energies, batch on lanes (lane-dense store)
    """
    f32 = jnp.float32
    bf16 = jnp.bfloat16

    S = s_ref[...].astype(f32)                                    # (P, TB)
    for i in range(num_layers):          # unrolled: num_layers is small & static
        ef_w1 = wl_ref[i, 0]                                      # (P, P) bf16
        ef_w2 = wl_ref[i, 1]
        qp_w1 = wl_ref[i, 2]
        qp_w2 = wl_ref[i, 3]
        ef_b1 = bl_ref[i, 0]                                      # (P, 1) f32
        ef_b2 = bl_ref[i, 1]
        qp_b1 = bl_ref[i, 2]
        qp_b2 = bl_ref[i, 3]

        # effective_field_layers[i]: Linear -> Tanh -> Linear
        h = jnp.tanh(jnp.dot(ef_w1, S.astype(bf16),
                             preferred_element_type=f32) + ef_b1)
        F = jnp.dot(ef_w2, h.astype(bf16), preferred_element_type=f32) + ef_b2
        # quasi_particle_layers[i]: Linear -> Tanh -> Linear
        h2 = jnp.tanh(jnp.dot(qp_w1, F.astype(bf16),
                              preferred_element_type=f32) + qp_b1)
        S = jnp.dot(qp_w2, h2.astype(bf16), preferred_element_type=f32) + qp_b2

    # output_layer: Linear -> Tanh -> Linear(num_neurons, 1)
    h = jnp.tanh(jnp.dot(ow1_ref[...], S.astype(bf16),
                         preferred_element_type=f32) + ob1_ref[...])
    e8 = jnp.dot(ow2_ref[...], h.astype(bf16),
                 preferred_element_type=f32)                      # (8, TB)
    # Row 0 of ow2 holds the real Linear(N, 1) weights (other rows zero).  The
    # PyTorch .sum(dim=1, keepdim=True) is over the size-1 feature dim -> no-op.
    e_ref[...] = e8[0:1, :] + ob2_ref[...]                        # lane-dense store


def init_params(key, num_spins, num_layers, num_neurons):
    """Deterministic synthetic parameters in PyTorch nn.Linear layout.

    Returns a flat list of (W, b) with W: [out, in], b: [out], ordered per layer
    as [ef_lin1, ef_lin2, qp_lin1, qp_lin2] and finally [out_lin1, out_lin2].
    """
    params = []

    def dense(k, fan_in, fan_out):
        kw, kb = jax.random.split(k)
        w = jax.random.normal(kw, (fan_out, fan_in), jnp.float32) * 0.1
        b = jax.random.normal(kb, (fan_out,), jnp.float32) * 0.1
        return (w, b)

    for i in range(num_layers):
        in_dim = num_spins if i == 0 else num_neurons
        key, k1, k2, k3, k4 = jax.random.split(key, 5)
        params += [dense(k1, in_dim, num_neurons),
                   dense(k2, num_neurons, num_neurons),
                   dense(k3, num_neurons, num_neurons),
                   dense(k4, num_neurons, num_neurons)]
    key, k1, k2 = jax.random.split(key, 3)
    params += [dense(k1, num_neurons, num_neurons),
               dense(k2, num_neurons, 1)]
    return params


def pack_params(params, num_layers, pad_dim):
    """Zero-pad to (pad_dim, pad_dim) and stack per-layer weights / biases."""
    def pad_w(w):
        o, i = w.shape
        return jnp.zeros((pad_dim, pad_dim), jnp.float32).at[:o, :i].set(w)

    def pad_b(b):
        return jnp.zeros((pad_dim, 1), jnp.float32).at[:b.shape[0], 0].set(b)

    wl, bl = [], []
    idx = 0
    for _ in range(num_layers):
        layer_w, layer_b = [], []
        for _ in range(4):
            w, b = params[idx]
            idx += 1
            layer_w.append(pad_w(w))
            layer_b.append(pad_b(b))
        wl.append(jnp.stack(layer_w))
        bl.append(jnp.stack(layer_b))
    WL = jnp.stack(wl).astype(jnp.bfloat16)         # (L, 4, P, P) bf16
    BL = jnp.stack(bl)                              # (L, 4, P, 1) f32

    (o1_w, o1_b), (o2_w, o2_b) = params[idx], params[idx + 1]
    OW1 = pad_w(o1_w).astype(jnp.bfloat16)          # (P, P) bf16
    OB1 = pad_b(o1_b)                               # (P, 1) f32
    OW2 = (jnp.zeros((8, pad_dim), jnp.float32)
           .at[0, :o2_w.shape[1]].set(o2_w[0])
           .astype(jnp.bfloat16))                   # (8, P) bf16, row 0 real
    OB2 = o2_b.reshape(1, 1).astype(jnp.float32)    # (1, 1) f32
    return WL, BL, OW1, OB1, OW2, OB2


def hs_dnn_forward(s0, params, num_layers, num_neurons, *, batch_tile=256):
    B, num_spins = s0.shape
    P = _round_up(max(num_spins, num_neurons), 128)     # padded hidden width
    TB = min(batch_tile, _round_up(B, 128))             # lane-aligned batch tile
    B_pad = _round_up(B, TB)

    WL, BL, OW1, OB1, OW2, OB2 = pack_params(params, num_layers, P)

    # Transposed, zero-padded input: features x batch (batch on lanes).
    s0T = jnp.zeros((P, B_pad), jnp.float32).at[:num_spins, :B].set(s0.T)

    grid = (B_pad // TB,)
    in_specs = [
        pl.BlockSpec((P, TB), lambda i: (0, i)),                 # s0T batch tile
        pl.BlockSpec(WL.shape, lambda i: (0, 0, 0, 0)),          # stacked weights
        pl.BlockSpec(BL.shape, lambda i: (0, 0, 0, 0)),          # stacked biases
        pl.BlockSpec(OW1.shape, lambda i: (0, 0)),
        pl.BlockSpec(OB1.shape, lambda i: (0, 0)),
        pl.BlockSpec(OW2.shape, lambda i: (0, 0)),
        pl.BlockSpec(OB2.shape, lambda i: (0, 0)),
    ]
    out_spec = pl.BlockSpec((1, TB), lambda i: (0, i))           # lane-dense output

    n_lin = 4 * num_layers + 2
    cost = pl.CostEstimate(
        flops=int(2 * B_pad * P * P * n_lin),
        transcendentals=int(B_pad * P * (2 * num_layers + 1)),
        bytes_accessed=int(s0T.size * 4 + WL.size * 2 + BL.size * 4
                           + OW1.size * 2 + OB1.size * 4 + OW2.size * 2
                           + OB2.size * 4 + B_pad * 4),
    )

    e_row = pl.pallas_call(
        functools.partial(_hs_dnn_kernel, num_layers),
        out_shape=jax.ShapeDtypeStruct((1, B_pad), jnp.float32),
        grid=grid,
        in_specs=in_specs,
        out_specs=out_spec,
        compiler_params=pltpu.CompilerParams(
            dimension_semantics=("parallel",),   # batch tiles shard across TCs (v7x)
        ),
        cost_estimate=cost,
    )(s0T, WL, BL, OW1, OB1, OW2, OB2)

    return e_row[0, :B].reshape(B, 1)


def hs_dnn_ref(s0, params, num_layers):
    """Pure-JAX f32 reference matching the PyTorch module semantics."""
    S = s0
    idx = 0
    for _ in range(num_layers):
        (w1, b1), (w2, b2), (w3, b3), (w4, b4) = params[idx:idx + 4]
        idx += 4
        F = jnp.tanh(S @ w1.T + b1) @ w2.T + b2
        S = jnp.tanh(F @ w3.T + b3) @ w4.T + b4
    (w1, b1), (w2, b2) = params[idx:idx + 2]
    E = jnp.tanh(S @ w1.T + b1) @ w2.T + b2
    return jnp.sum(E, axis=1, keepdims=True)


def hs_dnn_ref_bf16(s0, params, num_layers):
    """Reference with the kernel's exact bf16-matmul / f32-accumulate recipe."""
    def lin(x, w, b):
        y = jnp.dot(x.astype(jnp.bfloat16), w.T.astype(jnp.bfloat16),
                    preferred_element_type=jnp.float32)
        return y + b

    S = s0.astype(jnp.float32)
    idx = 0
    for _ in range(num_layers):
        (w1, b1), (w2, b2), (w3, b3), (w4, b4) = params[idx:idx + 4]
        idx += 4
        F = lin(jnp.tanh(lin(S, w1, b1)), w2, b2)
        S = lin(jnp.tanh(lin(F, w3, b3)), w4, b4)
    (w1, b1), (w2, b2) = params[idx:idx + 2]
    E = lin(jnp.tanh(lin(S, w1, b1)), w2, b2)
    return jnp.sum(E, axis=1, keepdims=True)


if __name__ == "__main__":
    num_spins = 16
    num_layers = 2
    num_neurons = 32
    batch = 300          # non-multiple of the tile: exercises padding + 2 grid steps

    key = jax.random.PRNGKey(0)
    k_x, k_p = jax.random.split(key)
    S0 = jax.random.normal(k_x, (batch, num_spins), jnp.float32)
    params = init_params(k_p, num_spins, num_layers, num_neurons)

    E = hs_dnn_forward(S0, params, num_layers, num_neurons)
    jax.block_until_ready(E)

    E_match = hs_dnn_ref_bf16(S0, params, num_layers)   # same bf16 recipe as kernel
    E_f32 = hs_dnn_ref(S0, params, num_layers)          # pure f32 PyTorch semantics

    assert E.shape == (batch, 1), E.shape
    assert jnp.allclose(E, E_match, atol=1e-4, rtol=1e-4), \
        float(jnp.max(jnp.abs(E - E_match)))
    # bf16 MXU inputs -> loose tolerance vs the full-f32 reference.
    assert jnp.allclose(E, E_f32, atol=5e-2, rtol=1e-1), \
        float(jnp.max(jnp.abs(E - E_f32)))
    print("KERNEL_OK")
</pallas_src>

<mosaic_0001>
module attributes {stable_mosaic.version = 11 : i64} {
  func.func @_hs_dnn_kernel(%arg0: i32, %arg1: memref<128x256xf32, #tpu.memory_space<vmem>>, %arg2: memref<2x4x128x128xbf16, #tpu.memory_space<vmem>>, %arg3: memref<2x4x128x1xf32, #tpu.memory_space<vmem>>, %arg4: memref<128x128xbf16, #tpu.memory_space<vmem>>, %arg5: memref<128x1xf32, #tpu.memory_space<vmem>>, %arg6: memref<8x128xbf16, #tpu.memory_space<vmem>>, %arg7: memref<1x1xf32, #tpu.memory_space<vmem>>, %arg8: memref<1x256xf32, #tpu.memory_space<vmem>>) attributes {dimension_semantics = [#tpu.dimension_semantics<parallel>], iteration_bounds = array<i64: 2>, scalar_prefetch = 0 : i64, scratch_operands = 0 : i64, tpu.core_type = #tpu.core_type<tc>, window_params = [{transform_indices = @transform_0, window_bounds = array<i64: 128, 256>}, {pipeline_mode = #tpu.pipeline_mode<synchronous>, transform_indices = @transform_1, window_bounds = array<i64: 2, 4, 128, 128>}, {pipeline_mode = #tpu.pipeline_mode<synchronous>, transform_indices = @transform_2, window_bounds = array<i64: 2, 4, 128, 1>}, {pipeline_mode = #tpu.pipeline_mode<synchronous>, transform_indices = @transform_3, window_bounds = array<i64: 128, 128>}, {pipeline_mode = #tpu.pipeline_mode<synchronous>, transform_indices = @transform_4, window_bounds = array<i64: 128, 1>}, {pipeline_mode = #tpu.pipeline_mode<synchronous>, transform_indices = @transform_5, window_bounds = array<i64: 8, 128>}, {pipeline_mode = #tpu.pipeline_mode<synchronous>, transform_indices = @transform_6, window_bounds = array<i64: 1, 1>}, {transform_indices = @transform_7, window_bounds = array<i64: 1, 256>}]} {
    %c0 = arith.constant 0 : index
    %c0_0 = arith.constant 0 : index
    %0 = vector.load %arg1[%c0, %c0_0] : memref<128x256xf32, #tpu.memory_space<vmem>>, vector<128x256xf32>
    %c0_1 = arith.constant 0 : index
    %c0_2 = arith.constant 0 : index
    %c0_3 = arith.constant 0 : index
    %c0_4 = arith.constant 0 : index
    %1 = vector.load %arg2[%c0_1, %c0_2, %c0_3, %c0_4] : memref<2x4x128x128xbf16, #tpu.memory_space<vmem>>, vector<1x1x128x128xbf16>
    %2 = vector.shape_cast %1 : vector<1x1x128x128xbf16> to vector<128x128xbf16>
    %c0_5 = arith.constant 0 : index
    %c1 = arith.constant 1 : index
    %c0_6 = arith.constant 0 : index
    %c0_7 = arith.constant 0 : index
    %3 = vector.load %arg2[%c0_5, %c1, %c0_6, %c0_7] : memref<2x4x128x128xbf16, #tpu.memory_space<vmem>>, vector<1x1x128x128xbf16>
    %4 = vector.shape_cast %3 : vector<1x1x128x128xbf16> to vector<128x128xbf16>
    %c0_8 = arith.constant 0 : index
    %c2 = arith.constant 2 : index
    %c0_9 = arith.constant 0 : index
    %c0_10 = arith.constant 0 : index
    %5 = vector.load %arg2[%c0_8, %c2, %c0_9, %c0_10] : memref<2x4x128x128xbf16, #tpu.memory_space<vmem>>, vector<1x1x128x128xbf16>
    %6 = vector.shape_cast %5 : vector<1x1x128x128xbf16> to vector<128x128xbf16>
    %c0_11 = arith.constant 0 : index
    %c3 = arith.constant 3 : index
    %c0_12 = arith.constant 0 : index
    %c0_13 = arith.constant 0 : index
    %7 = vector.load %arg2[%c0_11, %c3, %c0_12, %c0_13] : memref<2x4x128x128xbf16, #tpu.memory_space<vmem>>, vector<1x1x128x128xbf16>
    %8 = vector.shape_cast %7 : vector<1x1x128x128xbf16> to vector<128x128xbf16>
    %c0_14 = arith.constant 0 : index
    %c0_15 = arith.constant 0 : index
    %c0_16 = arith.constant 0 : index
    %c0_17 = arith.constant 0 : index
    %9 = vector.load %arg3[%c0_14, %c0_15, %c0_16, %c0_17] : memref<2x4x128x1xf32, #tpu.memory_space<vmem>>, vector<1x1x128x1xf32>
    %10 = vector.shape_cast %9 : vector<1x1x128x1xf32> to vector<128x1xf32>
    %c0_18 = arith.constant 0 : index
    %c1_19 = arith.constant 1 : index
    %c0_20 = arith.constant 0 : index
    %c0_21 = arith.constant 0 : index
    %11 = vector.load %arg3[%c0_18, %c1_19, %c0_20, %c0_21] : memref<2x4x128x1xf32, #tpu.memory_space<vmem>>, vector<1x1x128x1xf32>
    %12 = vector.shape_cast %11 : vector<1x1x128x1xf32> to vector<128x1xf32>
    %c0_22 = arith.constant 0 : index
    %c2_23 = arith.constant 2 : index
    %c0_24 = arith.constant 0 : index
    %c0_25 = arith.constant 0 : index
    %13 = vector.load %arg3[%c0_22, %c2_23, %c0_24, %c0_25] : memref<2x4x128x1xf32, #tpu.memory_space<vmem>>, vector<1x1x128x1xf32>
    %14 = vector.shape_cast %13 : vector<1x1x128x1xf32> to vector<128x1xf32>
    %c0_26 = arith.constant 0 : index
    %c3_27 = arith.constant 3 : index
    %c0_28 = arith.constant 0 : index
    %c0_29 = arith.constant 0 : index
    %15 = vector.load %arg3[%c0_26, %c3_27, %c0_28, %c0_29] : memref<2x4x128x1xf32, #tpu.memory_space<vmem>>, vector<1x1x128x1xf32>
    %16 = vector.shape_cast %15 : vector<1x1x128x1xf32> to vector<128x1xf32>
    %17 = arith.truncf %0 : vector<128x256xf32> to vector<128x256xbf16>
    %cst = arith.constant dense<0.000000e+00> : vector<128x256xf32>
    %18 = tpu.matmul %2, %17, %cst {dimension_numbers = #tpu.dot_dimension_numbers<[1], [0], [0], [1], [0, 0, 1, 1], [], []>} : vector<128x128xbf16>, vector<128x256xbf16>, vector<128x256xf32> -> vector<128x256xf32>
    %19 = vector.broadcast %10 : vector<128x1xf32> to vector<128x256xf32>
    %20 = arith.addf %18, %19 : vector<128x256xf32>
    %21 = math.tanh %20 : vector<128x256xf32>
    %22 = arith.truncf %21 : vector<128x256xf32> to vector<128x256xbf16>
    %cst_30 = arith.constant dense<0.000000e+00> : vector<128x256xf32>
    %23 = tpu.matmul %4, %22, %cst_30 {dimension_numbers = #tpu.dot_dimension_numbers<[1], [0], [0], [1], [0, 0, 1, 1], [], []>} : vector<128x128xbf16>, vector<128x256xbf16>, vector<128x256xf32> -> vector<128x256xf32>
    %24 = vector.broadcast %12 : vector<128x1xf32> to vector<128x256xf32>
    %25 = arith.addf %23, %24 : vector<128x256xf32>
    %26 = arith.truncf %25 : vector<128x256xf32> to vector<128x256xbf16>
    %cst_31 = arith.constant dense<0.000000e+00> : vector<128x256xf32>
    %27 = tpu.matmul %6, %26, %cst_31 {dimension_numbers = #tpu.dot_dimension_numbers<[1], [0], [0], [1], [0, 0, 1, 1], [], []>} : vector<128x128xbf16>, vector<128x256xbf16>, vector<128x256xf32> -> vector<128x256xf32>
    %28 = vector.broadcast %14 : vector<128x1xf32> to vector<128x256xf32>
    %29 = arith.addf %27, %28 : vector<128x256xf32>
    %30 = math.tanh %29 : vector<128x256xf32>
    %31 = arith.truncf %30 : vector<128x256xf32> to vector<128x256xbf16>
    %cst_32 = arith.constant dense<0.000000e+00> : vector<128x256xf32>
    %32 = tpu.matmul %8, %31, %cst_32 {dimension_numbers = #tpu.dot_dimension_numbers<[1], [0], [0], [1], [0, 0, 1, 1], [], []>} : vector<128x128xbf16>, vector<128x256xbf16>, vector<128x256xf32> -> vector<128x256xf32>
    %33 = vector.broadcast %16 : vector<128x1xf32> to vector<128x256xf32>
    %34 = arith.addf %32, %33 : vector<128x256xf32>
    %c1_33 = arith.constant 1 : index
    %c0_34 = arith.constant 0 : index
    %c0_35 = arith.constant 0 : index
    %c0_36 = arith.constant 0 : index
    %35 = vector.load %arg2[%c1_33, %c0_34, %c0_35, %c0_36] : memref<2x4x128x128xbf16, #tpu.memory_space<vmem>>, vector<1x1x128x128xbf16>
    %36 = vector.shape_cast %35 : vector<1x1x128x128xbf16> to vector<128x128xbf16>
    %c1_37 = arith.constant 1 : index
    %c1_38 = arith.constant 1 : index
    %c0_39 = arith.constant 0 : index
    %c0_40 = arith.constant 0 : index
    %37 = vector.load %arg2[%c1_37, %c1_38, %c0_39, %c0_40] : memref<2x4x128x128xbf16, #tpu.memory_space<vmem>>, vector<1x1x128x128xbf16>
    %38 = vector.shape_cast %37 : vector<1x1x128x128xbf16> to vector<128x128xbf16>
    %c1_41 = arith.constant 1 : index
    %c2_42 = arith.constant 2 : index
    %c0_43 = arith.constant 0 : index
    %c0_44 = arith.constant 0 : index
    %39 = vector.load %arg2[%c1_41, %c2_42, %c0_43, %c0_44] : memref<2x4x128x128xbf16, #tpu.memory_space<vmem>>, vector<1x1x128x128xbf16>
    %40 = vector.shape_cast %39 : vector<1x1x128x128xbf16> to vector<128x128xbf16>
    %c1_45 = arith.constant 1 : index
    %c3_46 = arith.constant 3 : index
    %c0_47 = arith.constant 0 : index
    %c0_48 = arith.constant 0 : index
    %41 = vector.load %arg2[%c1_45, %c3_46, %c0_47, %c0_48] : memref<2x4x128x128xbf16, #tpu.memory_space<vmem>>, vector<1x1x128x128xbf16>
    %42 = vector.shape_cast %41 : vector<1x1x128x128xbf16> to vector<128x128xbf16>
    %c1_49 = arith.constant 1 : index
    %c0_50 = arith.constant 0 : index
    %c0_51 = arith.constant 0 : index
    %c0_52 = arith.constant 0 : index
    %43 = vector.load %arg3[%c1_49, %c0_50, %c0_51, %c0_52] : memref<2x4x128x1xf32, #tpu.memory_space<vmem>>, vector<1x1x128x1xf32>
    %44 = vector.shape_cast %43 : vector<1x1x128x1xf32> to vector<128x1xf32>
    %c1_53 = arith.constant 1 : index
    %c1_54 = arith.constant 1 : index
    %c0_55 = arith.constant 0 : index
    %c0_56 = arith.constant 0 : index
    %45 = vector.load %arg3[%c1_53, %c1_54, %c0_55, %c0_56] : memref<2x4x128x1xf32, #tpu.memory_space<vmem>>, vector<1x1x128x1xf32>
    %46 = vector.shape_cast %45 : vector<1x1x128x1xf32> to vector<128x1xf32>
    %c1_57 = arith.constant 1 : index
    %c2_58 = arith.constant 2 : index
    %c0_59 = arith.constant 0 : index
    %c0_60 = arith.constant 0 : index
    %47 = vector.load %arg3[%c1_57, %c2_58, %c0_59, %c0_60] : memref<2x4x128x1xf32, #tpu.memory_space<vmem>>, vector<1x1x128x1xf32>
    %48 = vector.shape_cast %47 : vector<1x1x128x1xf32> to vector<128x1xf32>
    %c1_61 = arith.constant 1 : index
    %c3_62 = arith.constant 3 : index
    %c0_63 = arith.constant 0 : index
    %c0_64 = arith.constant 0 : index
    %49 = vector.load %arg3[%c1_61, %c3_62, %c0_63, %c0_64] : memref<2x4x128x1xf32, #tpu.memory_space<vmem>>, vector<1x1x128x1xf32>
    %50 = vector.shape_cast %49 : vector<1x1x128x1xf32> to vector<128x1xf32>
    %51 = arith.truncf %34 : vector<128x256xf32> to vector<128x256xbf16>
    %cst_65 = arith.constant dense<0.000000e+00> : vector<128x256xf32>
    %52 = tpu.matmul %36, %51, %cst_65 {dimension_numbers = #tpu.dot_dimension_numbers<[1], [0], [0], [1], [0, 0, 1, 1], [], []>} : vector<128x128xbf16>, vector<128x256xbf16>, vector<128x256xf32> -> vector<128x256xf32>
    %53 = vector.broadcast %44 : vector<128x1xf32> to vector<128x256xf32>
    %54 = arith.addf %52, %53 : vector<128x256xf32>
    %55 = math.tanh %54 : vector<128x256xf32>
    %56 = arith.truncf %55 : vector<128x256xf32> to vector<128x256xbf16>
    %cst_66 = arith.constant dense<0.000000e+00> : vector<128x256xf32>
    %57 = tpu.matmul %38, %56, %cst_66 {dimension_numbers = #tpu.dot_dimension_numbers<[1], [0], [0], [1], [0, 0, 1, 1], [], []>} : vector<128x128xbf16>, vector<128x256xbf16>, vector<128x256xf32> -> vector<128x256xf32>
    %58 = vector.broadcast %46 : vector<128x1xf32> to vector<128x256xf32>
    %59 = arith.addf %57, %58 : vector<128x256xf32>
    %60 = arith.truncf %59 : vector<128x256xf32> to vector<128x256xbf16>
    %cst_67 = arith.constant dense<0.000000e+00> : vector<128x256xf32>
    %61 = tpu.matmul %40, %60, %cst_67 {dimension_numbers = #tpu.dot_dimension_numbers<[1], [0], [0], [1], [0, 0, 1, 1], [], []>} : vector<128x128xbf16>, vector<128x256xbf16>, vector<128x256xf32> -> vector<128x256xf32>
    %62 = vector.broadcast %48 : vector<128x1xf32> to vector<128x256xf32>
    %63 = arith.addf %61, %62 : vector<128x256xf32>
    %64 = math.tanh %63 : vector<128x256xf32>
    %65 = arith.truncf %64 : vector<128x256xf32> to vector<128x256xbf16>
    %cst_68 = arith.constant dense<0.000000e+00> : vector<128x256xf32>
    %66 = tpu.matmul %42, %65, %cst_68 {dimension_numbers = #tpu.dot_dimension_numbers<[1], [0], [0], [1], [0, 0, 1, 1], [], []>} : vector<128x128xbf16>, vector<128x256xbf16>, vector<128x256xf32> -> vector<128x256xf32>
    %67 = vector.broadcast %50 : vector<128x1xf32> to vector<128x256xf32>
    %68 = arith.addf %66, %67 : vector<128x256xf32>
    %c0_69 = arith.constant 0 : index
    %c0_70 = arith.constant 0 : index
    %69 = vector.load %arg4[%c0_69, %c0_70] : memref<128x128xbf16, #tpu.memory_space<vmem>>, vector<128x128xbf16>
    %70 = arith.truncf %68 : vector<128x256xf32> to vector<128x256xbf16>
    %cst_71 = arith.constant dense<0.000000e+00> : vector<128x256xf32>
    %71 = tpu.matmul %69, %70, %cst_71 {dimension_numbers = #tpu.dot_dimension_numbers<[1], [0], [0], [1], [0, 0, 1, 1], [], []>} : vector<128x128xbf16>, vector<128x256xbf16>, vector<128x256xf32> -> vector<128x256xf32>
    %c0_72 = arith.constant 0 : index
    %c0_73 = arith.constant 0 : index
    %72 = vector.load %arg5[%c0_72, %c0_73] : memref<128x1xf32, #tpu.memory_space<vmem>>, vector<128x1xf32>
    %73 = vector.broadcast %72 : vector<128x1xf32> to vector<128x256xf32>
    %74 = arith.addf %71, %73 : vector<128x256xf32>
    %75 = math.tanh %74 : vector<128x256xf32>
    %c0_74 = arith.constant 0 : index
    %c0_75 = arith.constant 0 : index
    %76 = vector.load %arg6[%c0_74, %c0_75] : memref<8x128xbf16, #tpu.memory_space<vmem>>, vector<8x128xbf16>
    %77 = arith.truncf %75 : vector<128x256xf32> to vector<128x256xbf16>
    %cst_76 = arith.constant dense<0.000000e+00> : vector<8x256xf32>
    %78 = tpu.matmul %76, %77, %cst_76 {dimension_numbers = #tpu.dot_dimension_numbers<[1], [0], [0], [1], [0, 0, 1, 1], [], []>} : vector<8x128xbf16>, vector<128x256xbf16>, vector<8x256xf32> -> vector<8x256xf32>
    %79 = vector.extract_strided_slice %78 {offsets = [0, 0], sizes = [1, 256], strides = [1, 1]} : vector<8x256xf32> to vector<1x256xf32>
    %c0_77 = arith.constant 0 : index
    %c0_78 = arith.constant 0 : index
    %80 = vector.load %arg7[%c0_77, %c0_78] : memref<1x1xf32, #tpu.memory_space<vmem>>, vector<1x1xf32>
    %81 = vector.broadcast %80 : vector<1x1xf32> to vector<1x256xf32>
    %82 = arith.addf %79, %81 : vector<1x256xf32>
    %c0_79 = arith.constant 0 : index
    %c0_80 = arith.constant 0 : index
    %83 = vector.load %arg8[%c0_79, %c0_80] : memref<1x256xf32, #tpu.memory_space<vmem>>, vector<1x256xf32>
    tpu.vector_store %arg8[%c0_79, %c0_80], %82 {strides = array<i32>} : memref<1x256xf32, #tpu.memory_space<vmem>>, vector<1x256xf32>,
    return
  }
  func.func @transform_0(%arg0: i32) -> (i32, i32) {
    %c0_i32 = arith.constant 0 : i32
    %c0_i32_0 = arith.constant 0 : i32
    return %c0_i32, %arg0 : i32, i32
  }
  func.func @transform_1(%arg0: i32) -> (i32, i32, i32, i32) {
    %c0_i32 = arith.constant 0 : i32
    %c0_i32_0 = arith.constant 0 : i32
    %c0_i32_1 = arith.constant 0 : i32
    %c0_i32_2 = arith.constant 0 : i32
    %c0_i32_3 = arith.constant 0 : i32
    return %c0_i32, %c0_i32_0, %c0_i32_1, %c0_i32_2 : i32, i32, i32, i32
  }
  func.func @transform_2(%arg0: i32) -> (i32, i32, i32, i32) {
    %c0_i32 = arith.constant 0 : i32
    %c0_i32_0 = arith.constant 0 : i32
    %c0_i32_1 = arith.constant 0 : i32
    %c0_i32_2 = arith.constant 0 : i32
    %c0_i32_3 = arith.constant 0 : i32
    return %c0_i32, %c0_i32_0, %c0_i32_1, %c0_i32_2 : i32, i32, i32, i32
  }
  func.func @transform_3(%arg0: i32) -> (i32, i32) {
    %c0_i32 = arith.constant 0 : i32
    %c0_i32_0 = arith.constant 0 : i32
    %c0_i32_1 = arith.constant 0 : i32
    return %c0_i32, %c0_i32_0 : i32, i32
  }
  func.func @transform_4(%arg0: i32) -> (i32, i32) {
    %c0_i32 = arith.constant 0 : i32
    %c0_i32_0 = arith.constant 0 : i32
    %c0_i32_1 = arith.constant 0 : i32
    return %c0_i32, %c0_i32_0 : i32, i32
  }
  func.func @transform_5(%arg0: i32) -> (i32, i32) {
    %c0_i32 = arith.constant 0 : i32
    %c0_i32_0 = arith.constant 0 : i32
    %c0_i32_1 = arith.constant 0 : i32
    return %c0_i32, %c0_i32_0 : i32, i32
  }
  func.func @transform_6(%arg0: i32) -> (i32, i32) {
    %c0_i32 = arith.constant 0 : i32
    %c0_i32_0 = arith.constant 0 : i32
    %c0_i32_1 = arith.constant 0 : i32
    return %c0_i32, %c0_i32_0 : i32, i32
  }
  func.func @transform_7(%arg0: i32) -> (i32, i32) {
    %c0_i32 = arith.constant 0 : i32
    %c0_i32_0 = arith.constant 0 : i32
    return %c0_i32, %arg0 : i32, i32
  }
}

</mosaic_0001>

<bundles_post_ra>
// kernel: tpu_custom_call.1
= control target key start
LH: loop header
LB: loop body
LE: loop exit
PB: predicated region body
PF: predicated region fallthrough
CT: control target
= control target key end

     0   :  { %s5376_s0 = inlined_call_operand.vmem [shape: f32[128,512], index: 0, kind: input, shape index: {}]   ;;  %s5377_s1 = inlined_call_operand.vmem [shape: bf16[2,4,128,128], index: 1, kind: input, shape index: {}]   ;;  %s5378_s2 = inlined_call_operand.vmem [shape: f32[2,4,128,1], index: 2, kind: input, shape index: {}]   ;;  %s5379_s3 = inlined_call_operand.vmem [shape: bf16[128,128], index: 3, kind: input, shape index: {}]   ;;  %s5380_s4 = inlined_call_operand.vmem [shape: f32[128,1], index: 4, kind: input, shape index: {}]   ;;  %s5381_s5 = inlined_call_operand.vmem [shape: bf16[8,128], index: 5, kind: input, shape index: {}]   ;;  %s5382_s6 = inlined_call_operand.<no memory space> [shape: f32[1,1], index: 6, kind: input, shape index: {}]   ;;  %s5383_s7 = inlined_call_operand.hbm [shape: f32[1,512], index: 7, kind: output, shape index: {}]  }
   0x1   :  { %v12_v0 = vstv %s5382_s6 }
   0x2   :  { %13 = vst [vmem:[#allocation2] sm:$0x1] %v12_v0 }
   0x3   :  { %14 = vsyncpa [#allocation5], 0 }
   0x4   :  { %16 = vsyncpa [#allocation5 + $0x1], 0  ;;  %s4217_s26 = smov 0   ;;  %s4219_s27 = smov 0  }
   0x5   :  { %s4221_s28 = smov 0   ;;  %s4223_s29 = smov 0  }
   0x6 LB: > { %s3343_s6 = sadd.s32 4294967295, %s4169_s29   ;;  %s3344_s30 = sadd.s32 4294967294, %s4169_s29   ;;  %s4169_s29 = sphi %s4223_s29, %s5389_s29   ;;  %s4165_s28 = sphi %s4221_s28, %s5388_s28   ;;  %s4161_s27 = sphi %s4219_s27, %s5387_s27   ;;  %s4157_s26 = sphi %s4217_s26, %s5386_s26  }
   0x7   : > { %s4240_s8 = sadd.s32 1, %s4169_s29   ;;  %s29_s9 = sadd.s32 1, %s4165_s28 }
   0x8   : > { %s26_s10 = ssub.s32 %s4169_s29, %s4240_s8  ;;  %p36_p0 = scmp.ne.s32.totalorder %s4165_s28, %s4161_s27 }
   0x9   : > { %p27_p1 = scmp.eq.s32.totalorder %s26_s10, 0  ;;  %p37_p2 = scmp.eq.s32.totalorder %s4169_s29, 0 }
   0xa   : > { %p192_p3 = scmp.eq.s32.totalorder %s3343_s6, 1  ;;  %p197_p4 = scmp.ne.s32.totalorder %s4161_s27, %s4157_s26 }
   0xb   : > { %s4253_s11 = scalar_select %p27_p1, %s4165_s28, %s29_s9  }
   0xc   : > { %p38_p5 = por %p37_p2, %p36_p0  ;;  %p4255_p6 = por %p192_p3, %p36_p0 }
   0xd   : > { %p198_p7 = scmp.eq.s32.totalorder %s3344_s30, 1  ;;  %p3346_p9 = scmp.ge.s32.totalorder %s4169_s29, 2 }
   0xf   : > { %p4259_p8 = por %p198_p7, %p197_p4  ;;  %232 = sbr.rel (%p3346_p9) target bundleno = 42 (0x2a), region = 40 }
  0x16   : > { %235 = sbr.rel (!%p38_p5) target bundleno = 42 (0x2a), region = 44  ;;  %s237_s14 = sand.u32 (%p38_p5), 1, %s4165_s28  }
  0x17   : > { %s3654_s15 = sshll.u32 (%p38_p5), %s4169_s29, 4  ;;  %s3347_s16 = sshll.u32 (%p38_p5), %s237_s14, 8 }
  0x18   : > { %s4271_s19 = scalar_lea.vmem (%p38_p5), %s5376_s0, %s3654_s15  ;;  %s4276_s20 = scalar_lea.vmem (%p38_p5), [#allocation3], %s3347_s16 }
  0x19   : > { %v255_v1 = vld [vmem:[%s4271_s19] sm:$0xff] (%p38_p5)  ;;  %v257_v2 = vld [vmem:[%s4271_s19 + $0x8] sm:$0xff] (%p38_p5) }
  0x1a   : > { %v259_v3 = vld [vmem:[%s4271_s19 + $0x20] sm:$0xff] (%p38_p5)  ;;  %256 = vst [vmem:[%s4276_s20] sm:$0xff] (%p38_p5), %v255_v1  ;;  %258 = vst [vmem:[%s4276_s20 + $0x8] sm:$0xff] (%p38_p5), %v257_v2  ;;  %v261_v4 = vld [vmem:[%s4271_s19 + $0x28] sm:$0xff] (%p38_p5) }
  0x1b   : > { %260 = vst [vmem:[%s4276_s20 + $0x10] sm:$0xff] (%p38_p5), %v259_v3  ;;  %v263_v5 = vld [vmem:[%s4271_s19 + $0x40] sm:$0xff] (%p38_p5)  ;;  %v265_v6 = vld [vmem:[%s4271_s19 + $0x48] sm:$0xff] (%p38_p5)  ;;  %262 = vst [vmem:[%s4276_s20 + $0x18] sm:$0xff] (%p38_p5), %v261_v4 }
  0x1c   : > { %264 = vst [vmem:[%s4276_s20 + $0x20] sm:$0xff] (%p38_p5), %v263_v5  ;;  %266 = vst [vmem:[%s4276_s20 + $0x28] sm:$0xff] (%p38_p5), %v265_v6  ;;  %v267_v7 = vld [vmem:[%s4271_s19 + $0x60] sm:$0xff] (%p38_p5)  ;;  %v269_v8 = vld [vmem:[%s4271_s19 + $0x68] sm:$0xff] (%p38_p5) }
  0x1d   : > { %v271_v9 = vld [vmem:[%s4271_s19 + $0x80] sm:$0xff]  ;;  %268 = vst [vmem:[%s4276_s20 + $0x30] sm:$0xff] %v267_v7  ;;  %270 = vst [vmem:[%s4276_s20 + $0x38] sm:$0xff] %v269_v8  ;;  %v273_v10 = vld [vmem:[%s4271_s19 + $0x88] sm:$0xff] }
  0x1e   : > { %272 = vst [vmem:[%s4276_s20 + $0x40] sm:$0xff] %v271_v9  ;;  %v275_v11 = vld [vmem:[%s4271_s19 + $0xa0] sm:$0xff]  ;;  %v277_v12 = vld [vmem:[%s4271_s19 + $0xa8] sm:$0xff]  ;;  %274 = vst [vmem:[%s4276_s20 + $0x48] sm:$0xff] %v273_v10 }
  0x1f   : > { %276 = vst [vmem:[%s4276_s20 + $0x50] sm:$0xff] %v275_v11  ;;  %278 = vst [vmem:[%s4276_s20 + $0x58] sm:$0xff] %v277_v12  ;;  %v279_v13 = vld [vmem:[%s4271_s19 + $0xc0] sm:$0xff]  ;;  %v281_v14 = vld [vmem:[%s4271_s19 + $0xc8] sm:$0xff] }
  0x20   : > { %v283_v15 = vld [vmem:[%s4271_s19 + $0xe0] sm:$0xff]  ;;  %280 = vst [vmem:[%s4276_s20 + $0x60] sm:$0xff] %v279_v13  ;;  %282 = vst [vmem:[%s4276_s20 + $0x68] sm:$0xff] %v281_v14  ;;  %v285_v16 = vld [vmem:[%s4271_s19 + $0xe8] sm:$0xff] }
  0x21   : > { %284 = vst [vmem:[%s4276_s20 + $0x70] sm:$0xff] %v283_v15  ;;  %v287_v17 = vld [vmem:[%s4271_s19 + $0x100] sm:$0xff]  ;;  %v289_v18 = vld [vmem:[%s4271_s19 + $0x108] sm:$0xff]  ;;  %286 = vst [vmem:[%s4276_s20 + $0x78] sm:$0xff] %v285_v16 }
  0x22   : > { %288 = vst [vmem:[%s4276_s20 + $0x80] sm:$0xff] %v287_v17  ;;  %290 = vst [vmem:[%s4276_s20 + $0x88] sm:$0xff] %v289_v18  ;;  %v291_v19 = vld [vmem:[%s4271_s19 + $0x120] sm:$0xff]  ;;  %v293_v20 = vld [vmem:[%s4271_s19 + $0x128] sm:$0xff] }
  0x23   : > { %v295_v21 = vld [vmem:[%s4271_s19 + $0x140] sm:$0xff]  ;;  %292 = vst [vmem:[%s4276_s20 + $0x90] sm:$0xff] %v291_v19  ;;  %294 = vst [vmem:[%s4276_s20 + $0x98] sm:$0xff] %v293_v20  ;;  %v297_v22 = vld [vmem:[%s4271_s19 + $0x148] sm:$0xff] }
  0x24   : > { %296 = vst [vmem:[%s4276_s20 + $0xa0] sm:$0xff] %v295_v21  ;;  %v299_v23 = vld [vmem:[%s4271_s19 + $0x160] sm:$0xff]  ;;  %v301_v24 = vld [vmem:[%s4271_s19 + $0x168] sm:$0xff]  ;;  %298 = vst [vmem:[%s4276_s20 + $0xa8] sm:$0xff] %v297_v22 }
  0x25   : > { %300 = vst [vmem:[%s4276_s20 + $0xb0] sm:$0xff] %v299_v23  ;;  %302 = vst [vmem:[%s4276_s20 + $0xb8] sm:$0xff] %v301_v24  ;;  %v303_v25 = vld [vmem:[%s4271_s19 + $0x180] sm:$0xff]  ;;  %v305_v26 = vld [vmem:[%s4271_s19 + $0x188] sm:$0xff] }
  0x26   : > { %v307_v27 = vld [vmem:[%s4271_s19 + $0x1a0] sm:$0xff]  ;;  %304 = vst [vmem:[%s4276_s20 + $0xc0] sm:$0xff] %v303_v25  ;;  %306 = vst [vmem:[%s4276_s20 + $0xc8] sm:$0xff] %v305_v26  ;;  %v309_v28 = vld [vmem:[%s4271_s19 + $0x1a8] sm:$0xff] }
  0x27   : > { %308 = vst [vmem:[%s4276_s20 + $0xd0] sm:$0xff] %v307_v27  ;;  %v311_v29 = vld [vmem:[%s4271_s19 + $0x1c0] sm:$0xff]  ;;  %v313_v30 = vld [vmem:[%s4271_s19 + $0x1c8] sm:$0xff]  ;;  %310 = vst [vmem:[%s4276_s20 + $0xd8] sm:$0xff] %v309_v28 }
  0x28   : > { %312 = vst [vmem:[%s4276_s20 + $0xe0] sm:$0xff] %v311_v29  ;;  %314 = vst [vmem:[%s4276_s20 + $0xe8] sm:$0xff] %v313_v30  ;;  %v315_v31 = vld [vmem:[%s4271_s19 + $0x1e0] sm:$0xff]  ;;  %v317_v32 = vld [vmem:[%s4271_s19 + $0x1e8] sm:$0xff] }
  0x29   : > { %316 = vst [vmem:[%s4276_s20 + $0xf0] sm:$0xff] %v315_v31  ;;  %318 = vst [vmem:[%s4276_s20 + $0xf8] sm:$0xff] %v317_v32 }
  0x2a PF: > { %p3350_p10 = scmp.ge.s32.totalorder %s4169_s29, 1  ;;  %p323_p11 = scmp.lt.s32.totalorder %s4169_s29, 3 }
  0x2c   : > { %p324_p12 = pnand %p3350_p10, %p323_p11 }
  0x2d   : > { %v465_v33 = vld [vmem:[%s5378_s2 + $0x10] sm:$0xff] (!%p324_p12)  ;;  %v463_v34 = vld [vmem:[%s5378_s2] sm:$0xff] (!%p324_p12)  ;;  %s4348_s25 = sand.u32 (!%p324_p12), 1, %s4161_s27   ;;  %v4171_v35 = vmov (!%p324_p12), 0   ;;  %v466_v36 = vld [vmem:[%s5378_s2 + $0x18] sm:$0xff] (!%p324_p12) }
  0x2e   : > { %327 = sbr.rel (%p324_p12) target bundleno = 2874 (0xb3a), region = 67  ;;  %3714 = vset.pattern.permute.xlu1 (!%p324_p12), %v4171_v35  ;;  %3713 = vset.pattern.permute.xlu0 (!%p324_p12), %v4171_v35  ;;  %s3351_s30 = sshll.u32 (!%p324_p12), %s4348_s25, 8  ;;  %v464_v37 = vld [vmem:[%s5378_s2 + $0x8] sm:$0xff] (!%p324_p12)  ;;  %v467_v52 = vld [vmem:[%s5378_s2 + $0x20] sm:$0xff] (!%p324_p12)  ;;  %v470_v59 = vld [vmem:[%s5378_s2 + $0x38] sm:$0xff] (!%p324_p12) }
  0x2f   : > { %558 = vperm.xlu1 (!%p324_p12), %3714, %v465_v33   ;;  %548 = vperm.xlu0 (!%p324_p12), %3713, %v463_v34   ;;  %s4359_s16 = scalar_lea.vmem (!%p324_p12), [#allocation3], %s3351_s30  ;;  %v468_v51 = vld [vmem:[%s5378_s2 + $0x28] sm:$0xff] (!%p324_p12)  ;;  %v469_v60 = vld [vmem:[%s5378_s2 + $0x30] sm:$0xff] (!%p324_p12)  ;;  %v471_v4 = vld [vmem:[%s5378_s2 + $0x40] sm:$0xff] (!%p324_p12)  ;;  %s3352_s24 = sshll.u32 (!%p324_p12), %s4348_s25, 1 }
  0x30   : > { %v365_v38 = vld [vmem:[%s4359_s16 + $0x8] sm:$0xff] (!%p324_p12)  ;;  %v367_v39 = vld [vmem:[%s4359_s16 + $0x18] sm:$0xff] (!%p324_p12)  ;;  %v364_v40 = vld [vmem:[%s4359_s16] sm:$0xff] (!%p324_p12)  ;;  %706 = vmatprep.mubr.bf16.mxu0 (!%p324_p12), %v4171_v35  ;;  %746 = vmatprep.mubr.bf16.mxu1 (!%p324_p12), %v4171_v35  ;;  %s3655_s30 = sshll.u32 (!%p324_p12), %s3343_s6, 5  ;;  %s360_s9 = scalar_lea.vmem (!%p324_p12), [#allocation4], %s3352_s24 }
  0x31   : > { %v531_v41 = vpack.c.bf16 (!%p324_p12), %v367_v39, %v365_v38  ;;  %v366_v42 = vld [vmem:[%s4359_s16 + $0x10] sm:$0xff] (!%p324_p12)  ;;  %v369_v43 = vld [vmem:[%s4359_s16 + $0x28] sm:$0xff] (!%p324_p12)  ;;  %v371_v44 = vld [vmem:[%s4359_s16 + $0x38] sm:$0xff] (!%p324_p12)  ;;  %s3279_s10 = sshll.u32 (!%p324_p12), %s360_s9, 4  ;;  %s5332_s17 = scalar_lea.hbm (!%p324_p12), %s5383_s7, %s3655_s30  ;;  %s5334_s10 = int_to_ptr.vmem [resolvable:$true] %s3279_s10 }
  0x32   : > { %v530_v45 = vpack.c.bf16 (!%p324_p12), %v366_v42, %v364_v40  ;;  %v533_v46 = vpack.c.bf16 (!%p324_p12), %v371_v44, %v369_v43  ;;  %v368_v47 = vld [vmem:[%s4359_s16 + $0x20] sm:$0xff] (!%p324_p12)  ;;  %v370_v48 = vld [vmem:[%s4359_s16 + $0x30] sm:$0xff] (!%p324_p12)  ;;  %v373_v49 = vld [vmem:[%s4359_s16 + $0x48] sm:$0xff] (!%p324_p12)  ;;  %s3265_s18 = scalar_lea.sflag (!%p324_p12), [#allocation5], %s4348_s25  ;;  %s4107_s19 = scalar_lea.vmem (!%p324_p12), %s5334_s10, 32 }
  0x33   : > { %563 = vperm.xlu1 (!%p324_p12), %3714, %v466_v36   ;;  %553 = vperm.xlu0 (!%p324_p12), %3713, %v464_v37   ;;  %v375_v50 = vld [vmem:[%s4359_s16 + $0x58] sm:$0xff] (!%p324_p12)  ;;  %v532_v53 = vpack.c.bf16 (!%p324_p12), %v370_v48, %v368_v47  ;;  %v372_v55 = vld [vmem:[%s4359_s16 + $0x40] sm:$0xff] (!%p324_p12)  ;;  %v374_v56 = vld [vmem:[%s4359_s16 + $0x50] sm:$0xff] (!%p324_p12)  ;;  %p4108_p13 = scmp.ne.s32.totalorder (!%p324_p12), %s5334_s10, %s4107_s19  ;;  %s4173_s6 = smov (!%p324_p12), [#allocation4]  }
  0x34   : > { %674 = vmatprep.subr.bf16.mxu0 (!%p324_p12), %v531_v41  ;;  %3656 = vmatprep.subr.bf16.mxu1 (!%p324_p12), %v531_v41  ;;  %v535_v54 = vpack.c.bf16 (!%p324_p12), %v375_v50, %v373_v49  ;;  %v377_v57 = vld [vmem:[%s4359_s16 + $0x68] sm:$0xff] (!%p324_p12)  ;;  %v379_v58 = vld [vmem:[%s4359_s16 + $0x78] sm:$0xff] (!%p324_p12)  ;;  %v534_v61 = vpack.c.bf16 (!%p324_p12), %v374_v56, %v372_v55  ;;  %v376_v63 = vld [vmem:[%s4359_s16 + $0x60] sm:$0xff] (!%p324_p12)  ;;  %s4111_s20 = sshll.u32 (!%p324_p12), %s4173_s6, 4  ;;  %s4112_s20 = int_to_ptr.vmem [resolvable:$false] %s4111_s20 }
  0x35   : > { %675 = vmatpush1.bf16.msra.mxu0 %v530_v45  ;;  %3664 = vmatpush1.bf16.msra.mxu1 %v530_v45  ;;  %v537_v62 = vpack.c.bf16 %v379_v58, %v377_v57  ;;  %v378_v0 = vld [vmem:[%s4359_s16 + $0x70] sm:$0xff]  ;;  %v381_v1 = vld [vmem:[%s4359_s16 + $0x88] sm:$0xff]  ;;  %v383_v2 = vld [vmem:[%s4359_s16 + $0x98] sm:$0xff]  ;;  %p4109_p0 = pnand %p4108_p13, %p4255_p6  ;;  %p4114_p2 = scmp.lt.s32.totalorder %s5334_s10, %s4112_s20 }
  0x36   : > { %676 = vmatprep.subr.bf16.mxu0 %v533_v46  ;;  %3657 = vmatprep.subr.bf16.mxu1 %v533_v46  ;;  %v472_v3 = vld [vmem:[%s5378_s2 + $0x48] sm:$0xff]  ;;  %v536_v5 = vpack.c.bf16 %v378_v0, %v376_v63  ;;  %v382_v7 = vld [vmem:[%s4359_s16 + $0x90] sm:$0xff]  ;;  %v539_v8 = vpack.c.bf16 %v383_v2, %v381_v1  ;;  %v387_v10 = vld [vmem:[%s4359_s16 + $0xb8] sm:$0xff] }
  0x37   : > { %573 = vperm.xlu1 %3714, %v468_v51   ;;  %568 = vperm.xlu0 %3713, %v467_v52   ;;  %v380_v6 = vld [vmem:[%s4359_s16 + $0x80] sm:$0xff]  ;;  %v385_v9 = vld [vmem:[%s4359_s16 + $0xa8] sm:$0xff]  ;;  %v474_v11 = vld [vmem:[%s5378_s2 + $0x58] sm:$0xff]  ;;  %p4110_p1 = pneg %p4109_p0 }
  0x38   : > { %v473_v12 = vld [vmem:[%s5378_s2 + $0x50] sm:$0xff]  ;;  %v538_v13 = vpack.c.bf16 %v382_v7, %v380_v6  ;;  %v384_v14 = vld [vmem:[%s4359_s16 + $0xa0] sm:$0xff]  ;;  %v541_v15 = vpack.c.bf16 %v387_v10, %v385_v9  ;;  %v391_v18 = vld [vmem:[%s4359_s16 + $0xd8] sm:$0xff] }
  0x39   : > { %677 = vmatpush1.bf16.msra.mxu0 %v532_v53  ;;  %3665 = vmatpush1.bf16.msra.mxu1 %v532_v53  ;;  %v386_v16 = vld [vmem:[%s4359_s16 + $0xb0] sm:$0xff]  ;;  %v389_v17 = vld [vmem:[%s4359_s16 + $0xc8] sm:$0xff]  ;;  %v475_v20 = vld [vmem:[%s5378_s2 + $0x60] sm:$0xff] }
  0x3a   : > { %678 = vmatprep.subr.bf16.mxu0 %v535_v54  ;;  %3658 = vmatprep.subr.bf16.mxu1 %v535_v54  ;;  %v476_v19 = vld [vmem:[%s5378_s2 + $0x68] sm:$0xff]  ;;  %v540_v21 = vpack.c.bf16 %v386_v16, %v384_v14  ;;  %v543_v23 = vpack.c.bf16 %v391_v18, %v389_v17  ;;  %v390_v24 = vld [vmem:[%s4359_s16 + $0xd0] sm:$0xff]  ;;  %v395_v27 = vld [vmem:[%s4359_s16 + $0xf8] sm:$0xff] }
  0x3b   : > { %583 = vperm.xlu1 %3714, %v470_v59   ;;  %578 = vperm.xlu0 %3713, %v469_v60   ;;  %v388_v22 = vld [vmem:[%s4359_s16 + $0xc0] sm:$0xff]  ;;  %v478_v25 = vld [vmem:[%s5378_s2 + $0x78] sm:$0xff]  ;;  %v393_v26 = vld [vmem:[%s4359_s16 + $0xe8] sm:$0xff] }
  0x3c   : > { %v477_v28 = vld [vmem:[%s5378_s2 + $0x70] sm:$0xff]  ;;  %v542_v29 = vpack.c.bf16 %v390_v24, %v388_v22  ;;  %v545_v30 = vpack.c.bf16 %v395_v27, %v393_v26  ;;  %v392_v31 = vld [vmem:[%s4359_s16 + $0xe0] sm:$0xff]  ;;  %v3404_v37 = vld [vmem:[%s5378_s2 + $0x98] sm:$0xff] }
  0x3d   : > { %679 = vmatpush1.bf16.msra.mxu0 %v534_v61  ;;  %3666 = vmatpush1.bf16.msra.mxu1 %v534_v61  ;;  %v394_v32 = vld [vmem:[%s4359_s16 + $0xf0] sm:$0xff]  ;;  %v3402_v33 = vld [vmem:[%s5378_s2 + $0x88] sm:$0xff]  ;;  %v3401_v34 = vld [vmem:[%s5378_s2 + $0x80] sm:$0xff]  ;;  %s4113_s16 = scalar_lea.vmem %s4112_s20, 64 }
  0x3e   : > { %680 = vmatprep.subr.bf16.mxu0 %v537_v62  ;;  %3659 = vmatprep.subr.bf16.mxu1 %v537_v62  ;;  %v544_v36 = vpack.c.bf16 %v394_v32, %v392_v31  ;;  %v3403_v38 = vld [vmem:[%s5378_s2 + $0x90] sm:$0xff]  ;;  %v3715_v39 = vld [vmem:[%s5377_s1] sm:$0xff]   ;;  %v3406_v41 = vld [vmem:[%s5378_s2 + $0xa8] sm:$0xff]  ;;  %p4115_p3 = scmp.lt.s32.totalorder %s4113_s16, %s4107_s19 }
  0x3f   : > { %593 = vperm.xlu1 %3714, %v472_v3   ;;  %588 = vperm.xlu0 %3713, %v471_v4   ;;  %v3716_v40 = vld [vmem:[%s5377_s1 + $0x20] sm:$0xff]   ;;  %v3408_v43 = vld [vmem:[%s5378_s2 + $0xb8] sm:$0xff]  ;;  %v3407_v44 = vld [vmem:[%s5378_s2 + $0xb0] sm:$0xff] }
  0x40   : > { %v3405_v42 = vld [vmem:[%s5378_s2 + $0xa0] sm:$0xff]  ;;  %v3717_v45 = vld [vmem:[%s5377_s1 + $0x8] sm:$0xff]   ;;  %v3412_v49 = vld [vmem:[%s5378_s2 + $0xd8] sm:$0xff]  ;;  %p4116_p4 = por %p4115_p3, %p4114_p2 }
  0x41   : > { %681 = vmatpush1.bf16.msra.mxu0 %v536_v5  ;;  %3667 = vmatpush1.bf16.msra.mxu1 %v536_v5  ;;  %v3718_v46 = vld [vmem:[%s5377_s1 + $0x28] sm:$0xff]   ;;  %v3409_v48 = vld [vmem:[%s5378_s2 + $0xc0] sm:$0xff]  ;;  %v3411_v50 = vld [vmem:[%s5378_s2 + $0xd0] sm:$0xff] }
  0x42   : > { %682 = vmatprep.subr.bf16.mxu0 %v539_v8  ;;  %3660 = vmatprep.subr.bf16.mxu1 %v539_v8  ;;  %v3410_v47 = vld [vmem:[%s5378_s2 + $0xc8] sm:$0xff]  ;;  %v3719_v51 = vld [vmem:[%s5377_s1 + $0x10] sm:$0xff]   ;;  %v3413_v54 = vld [vmem:[%s5378_s2 + $0xe0] sm:$0xff]  ;;  %p4117_p5 = pnand %p4116_p4, %p4110_p1 }
  0x43   : > { %603 = vperm.xlu1 %3714, %v474_v11   ;;  %598 = vperm.xlu0 %3713, %v473_v12   ;;  %v3720_v52 = vld [vmem:[%s5377_s1 + $0x30] sm:$0xff]   ;;  %v3414_v53 = vld [vmem:[%s5378_s2 + $0xe8] sm:$0xff]  ;;  %v3416_v55 = vld [vmem:[%s5378_s2 + $0xf8] sm:$0xff] }
  0x44   : > { %v3415_v56 = vld [vmem:[%s5378_s2 + $0xf0] sm:$0xff]  ;;  %v3721_v57 = vld [vmem:[%s5377_s1 + $0x18] sm:$0xff]   ;;  %v3418_v59 = vld [vmem:[%s5378_s2 + $0x108] sm:$0xff] }
  0x45   : > { %683 = vmatpush1.bf16.msra.mxu0 %v538_v13  ;;  %3668 = vmatpush1.bf16.msra.mxu1 %v538_v13  ;;  %v3722_v58 = vld [vmem:[%s5377_s1 + $0x38] sm:$0xff]   ;;  %v3417_v60 = vld [vmem:[%s5378_s2 + $0x100] sm:$0xff]  ;;  %v3419_v62 = vld [vmem:[%s5378_s2 + $0x110] sm:$0xff] }
  0x46   : > { %684 = vmatprep.subr.bf16.mxu0 %v541_v15  ;;  %3661 = vmatprep.subr.bf16.mxu1 %v541_v15  ;;  %v3420_v61 = vld [vmem:[%s5378_s2 + $0x118] sm:$0xff]  ;;  %v3422_v63 = vld [vmem:[%s5378_s2 + $0x128] sm:$0xff]  ;;  %v3421_v0 = vld [vmem:[%s5378_s2 + $0x120] sm:$0xff] }
  0x47   : > { %613 = vperm.xlu1 %3714, %v476_v19   ;;  %608 = vperm.xlu0 %3713, %v475_v20   ;;  %v3424_v1 = vld [vmem:[%s5378_s2 + $0x138] sm:$0xff]  ;;  %v3423_v2 = vld [vmem:[%s5378_s2 + $0x130] sm:$0xff]  ;;  %v3426_v3 = vld [vmem:[%s5378_s2 + $0x148] sm:$0xff] }
  0x48   : > { %v3425_v4 = vld [vmem:[%s5378_s2 + $0x140] sm:$0xff]  ;;  %v3428_v5 = vld [vmem:[%s5378_s2 + $0x158] sm:$0xff]  ;;  %v3427_v6 = vld [vmem:[%s5378_s2 + $0x150] sm:$0xff] }
  0x49   : > { %685 = vmatpush1.bf16.msra.mxu0 %v540_v21  ;;  %3669 = vmatpush1.bf16.msra.mxu1 %v540_v21  ;;  %v3430_v7 = vld [vmem:[%s5378_s2 + $0x168] sm:$0xff]  ;;  %v3429_v8 = vld [vmem:[%s5378_s2 + $0x160] sm:$0xff]  ;;  %v3432_v9 = vld [vmem:[%s5378_s2 + $0x178] sm:$0xff] }
  0x4a   : > { %686 = vmatprep.subr.bf16.mxu0 %v543_v23  ;;  %3662 = vmatprep.subr.bf16.mxu1 %v543_v23  ;;  %v3431_v10 = vld [vmem:[%s5378_s2 + $0x170] sm:$0xff]  ;;  %v3434_v11 = vld [vmem:[%s5378_s2 + $0x188] sm:$0xff]  ;;  %v3433_v12 = vld [vmem:[%s5378_s2 + $0x180] sm:$0xff] }
  0x4b   : > { %623 = vperm.xlu1 %3714, %v478_v25   ;;  %618 = vperm.xlu0 %3713, %v477_v28   ;;  %v3436_v13 = vld [vmem:[%s5378_s2 + $0x198] sm:$0xff]  ;;  %v3435_v14 = vld [vmem:[%s5378_s2 + $0x190] sm:$0xff]  ;;  %v3438_v15 = vld [vmem:[%s5378_s2 + $0x1a8] sm:$0xff] }
  0x4c   : > { %v3437_v16 = vld [vmem:[%s5378_s2 + $0x1a0] sm:$0xff]  ;;  %v3440_v17 = vld [vmem:[%s5378_s2 + $0x1b8] sm:$0xff]  ;;  %v3439_v18 = vld [vmem:[%s5378_s2 + $0x1b0] sm:$0xff] }
  0x4d   : > { %687 = vmatpush1.bf16.msra.mxu0 %v542_v29  ;;  %3670 = vmatpush1.bf16.msra.mxu1 %v542_v29  ;;  %v3442_v19 = vld [vmem:[%s5378_s2 + $0x1c8] sm:$0xff]  ;;  %v3441_v20 = vld [vmem:[%s5378_s2 + $0x1c0] sm:$0xff]  ;;  %v3444_v21 = vld [vmem:[%s5378_s2 + $0x1d8] sm:$0xff] }
  0x4e   : > { %688 = vmatprep.subr.bf16.mxu0 %v545_v30  ;;  %3663 = vmatprep.subr.bf16.mxu1 %v545_v30  ;;  %v3443_v22 = vld [vmem:[%s5378_s2 + $0x1d0] sm:$0xff]  ;;  %v3446_v23 = vld [vmem:[%s5378_s2 + $0x1e8] sm:$0xff]  ;;  %v3445_v24 = vld [vmem:[%s5378_s2 + $0x1e0] sm:$0xff] }
  0x4f   : > { %842 = vperm.xlu1 %3714, %v3402_v33   ;;  %837 = vperm.xlu0 %3713, %v3401_v34   ;;  %v3448_v25 = vld [vmem:[%s5378_s2 + $0x1f8] sm:$0xff]  ;;  %v3447_v26 = vld [vmem:[%s5378_s2 + $0x1f0] sm:$0xff]  ;;  %v3546_v27 = vld [vmem:[%s5378_s2 + $0x208] sm:$0xff] }
  0x50   : > { %v3545_v28 = vld [vmem:[%s5378_s2 + $0x200] sm:$0xff]  ;;  %v3548_v29 = vld [vmem:[%s5378_s2 + $0x218] sm:$0xff]  ;;  %v3547_v30 = vld [vmem:[%s5378_s2 + $0x210] sm:$0xff] }
  0x51   : > { %689 = vmatpush1.bf16.msra.mxu0 %v544_v36  ;;  %3671 = vmatpush1.bf16.msra.mxu1 %v544_v36  ;;  %v3550_v31 = vld [vmem:[%s5378_s2 + $0x228] sm:$0xff]  ;;  %v3549_v32 = vld [vmem:[%s5378_s2 + $0x220] sm:$0xff]  ;;  %v3552_v33 = vld [vmem:[%s5378_s2 + $0x238] sm:$0xff] }
  0x52   : > { %v3551_v34 = vld [vmem:[%s5378_s2 + $0x230] sm:$0xff]  ;;  %v3554_v36 = vld [vmem:[%s5378_s2 + $0x248] sm:$0xff] }
  0x53   : > { %852 = vperm.xlu1 %3714, %v3404_v37   ;;  %847 = vperm.xlu0 %3713, %v3403_v38   ;;  %v3553_v37 = vld [vmem:[%s5378_s2 + $0x240] sm:$0xff] }
  0x54   : > { %707 = vmatmul.mubr.bf16.vlgmr.msra.gmra.mrb[0].mxu0 %v3715_v39  ;;  %747 = vmatmul.mubr.bf16.vlgmr.msra.gmra.mrb[0].mxu1 %v3716_v40  ;;  %v3556_v40 = vld [vmem:[%s5378_s2 + $0x258] sm:$0xff] }
  0x55   : > { %716 = vmatprep.mubr.bf16.mxu0 %v4171_v35  ;;  %756 = vmatprep.mubr.bf16.mxu1 %v4171_v35 }
  0x57   : > { %862 = vperm.xlu1 %3714, %v3406_v41   ;;  %857 = vperm.xlu0 %3713, %v3405_v42   ;;  %v3555_v41 = vld [vmem:[%s5378_s2 + $0x250] sm:$0xff]  ;;  %v3558_v42 = vld [vmem:[%s5378_s2 + $0x268] sm:$0xff] }
  0x5b   : > { %872 = vperm.xlu1 %3714, %v3408_v43   ;;  %867 = vperm.xlu0 %3713, %v3407_v44   ;;  %v3557_v43 = vld [vmem:[%s5378_s2 + $0x260] sm:$0xff] }
  0x5c   : > { %717 = vmatmul.mubr.bf16.gmra.mrb[4].mxu0 %v3717_v45  ;;  %757 = vmatmul.mubr.bf16.gmra.mrb[4].mxu1 %v3718_v46  ;;  %v3560_v46 = vld [vmem:[%s5378_s2 + $0x278] sm:$0xff] }
  0x5d   : > { %726 = vmatprep.mubr.bf16.mxu0 %v4171_v35  ;;  %766 = vmatprep.mubr.bf16.mxu1 %v4171_v35 }
  0x5f   : > { %882 = vperm.xlu1 %3714, %v3410_v47   ;;  %877 = vperm.xlu0 %3713, %v3409_v48   ;;  %v3559_v47 = vld [vmem:[%s5378_s2 + $0x270] sm:$0xff] }
  0x63   : > { %892 = vperm.xlu1 %3714, %v3412_v49   ;;  %887 = vperm.xlu0 %3713, %v3411_v50   ;;  %v3562_v50 = vld [vmem:[%s5378_s2 + $0x288] sm:$0xff] }
  0x64   : > { %727 = vmatmul.mubr.bf16.gmra.mrb[8].mxu0 %v3719_v51  ;;  %767 = vmatmul.mubr.bf16.gmra.mrb[8].mxu1 %v3720_v52  ;;  %v3561_v51 = vld [vmem:[%s5378_s2 + $0x280] sm:$0xff]  ;;  %v3564_v52 = vld [vmem:[%s5378_s2 + $0x298] sm:$0xff] }
  0x65   : > { %736 = vmatprep.mubr.bf16.mxu0 %v4171_v35  ;;  %776 = vmatprep.mubr.bf16.mxu1 %v4171_v35 }
  0x67   : > { %902 = vperm.xlu1 %3714, %v3414_v53   ;;  %897 = vperm.xlu0 %3713, %v3413_v54   ;;  %v3563_v53 = vld [vmem:[%s5378_s2 + $0x290] sm:$0xff] }
  0x6b   : > { %912 = vperm.xlu1 %3714, %v3416_v55   ;;  %907 = vperm.xlu0 %3713, %v3415_v56   ;;  %v3566_v56 = vld [vmem:[%s5378_s2 + $0x2a8] sm:$0xff] }
  0x6c   : > { %737 = vmatmul.mubr.bf16.gmra.mrb[12].mxu0 %v3721_v57  ;;  %777 = vmatmul.mubr.bf16.gmra.mrb[12].mxu1 %v3722_v58  ;;  %v3565_v57 = vld [vmem:[%s5378_s2 + $0x2a0] sm:$0xff] }
  0x6d   : > { %995 = vmatprep.mubr.bf16.mxu1 %v4171_v35  ;;  %1252 = vmatprep.mubr.bf16.mxu0 %v4171_v35 }
  0x6f   : > { %1099 = vperm.xlu1 %3714, %v3418_v59   ;;  %1094 = vperm.xlu0 %3713, %v3417_v60   ;;  %v3568_v60 = vld [vmem:[%s5378_s2 + $0x2b8] sm:$0xff] }
  0x73   : > { %1109 = vperm.xlu1 %3714, %v3420_v61   ;;  %1104 = vperm.xlu0 %3713, %v3419_v62   ;;  %v3567_v61 = vld [vmem:[%s5378_s2 + $0x2b0] sm:$0xff]  ;;  %v3570_v62 = vld [vmem:[%s5378_s2 + $0x2c8] sm:$0xff] }
  0x77   : > { %1119 = vperm.xlu1 %3714, %v3422_v63   ;;  %1114 = vperm.xlu0 %3713, %v3421_v0   ;;  %v3569_v63 = vld [vmem:[%s5378_s2 + $0x2c0] sm:$0xff] }
  0x7b   : > { %1129 = vperm.xlu1 %3714, %v3424_v1   ;;  %1124 = vperm.xlu0 %3713, %v3423_v2   ;;  %v3572_v2 = vld [vmem:[%s5378_s2 + $0x2d8] sm:$0xff] }
  0x7f   : > { %1139 = vperm.xlu1 %3714, %v3426_v3   ;;  %1134 = vperm.xlu0 %3713, %v3425_v4   ;;  %v3571_v3 = vld [vmem:[%s5378_s2 + $0x2d0] sm:$0xff] }
  0x83   : > { %1149 = vperm.xlu1 %3714, %v3428_v5   ;;  %1144 = vperm.xlu0 %3713, %v3427_v6   ;;  %v3574_v6 = vld [vmem:[%s5378_s2 + $0x2e8] sm:$0xff] }
  0x87   : > { %1159 = vperm.xlu1 %3714, %v3430_v7   ;;  %1154 = vperm.xlu0 %3713, %v3429_v8   ;;  %v3573_v7 = vld [vmem:[%s5378_s2 + $0x2e0] sm:$0xff]  ;;  %v3576_v8 = vld [vmem:[%s5378_s2 + $0x2f8] sm:$0xff] }
  0x8b   : > { %1169 = vperm.xlu1 %3714, %v3432_v9   ;;  %1164 = vperm.xlu0 %3713, %v3431_v10   ;;  %v3575_v9 = vld [vmem:[%s5378_s2 + $0x2f0] sm:$0xff] }
  0x8f   : > { %1388 = vperm.xlu1 %3714, %v3434_v11   ;;  %1383 = vperm.xlu0 %3713, %v3433_v12   ;;  %v3578_v12 = vld [vmem:[%s5378_s2 + $0x308] sm:$0xff] }
  0x93   : > { %1398 = vperm.xlu1 %3714, %v3436_v13   ;;  %1393 = vperm.xlu0 %3713, %v3435_v14   ;;  %v3577_v13 = vld [vmem:[%s5378_s2 + $0x300] sm:$0xff] }
  0x97   : > { %1408 = vperm.xlu1 %3714, %v3438_v15   ;;  %1403 = vperm.xlu0 %3713, %v3437_v16   ;;  %v3580_v16 = vld [vmem:[%s5378_s2 + $0x318] sm:$0xff] }
  0x9b   : > { %1418 = vperm.xlu1 %3714, %v3440_v17   ;;  %1413 = vperm.xlu0 %3713, %v3439_v18   ;;  %v3579_v17 = vld [vmem:[%s5378_s2 + $0x310] sm:$0xff]  ;;  %v3582_v18 = vld [vmem:[%s5378_s2 + $0x328] sm:$0xff] }
  0x9f   : > { %1428 = vperm.xlu1 %3714, %v3442_v19   ;;  %1423 = vperm.xlu0 %3713, %v3441_v20   ;;  %v3581_v19 = vld [vmem:[%s5378_s2 + $0x320] sm:$0xff] }
  0xa3   : > { %1438 = vperm.xlu1 %3714, %v3444_v21   ;;  %1433 = vperm.xlu0 %3713, %v3443_v22   ;;  %v3584_v22 = vld [vmem:[%s5378_s2 + $0x338] sm:$0xff] }
  0xa7   : > { %1448 = vperm.xlu1 %3714, %v3446_v23   ;;  %1443 = vperm.xlu0 %3713, %v3445_v24   ;;  %v3583_v23 = vld [vmem:[%s5378_s2 + $0x330] sm:$0xff] }
  0xab   : > { %1458 = vperm.xlu1 %3714, %v3448_v25   ;;  %1453 = vperm.xlu0 %3713, %v3447_v26   ;;  %v3586_v26 = vld [vmem:[%s5378_s2 + $0x348] sm:$0xff] }
  0xae   : > { %v4637_v38 = vpop.permute.xlu1 %558  ;;  %v4639_v39 = vpop.permute.xlu0 %548 }
  0xaf   : > { %1781 = vperm.xlu1 %3714, %v3546_v27   ;;  %1776 = vperm.xlu0 %3713, %v3545_v28   ;;  %v3585_v27 = vld [vmem:[%s5378_s2 + $0x340] sm:$0xff]  ;;  %v3588_v28 = vld [vmem:[%s5378_s2 + $0x358] sm:$0xff] }
  0xb2   : > { %v4653_v44 = vpop.permute.xlu1 %563  ;;  %v4655_v45 = vpop.permute.xlu0 %553 }
  0xb3   : > { %1791 = vperm.xlu1 %3714, %v3548_v29   ;;  %1786 = vperm.xlu0 %3713, %v3547_v30   ;;  %v3587_v29 = vld [vmem:[%s5378_s2 + $0x350] sm:$0xff] }
  0xb6   : > { %v4663_v48 = vpop.permute.xlu1 %573  ;;  %v4665_v49 = vpop.permute.xlu0 %568 }
  0xb7   : > { %1801 = vperm.xlu1 %3714, %v3550_v31   ;;  %1796 = vperm.xlu0 %3713, %v3549_v32   ;;  %v3590_v32 = vld [vmem:[%s5378_s2 + $0x368] sm:$0xff] }
  0xba   : > { %v4679_v54 = vpop.permute.xlu1 %583  ;;  %v4681_v55 = vpop.permute.xlu0 %578 }
  0xbb   : > { %1811 = vperm.xlu1 %3714, %v3552_v33   ;;  %1806 = vperm.xlu0 %3713, %v3551_v34   ;;  %v3589_v33 = vld [vmem:[%s5378_s2 + $0x360] sm:$0xff] }
  0xbe   : > { %v4689_v58 = vpop.permute.xlu1 %593  ;;  %v4691_v59 = vpop.permute.xlu0 %588 }
  0xbf   : > { %1821 = vperm.xlu1 %3714, %v3554_v36   ;;  %1816 = vperm.xlu0 %3713, %v3553_v37   ;;  %v3592_v37 = vld [vmem:[%s5378_s2 + $0x378] sm:$0xff] }
  0xc2   : > { %v4705_v0 = vpop.permute.xlu1 %603  ;;  %v4707_v1 = vpop.permute.xlu0 %598 }
  0xc3   : > { %1831 = vperm.xlu1 %3714, %v3556_v40   ;;  %1826 = vperm.xlu0 %3713, %v3555_v41   ;;  %v3591_v40 = vld [vmem:[%s5378_s2 + $0x370] sm:$0xff]  ;;  %v3594_v41 = vld [vmem:[%s5378_s2 + $0x388] sm:$0xff] }
  0xc6   : > { %v4715_v4 = vpop.permute.xlu1 %613  ;;  %v4717_v5 = vpop.permute.xlu0 %608 }
  0xc7   : > { %1841 = vperm.xlu1 %3714, %v3558_v42   ;;  %1836 = vperm.xlu0 %3713, %v3557_v43   ;;  %v3593_v42 = vld [vmem:[%s5378_s2 + $0x380] sm:$0xff] }
  0xca   : > { %v4731_v10 = vpop.permute.xlu1 %623  ;;  %v4733_v11 = vpop.permute.xlu0 %618 }
  0xcb   : > { %1851 = vperm.xlu1 %3714, %v3560_v46   ;;  %1846 = vperm.xlu0 %3713, %v3559_v47   ;;  %v3596_v47 = vld [vmem:[%s5378_s2 + $0x398] sm:$0xff] }
  0xce   : > { %v4741_v14 = vpop.permute.xlu1 %842  ;;  %v4743_v15 = vpop.permute.xlu0 %837 }
  0xcf   : > { %2070 = vperm.xlu1 %3714, %v3562_v50   ;;  %2065 = vperm.xlu0 %3713, %v3561_v51   ;;  %v3595_v50 = vld [vmem:[%s5378_s2 + $0x390] sm:$0xff] }
  0xd2   : > { %v4757_v20 = vpop.permute.xlu1 %852  ;;  %v4759_v21 = vpop.permute.xlu0 %847 }
  0xd3   : > { %2080 = vperm.xlu1 %3714, %v3564_v52   ;;  %2075 = vperm.xlu0 %3713, %v3563_v53   ;;  %v3598_v53 = vld [vmem:[%s5378_s2 + $0x3a8] sm:$0xff] }
  0xd6   : > { %v4767_v24 = vpop.permute.xlu1 %862  ;;  %v4769_v25 = vpop.permute.xlu0 %857 }
  0xd7   : > { %2090 = vperm.xlu1 %3714, %v3566_v56   ;;  %2085 = vperm.xlu0 %3713, %v3565_v57   ;;  %v3597_v56 = vld [vmem:[%s5378_s2 + $0x3a0] sm:$0xff]  ;;  %v3600_v57 = vld [vmem:[%s5378_s2 + $0x3b8] sm:$0xff] }
  0xda   : > { %v4783_v30 = vpop.permute.xlu1 %872  ;;  %v4785_v31 = vpop.permute.xlu0 %867 }
  0xdb   : > { %2100 = vperm.xlu1 %3714, %v3568_v60   ;;  %2095 = vperm.xlu0 %3713, %v3567_v61   ;;  %v3599_v60 = vld [vmem:[%s5378_s2 + $0x3b0] sm:$0xff] }
  0xde   : > { %v4793_v34 = vpop.permute.xlu1 %882  ;;  %v4795_v36 = vpop.permute.xlu0 %877 }
  0xdf   : > { %2110 = vperm.xlu1 %3714, %v3570_v62   ;;  %2105 = vperm.xlu0 %3713, %v3569_v63   ;;  %v3602_v63 = vld [vmem:[%s5378_s2 + $0x3c8] sm:$0xff] }
  0xe2   : > { %v4809_v43 = vpop.permute.xlu1 %892  ;;  %v4811_v46 = vpop.permute.xlu0 %887 }
  0xe3   : > { %2120 = vperm.xlu1 %3714, %v3572_v2   ;;  %2115 = vperm.xlu0 %3713, %v3571_v3   ;;  %v3601_v2 = vld [vmem:[%s5378_s2 + $0x3c0] sm:$0xff] }
  0xe6   : > { %v4819_v51 = vpop.permute.xlu1 %902  ;;  %v4821_v52 = vpop.permute.xlu0 %897 }
  0xe7   : > { %2130 = vperm.xlu1 %3714, %v3574_v6   ;;  %2125 = vperm.xlu0 %3713, %v3573_v7   ;;  %v3604_v7 = vld [vmem:[%s5378_s2 + $0x3d8] sm:$0xff] }
  0xea   : > { %v4835_v61 = vpop.permute.xlu1 %912  ;;  %v4837_v62 = vpop.permute.xlu0 %907 }
  0xeb   : > { %2140 = vperm.xlu1 %3714, %v3576_v8   ;;  %2135 = vperm.xlu0 %3713, %v3575_v9   ;;  %v3603_v8 = vld [vmem:[%s5378_s2 + $0x3d0] sm:$0xff]  ;;  %v3606_v9 = vld [vmem:[%s5378_s2 + $0x3e8] sm:$0xff] }
  0xee   : > { %v4845_v3 = vpop.permute.xlu1 %1099  ;;  %v4847_v6 = vpop.permute.xlu0 %1094 }
  0xef   : > { %2327 = vperm.xlu1 %3714, %v3578_v12   ;;  %2322 = vperm.xlu0 %3713, %v3577_v13   ;;  %v3605_v12 = vld [vmem:[%s5378_s2 + $0x3e0] sm:$0xff] }
  0xf2   : > { %v4861_v13 = vpop.permute.xlu1 %1109 }
  0xf3   : > { %2337 = vperm.xlu1 %3714, %v3580_v16   ;;  %2332 = vperm.xlu0 %3713, %v3579_v17   ;;  %v4863_v16 = vpop.permute.xlu0 %1104 }
  0xf7   : > { %2347 = vperm.xlu1 %3714, %v3582_v18   ;;  %2342 = vperm.xlu0 %3713, %v3581_v19  }
  0xfb   : > { %2357 = vperm.xlu1 %3714, %v3584_v22   ;;  %2352 = vperm.xlu0 %3713, %v3583_v23   ;;  %v3608_v23 = vld [vmem:[%s5378_s2 + $0x3f8] sm:$0xff] }
  0xff   : > { %2367 = vperm.xlu1 %3714, %v3586_v26   ;;  %2362 = vperm.xlu0 %3713, %v3585_v27   ;;  %v3607_v26 = vld [vmem:[%s5378_s2 + $0x3f0] sm:$0xff] }
 0x103   : > { %2377 = vperm.xlu1 %3714, %v3588_v28   ;;  %2372 = vperm.xlu0 %3713, %v3587_v29  }
 0x107   : > { %2387 = vperm.xlu1 %3714, %v3590_v32   ;;  %2382 = vperm.xlu0 %3713, %v3589_v33  }
 0x10b   : > { %2397 = vperm.xlu1 %3714, %v3592_v37   ;;  %2392 = vperm.xlu0 %3713, %v3591_v40  }
 0x10f   : > { %2616 = vperm.xlu1 %3714, %v3594_v41   ;;  %2611 = vperm.xlu0 %3713, %v3593_v42  }
 0x113   : > { %2626 = vperm.xlu1 %3714, %v3596_v47   ;;  %2621 = vperm.xlu0 %3713, %v3595_v50  }
 0x117   : > { %2636 = vperm.xlu1 %3714, %v3598_v53   ;;  %2631 = vperm.xlu0 %3713, %v3597_v56   ;;  %v2882_v53 = vld [vmem:[%s5380_s4] sm:$0xff] }
 0x11b   : > { %2646 = vperm.xlu1 %3714, %v3600_v57   ;;  %2641 = vperm.xlu0 %3713, %v3599_v60   ;;  %v4887_v57 = vpop.permute.xlu0 %1114 }
 0x11f   : > { %2656 = vperm.xlu1 %3714, %v3602_v63   ;;  %2651 = vperm.xlu0 %3713, %v3601_v2  }
 0x123   : > { %2666 = vperm.xlu1 %3714, %v3604_v7   ;;  %2661 = vperm.xlu0 %3713, %v3603_v8   ;;  %v2885_v7 = vld [vmem:[%s5380_s4 + $0x18] sm:$0xff] }
 0x127   : > { %v708_v17 = vpop.f32.mrb[0].mxu0  ;;  %2676 = vperm.xlu1 %3714, %v3606_v9   ;;  %2671 = vperm.xlu0 %3713, %v3605_v12   ;;  %v748_v18 = vpop.f32.mrb[0].mxu1 }
 0x128   : > { %v709_v19 = vadd.f32 %v708_v17, %v4639_v39  ;;  %v710_v22 = vpop.f32.mrb[1].mxu0  ;;  %v750_v27 = vpop.f32.mrb[1].mxu1  ;;  %v749_v40 = vadd.f32 %v748_v18, %v4691_v59 }
 0x129   : > { %v711_v28 = vadd.f32 %v710_v22, %v4639_v39  ;;  %v712_v29 = vpop.f32.mrb[2].mxu0  ;;  %v752_v32 = vpop.f32.mrb[2].mxu1  ;;  %v751_v42 = vadd.f32 %v750_v27, %v4691_v59  ;;  %v2883_v39 = vld [vmem:[%s5380_s4 + $0x8] sm:$0xff] }
 0x12a   : > { %3787 = vtanh.f32 %v709_v19  ;;  %v713_v33 = vadd.f32 %v712_v29, %v4655_v45  ;;  %v714_v37 = vpop.f32.mrb[3].mxu0  ;;  %v754_v47 = vpop.f32.mrb[3].mxu1  ;;  %v753_v50 = vadd.f32 %v752_v32, %v4689_v58 }
 0x12b   : > { %3789 = vtanh.f32 %v711_v28  ;;  %v715_v41 = vadd.f32 %v714_v37, %v4655_v45  ;;  %2686 = vperm.xlu1 %3714, %v3608_v23   ;;  %2681 = vperm.xlu0 %3713, %v3607_v26   ;;  %v755_v56 = vadd.f32 %v754_v47, %v4689_v58  ;;  %v4885_v45 = vpop.permute.xlu1 %1119  ;;  %v2884_v58 = vld [vmem:[%s5380_s4 + $0x10] sm:$0xff] }
 0x12c   : > { %3791 = vtanh.f32 %v713_v33 }
 0x12d   : > { %3793 = vtanh.f32 %v715_v41 }
 0x12e   : > { %3795 = vtanh.f32 %v749_v40 }
 0x12f   : > { %3797 = vtanh.f32 %v751_v42  ;;  %v718_v59 = vpop.f32.mrb[4].mxu0  ;;  %2905 = vperm.xlu1 %3714, %v2883_v39   ;;  %2900 = vperm.xlu0 %3713, %v2882_v53   ;;  %v758_v63 = vpop.f32.mrb[4].mxu1 }
 0x130   : > { %3799 = vtanh.f32 %v753_v50  ;;  %v719_v60 = vadd.f32 %v718_v59, %v4637_v38  ;;  %v720_v2 = vpop.f32.mrb[5].mxu0  ;;  %v759_v8 = vadd.f32 %v758_v63, %v4707_v1  ;;  %v760_v12 = vpop.f32.mrb[5].mxu1 }
 0x131   : > { %3801 = vtanh.f32 %v755_v56  ;;  %v721_v9 = vadd.f32 %v720_v2, %v4637_v38  ;;  %v722_v17 = vpop.f32.mrb[6].mxu0  ;;  %v761_v18 = vadd.f32 %v760_v12, %v4707_v1  ;;  %v762_v22 = vpop.f32.mrb[6].mxu1  ;;  %v2887_v38 = vld [vmem:[%s5380_s4 + $0x28] sm:$0xff]  ;;  %v2886_v1 = vld [vmem:[%s5380_s4 + $0x20] sm:$0xff] }
 0x132   : > { %3803 = vtanh.f32 %v719_v60  ;;  %v723_v19 = vadd.f32 %v722_v17, %v4653_v44  ;;  %v724_v23 = vpop.f32.mrb[7].mxu0  ;;  %v763_v26 = vadd.f32 %v762_v22, %v4705_v0  ;;  %v764_v27 = vpop.f32.mrb[7].mxu1 }
 0x133   : > { %3805 = vtanh.f32 %v759_v8  ;;  %2915 = vperm.xlu1 %3714, %v2885_v7   ;;  %2910 = vperm.xlu0 %3713, %v2884_v58   ;;  %v725_v29 = vadd.f32 %v724_v23, %v4653_v44  ;;  %v765_v33 = vadd.f32 %v764_v27, %v4705_v0  ;;  %v4909_v41 = vpop.permute.xlu1 %1129  ;;  %v4913_v50 = vpop.permute.xlu0 %1124  ;;  %v2889_v0 = vld [vmem:[%s5380_s4 + $0x38] sm:$0xff]  ;;  %v2888_v7 = vld [vmem:[%s5380_s4 + $0x30] sm:$0xff] }
 0x134   : > { %v3788_v28 = vpop.eup %3787  ;;  %3807 = vtanh.f32 %v721_v9 }
 0x135   : > { %v3790_v32 = vpop.eup %3789  ;;  %3809 = vtanh.f32 %v761_v18 }
 0x136   : > { %v3792_v37 = vpop.eup %3791  ;;  %3811 = vtanh.f32 %v723_v19 }
 0x137   : > { %v3794_v40 = vpop.eup %3793  ;;  %3813 = vtanh.f32 %v763_v26  ;;  %v728_v42 = vpop.f32.mrb[8].mxu0  ;;  %2925 = vperm.xlu1 %3714, %v2887_v38   ;;  %2920 = vperm.xlu0 %3713, %v2886_v1   ;;  %v819_v44 = vpack.c.bf16 %v3792_v37, %v3788_v28  ;;  %v2891_v28 = vld [vmem:[%s5380_s4 + $0x48] sm:$0xff] }
 0x138   : > { %v4911_v47 = vpop.eup %3795  ;;  %3815 = vtanh.f32 %v725_v29  ;;  %v729_v39 = vadd.f32 %v728_v42, %v4665_v49  ;;  %v768_v53 = vpop.f32.mrb[8].mxu1  ;;  %v820_v56 = vpack.c.bf16 %v3794_v40, %v3790_v32  ;;  %v2890_v32 = vld [vmem:[%s5380_s4 + $0x40] sm:$0xff] }
 0x139   : > { %v4919_v59 = vpop.eup %3797  ;;  %3817 = vtanh.f32 %v765_v33  ;;  %v769_v60 = vadd.f32 %v768_v53, %v4717_v5  ;;  %v730_v63 = vpop.f32.mrb[9].mxu0 }
 0x13a   : > { %v770_v2 = vpop.f32.mrb[9].mxu1  ;;  %v4925_v58 = vpop.eup %3799  ;;  %3819 = vtanh.f32 %v729_v39  ;;  %v731_v8 = vadd.f32 %v730_v63, %v4665_v49  ;;  %963 = vmatprep.subr.bf16.mxu1 %v820_v56  ;;  %v2893_v56 = vld [vmem:[%s5380_s4 + $0x58] sm:$0xff] }
 0x13b   : > { %v771_v9 = vadd.f32 %v770_v2, %v4717_v5  ;;  %v732_v12 = vpop.f32.mrb[10].mxu0  ;;  %v772_v17 = vpop.f32.mrb[10].mxu1  ;;  %3821 = vtanh.f32 %v769_v60  ;;  %964 = vmatpush1.bf16.msra.mxu1 %v819_v44  ;;  %2935 = vperm.xlu1 %3714, %v2889_v0   ;;  %v827_v27 = vpack.c.bf16 %v4925_v58, %v4911_v47  ;;  %v3724_v47 = vld [vmem:[%s5377_s1 + $0x48] sm:$0xff]   ;;  %v3726_v58 = vld [vmem:[%s5377_s1 + $0x58] sm:$0xff]  }
 0x13c   : > { %v4929_v18 = vpop.eup %3801  ;;  %v733_v19 = vadd.f32 %v732_v12, %v4663_v48  ;;  %v773_v22 = vadd.f32 %v772_v17, %v4715_v4  ;;  %v734_v23 = vpop.f32.mrb[11].mxu0  ;;  %3823 = vtanh.f32 %v731_v8  ;;  %2930 = vperm.xlu0 %3713, %v2888_v7   ;;  %v2892_v7 = vld [vmem:[%s5380_s4 + $0x50] sm:$0xff] }
 0x13d   : > { %v774_v26 = vpop.f32.mrb[11].mxu1  ;;  %v3804_v49 = vpop.eup %3803  ;;  %v735_v5 = vadd.f32 %v734_v23, %v4663_v48  ;;  %v828_v29 = vpack.c.bf16 %v4929_v18, %v4919_v59  ;;  %3825 = vtanh.f32 %v771_v9  ;;  %v3725_v59 = vld [vmem:[%s5377_s1 + $0x50] sm:$0xff]   ;;  %v3727_v18 = vld [vmem:[%s5377_s1 + $0x60] sm:$0xff]  }
 0x13e   : > { %v4941_v38 = vpop.eup %3805  ;;  %v775_v1 = vadd.f32 %v774_v26, %v4715_v4  ;;  %v4947_v37 = vpop.permute.xlu1 %1139  ;;  %3827 = vtanh.f32 %v733_v19 }
 0x13f   : > { %v3808_v33 = vpop.eup %3807  ;;  %v4949_v48 = vpop.permute.xlu0 %1134  ;;  %3829 = vtanh.f32 %v773_v22  ;;  %2945 = vperm.xlu1 %3714, %v2891_v28  }
 0x140   : > { %v4951_v40 = vpop.eup %3809  ;;  %v738_v42 = vpop.f32.mrb[12].mxu0  ;;  %3831 = vtanh.f32 %v735_v5  ;;  %2940 = vperm.xlu0 %3713, %v2890_v32  }
 0x141   : > { %v778_v44 = vpop.f32.mrb[12].mxu1  ;;  %v3812_v39 = vpop.eup %3811  ;;  %v739_v4 = vadd.f32 %v738_v42, %v4681_v55  ;;  %3833 = vtanh.f32 %v775_v1  ;;  %v2895_v42 = vld [vmem:[%s5380_s4 + $0x68] sm:$0xff] }
 0x142   : > { %v779_v53 = vadd.f32 %v778_v44, %v4733_v11  ;;  %v4958_v0 = vpop.eup %3813  ;;  %v740_v60 = vpop.f32.mrb[13].mxu0  ;;  %v821_v2 = vpack.c.bf16 %v3812_v39, %v3804_v49 }
 0x143   : > { %v780_v63 = vpop.f32.mrb[13].mxu1  ;;  %v3816_v8 = vpop.eup %3815  ;;  %3835 = vtanh.f32 %v739_v4  ;;  %v741_v9 = vadd.f32 %v740_v60, %v4681_v55  ;;  %v829_v22 = vpack.c.bf16 %v4958_v0, %v4941_v38  ;;  %2955 = vperm.xlu1 %3714, %v2893_v56   ;;  %v3730_v38 = vld [vmem:[%s5377_s1 + $0x78] sm:$0xff]  }
 0x144   : > { %v781_v12 = vadd.f32 %v780_v63, %v4733_v11  ;;  %v742_v17 = vpop.f32.mrb[14].mxu0  ;;  %v782_v19 = vpop.f32.mrb[14].mxu1  ;;  %3837 = vtanh.f32 %v779_v53  ;;  %v822_v1 = vpack.c.bf16 %v3816_v8, %v3808_v33  ;;  %2950 = vperm.xlu0 %3713, %v2892_v7   ;;  %v2894_v53 = vld [vmem:[%s5380_s4 + $0x60] sm:$0xff]  ;;  %v2896_v7 = vld [vmem:[%s5380_s4 + $0x70] sm:$0xff] }
 0x145   : > { %v4967_v23 = vpop.eup %3817  ;;  %v743_v26 = vadd.f32 %v742_v17, %v4679_v54  ;;  %v783_v49 = vadd.f32 %v782_v19, %v4731_v10  ;;  %v744_v5 = vpop.f32.mrb[15].mxu0  ;;  %3839 = vtanh.f32 %v741_v9 }
 0x146   : > { %v784_v28 = vpop.f32.mrb[15].mxu1  ;;  %v3820_v32 = vpop.eup %3819  ;;  %v745_v11 = vadd.f32 %v744_v5, %v4679_v54  ;;  %v830_v44 = vpack.c.bf16 %v4967_v23, %v4951_v40  ;;  %3841 = vtanh.f32 %v781_v12  ;;  %965 = vmatprep.subr.bf16.mxu1 %v822_v1  ;;  %v2897_v40 = vld [vmem:[%s5380_s4 + $0x78] sm:$0xff]  ;;  %v3229_v5 = vld [vmem:[#allocation2] sm:$0x1] }
 0x147   : > { %v4971_v55 = vpop.permute.xlu0 %1144  ;;  %v3822_v39 = vpop.eup %3821  ;;  %v785_v33 = vadd.f32 %v784_v28, %v4731_v10  ;;  %3843 = vtanh.f32 %v743_v26  ;;  %966 = vmatpush1.bf16.msra.mxu1 %v821_v2 }
 0x148   : > { %v4979_v4 = vpop.permute.xlu1 %1149  ;;  %v3824_v54 = vpop.eup %3823  ;;  %3845 = vtanh.f32 %v783_v49  ;;  %2965 = vperm.xlu1 %3714, %v2895_v42   ;;  %2960 = vperm.xlu0 %3713, %v2894_v53  }
 0x149   : > { %v3826_v56 = vpop.eup %3825  ;;  %3847 = vtanh.f32 %v745_v11 }
 0x14a   : > { %v3828_v60 = vpop.eup %3827  ;;  %3849 = vtanh.f32 %v785_v33 }
 0x14b   : > { %v3830_v63 = vpop.eup %3829  ;;  %v823_v10 = vpack.c.bf16 %v3828_v60, %v3820_v32  ;;  %v4991_v9 = vpop.permute.xlu0 %1154 }
 0x14c   : > { %v3832_v8 = vpop.eup %3831  ;;  %v831_v2 = vpack.c.bf16 %v3830_v63, %v3822_v39  ;;  %v4993_v17 = vpop.permute.xlu1 %1159  ;;  %2975 = vperm.xlu1 %3714, %v2897_v40   ;;  %2970 = vperm.xlu0 %3713, %v2896_v7  }
 0x14d   : > { %v3834_v12 = vpop.eup %3833  ;;  %v824_v19 = vpack.c.bf16 %v3832_v8, %v3824_v54 }
 0x14e   : > { %v3836_v23 = vpop.eup %3835  ;;  %v832_v26 = vpack.c.bf16 %v3834_v12, %v3826_v56  ;;  %v3723_v56 = vld [vmem:[%s5377_s1 + $0x40] sm:$0xff]  }
 0x14f   : > { %v3838_v49 = vpop.eup %3837  ;;  %967 = vmatprep.subr.bf16.mxu1 %v824_v19  ;;  %v4995_v11 = vpop.permute.xlu0 %1164 }
 0x150   : > { %v3840_v28 = vpop.eup %3839  ;;  %968 = vmatpush1.bf16.msra.mxu1 %v823_v10  ;;  %3232 = vperm.xlu0 %3713, %v3229_v5  }
 0x151   : > { %v3842_v1 = vpop.eup %3841 }
 0x152   : > { %v3844_v32 = vpop.eup %3843 }
 0x153   : > { %v3846_v42 = vpop.eup %3845  ;;  %v825_v39 = vpack.c.bf16 %v3844_v32, %v3836_v23 }
 0x154   : > { %v3848_v33 = vpop.eup %3847  ;;  %v833_v53 = vpack.c.bf16 %v3846_v42, %v3838_v49 }
 0x155   : > { %v3850_v60 = vpop.eup %3849  ;;  %v826_v54 = vpack.c.bf16 %v3848_v33, %v3840_v28 }
 0x156   : > { %v834_v40 = vpack.c.bf16 %v3850_v60, %v3842_v1 }
 0x157   : > { %969 = vmatprep.subr.bf16.mxu1 %v826_v54 }
 0x158   : > { %970 = vmatpush1.bf16.msra.mxu1 %v825_v39 }
 0x159   : > { %971 = vmatprep.subr.bf16.mxu1 %v828_v29  ;;  %v3729_v29 = vld [vmem:[%s5377_s1 + $0x70] sm:$0xff]  }
 0x15c   : > { %972 = vmatpush1.bf16.msra.mxu1 %v827_v27  ;;  %v3728_v27 = vld [vmem:[%s5377_s1 + $0x68] sm:$0xff]  }
 0x15d   : > { %973 = vmatprep.subr.bf16.mxu1 %v830_v44 }
 0x160   : > { %974 = vmatpush1.bf16.msra.mxu1 %v829_v22 }
 0x161   : > { %975 = vmatprep.subr.bf16.mxu1 %v832_v26 }
 0x164   : > { %976 = vmatpush1.bf16.msra.mxu1 %v831_v2 }
 0x165   : > { %977 = vmatprep.subr.bf16.mxu1 %v834_v40 }
 0x168   : > { %978 = vmatpush1.bf16.msra.mxu1 %v833_v53 }
 0x16b   : > { %996 = vmatmul.mubr.bf16.vlgmr.msra.gmra.mrb[16].mxu1 %v3723_v56 }
 0x16c   : > { %1005 = vmatprep.mubr.bf16.mxu1 %v4171_v35 }
 0x173   : > { %1006 = vmatmul.mubr.bf16.gmra.mrb[20].mxu1 %v3724_v47 }
 0x174   : > { %1015 = vmatprep.mubr.bf16.mxu1 %v4171_v35 }
 0x17b   : > { %1016 = vmatmul.mubr.bf16.gmra.mrb[24].mxu1 %v3725_v59 }
 0x17c   : > { %1025 = vmatprep.mubr.bf16.mxu1 %v4171_v35 }
 0x183   : > { %1026 = vmatmul.mubr.bf16.gmra.mrb[28].mxu1 %v3726_v58 }
 0x184   : > { %1035 = vmatprep.mubr.bf16.mxu1 %v4171_v35 }
 0x18b   : > { %1036 = vmatmul.mubr.bf16.gmra.mrb[32].mxu1 %v3727_v18 }
 0x18c   : > { %1045 = vmatprep.mubr.bf16.mxu1 %v4171_v35 }
 0x193   : > { %1046 = vmatmul.mubr.bf16.gmra.mrb[36].mxu1 %v3728_v27 }
 0x194   : > { %1055 = vmatprep.mubr.bf16.mxu1 %v4171_v35 }
 0x19b   : > { %1056 = vmatmul.mubr.bf16.gmra.mrb[40].mxu1 %v3729_v29 }
 0x19c   : > { %1065 = vmatprep.mubr.bf16.mxu1 %v4171_v35 }
 0x1a3   : > { %1066 = vmatmul.mubr.bf16.gmra.mrb[44].mxu1 %v3730_v38 }
 0x1a4   : > { %1541 = vmatprep.mubr.bf16.mxu1 %v4171_v35 }
 0x23e   : > { %v997_v0 = vpop.f32.mrb[16].mxu1 }
 0x23f   : > { %v999_v22 = vpop.f32.mrb[17].mxu1  ;;  %v998_v63 = vadd.f32 %v997_v0, %v4743_v15 }
 0x240   : > { %v1001_v44 = vpop.f32.mrb[18].mxu1  ;;  %v1000_v8 = vadd.f32 %v999_v22, %v4743_v15 }
 0x241   : > { %v1002_v10 = vadd.f32 %v1001_v44, %v4741_v14  ;;  %v1003_v7 = vpop.f32.mrb[19].mxu1 }
 0x242   : > { %v1004_v2 = vadd.f32 %v1003_v7, %v4741_v14 }
 0x243   : > { %v1076_v12 = vpack.c.bf16 %v1002_v10, %v998_v63 }
 0x244   : > { %v1077_v19 = vpack.c.bf16 %v1004_v2, %v1000_v8 }
 0x246   : > { %v1007_v23 = vpop.f32.mrb[20].mxu1  ;;  %1220 = vmatprep.subr.bf16.mxu0 %v1077_v19 }
 0x247   : > { %v1009_v26 = vpop.f32.mrb[21].mxu1  ;;  %1221 = vmatpush1.bf16.msra.mxu0 %v1076_v12  ;;  %v1008_v5 = vadd.f32 %v1007_v23, %v4759_v21 }
 0x248   : > { %v1011_v49 = vpop.f32.mrb[22].mxu1  ;;  %v1010_v32 = vadd.f32 %v1009_v26, %v4759_v21 }
 0x249   : > { %v1012_v28 = vadd.f32 %v1011_v49, %v4757_v20  ;;  %v1013_v1 = vpop.f32.mrb[23].mxu1 }
 0x24a   : > { %v1014_v42 = vadd.f32 %v1013_v1, %v4757_v20 }
 0x24b   : > { %v1078_v39 = vpack.c.bf16 %v1012_v28, %v1008_v5 }
 0x24c   : > { %v1079_v15 = vpack.c.bf16 %v1014_v42, %v1010_v32 }
 0x24e   : > { %v1017_v33 = vpop.f32.mrb[24].mxu1  ;;  %1222 = vmatprep.subr.bf16.mxu0 %v1079_v15 }
 0x24f   : > { %v1019_v14 = vpop.f32.mrb[25].mxu1  ;;  %1223 = vmatpush1.bf16.msra.mxu0 %v1078_v39  ;;  %v1018_v60 = vadd.f32 %v1017_v33, %v4769_v25 }
 0x250   : > { %v1021_v53 = vpop.f32.mrb[26].mxu1  ;;  %v1020_v56 = vadd.f32 %v1019_v14, %v4769_v25 }
 0x251   : > { %v1022_v54 = vadd.f32 %v1021_v53, %v4767_v24  ;;  %v1023_v40 = vpop.f32.mrb[27].mxu1 }
 0x252   : > { %v1024_v47 = vadd.f32 %v1023_v40, %v4767_v24 }
 0x253   : > { %v1080_v59 = vpack.c.bf16 %v1022_v54, %v1018_v60 }
 0x254   : > { %v1081_v21 = vpack.c.bf16 %v1024_v47, %v1020_v56 }
 0x256   : > { %v1027_v58 = vpop.f32.mrb[28].mxu1  ;;  %1224 = vmatprep.subr.bf16.mxu0 %v1081_v21 }
 0x257   : > { %v1029_v20 = vpop.f32.mrb[29].mxu1  ;;  %1225 = vmatpush1.bf16.msra.mxu0 %v1080_v59  ;;  %v1028_v27 = vadd.f32 %v1027_v58, %v4785_v31 }
 0x258   : > { %v1031_v18 = vpop.f32.mrb[30].mxu1  ;;  %v1030_v0 = vadd.f32 %v1029_v20, %v4785_v31 }
 0x259   : > { %v1032_v29 = vadd.f32 %v1031_v18, %v4783_v30  ;;  %v1033_v38 = vpop.f32.mrb[31].mxu1 }
 0x25a   : > { %v1034_v22 = vadd.f32 %v1033_v38, %v4783_v30  ;;  %v3732_v38 = vld [vmem:[%s5377_s1 + $0x88] sm:$0xff]  }
 0x25b   : > { %v1082_v44 = vpack.c.bf16 %v1032_v29, %v1028_v27 }
 0x25c   : > { %v1083_v25 = vpack.c.bf16 %v1034_v22, %v1030_v0  ;;  %v3735_v0 = vld [vmem:[%s5377_s1 + $0xa0] sm:$0xff]   ;;  %v3736_v22 = vld [vmem:[%s5377_s1 + $0xa8] sm:$0xff]  }
 0x25e   : > { %v1037_v63 = vpop.f32.mrb[32].mxu1  ;;  %1226 = vmatprep.subr.bf16.mxu0 %v1083_v25  ;;  %v3738_v25 = vld [vmem:[%s5377_s1 + $0xb8] sm:$0xff]  }
 0x25f   : > { %v1039_v24 = vpop.f32.mrb[33].mxu1  ;;  %1227 = vmatpush1.bf16.msra.mxu0 %v1082_v44  ;;  %v1038_v7 = vadd.f32 %v1037_v63, %v4795_v36  ;;  %v3737_v44 = vld [vmem:[%s5377_s1 + $0xb0] sm:$0xff]  }
 0x260   : > { %v1041_v10 = vpop.f32.mrb[34].mxu1  ;;  %v1040_v12 = vadd.f32 %v1039_v24, %v4795_v36 }
 0x261   : > { %v1042_v8 = vadd.f32 %v1041_v10, %v4793_v34  ;;  %v1043_v2 = vpop.f32.mrb[35].mxu1 }
 0x262   : > { %v1044_v19 = vadd.f32 %v1043_v2, %v4793_v34 }
 0x263   : > { %v1084_v23 = vpack.c.bf16 %v1042_v8, %v1038_v7 }
 0x264   : > { %v1085_v31 = vpack.c.bf16 %v1044_v19, %v1040_v12 }
 0x266   : > { %v1047_v26 = vpop.f32.mrb[36].mxu1  ;;  %1228 = vmatprep.subr.bf16.mxu0 %v1085_v31 }
 0x267   : > { %v1049_v30 = vpop.f32.mrb[37].mxu1  ;;  %1229 = vmatpush1.bf16.msra.mxu0 %v1084_v23  ;;  %v1048_v5 = vadd.f32 %v1047_v26, %v4811_v46 }
 0x268   : > { %v1051_v49 = vpop.f32.mrb[38].mxu1  ;;  %v1050_v32 = vadd.f32 %v1049_v30, %v4811_v46 }
 0x269   : > { %v1052_v28 = vadd.f32 %v1051_v49, %v4809_v43  ;;  %v1053_v1 = vpop.f32.mrb[39].mxu1 }
 0x26a   : > { %v1054_v42 = vadd.f32 %v1053_v1, %v4809_v43 }
 0x26b   : > { %v1086_v39 = vpack.c.bf16 %v1052_v28, %v1048_v5 }
 0x26c   : > { %v1087_v36 = vpack.c.bf16 %v1054_v42, %v1050_v32 }
 0x26e   : > { %v1057_v15 = vpop.f32.mrb[40].mxu1  ;;  %1230 = vmatprep.subr.bf16.mxu0 %v1087_v36 }
 0x26f   : > { %v1059_v34 = vpop.f32.mrb[41].mxu1  ;;  %1231 = vmatpush1.bf16.msra.mxu0 %v1086_v39  ;;  %v1058_v14 = vadd.f32 %v1057_v15, %v4821_v52 }
 0x270   : > { %v1061_v33 = vpop.f32.mrb[42].mxu1  ;;  %v1060_v54 = vadd.f32 %v1059_v34, %v4821_v52 }
 0x271   : > { %v1062_v53 = vadd.f32 %v1061_v33, %v4819_v51  ;;  %v1063_v60 = vpop.f32.mrb[43].mxu1 }
 0x272   : > { %v1064_v40 = vadd.f32 %v1063_v60, %v4819_v51  ;;  %v3731_v51 = vld [vmem:[%s5377_s1 + $0x80] sm:$0xff]  }
 0x273   : > { %v1088_v56 = vpack.c.bf16 %v1062_v53, %v1058_v14 }
 0x274   : > { %v1089_v46 = vpack.c.bf16 %v1064_v40, %v1060_v54 }
 0x276   : > { %v1067_v47 = vpop.f32.mrb[44].mxu1  ;;  %1232 = vmatprep.subr.bf16.mxu0 %v1089_v46 }
 0x277   : > { %v1069_v43 = vpop.f32.mrb[45].mxu1  ;;  %1233 = vmatpush1.bf16.msra.mxu0 %v1088_v56  ;;  %v1068_v21 = vadd.f32 %v1067_v47, %v4837_v62 }
 0x278   : > { %v1071_v59 = vpop.f32.mrb[46].mxu1  ;;  %v1070_v18 = vadd.f32 %v1069_v43, %v4837_v62  ;;  %v3734_v62 = vld [vmem:[%s5377_s1 + $0x98] sm:$0xff]  }
 0x279   : > { %v1072_v58 = vadd.f32 %v1071_v59, %v4835_v61  ;;  %v1073_v20 = vpop.f32.mrb[47].mxu1 }
 0x27a   : > { %v1074_v27 = vadd.f32 %v1073_v20, %v4835_v61  ;;  %v3733_v61 = vld [vmem:[%s5377_s1 + $0x90] sm:$0xff]  }
 0x27b   : > { %v1090_v29 = vpack.c.bf16 %v1072_v58, %v1068_v21 }
 0x27c   : > { %v1091_v52 = vpack.c.bf16 %v1074_v27, %v1070_v18 }
 0x27e   : > { %1234 = vmatprep.subr.bf16.mxu0 %v1091_v52 }
 0x27f   : > { %1235 = vmatpush1.bf16.msra.mxu0 %v1090_v29 }
 0x282   : > { %1253 = vmatmul.mubr.bf16.vlgmr.msra.gmra.mrb[16].mxu0 %v3731_v51 }
 0x283   : > { %1262 = vmatprep.mubr.bf16.mxu0 %v4171_v35 }
 0x28a   : > { %1263 = vmatmul.mubr.bf16.gmra.mrb[20].mxu0 %v3732_v38 }
 0x28b   : > { %1272 = vmatprep.mubr.bf16.mxu0 %v4171_v35 }
 0x292   : > { %1273 = vmatmul.mubr.bf16.gmra.mrb[24].mxu0 %v3733_v61 }
 0x293   : > { %1282 = vmatprep.mubr.bf16.mxu0 %v4171_v35 }
 0x29a   : > { %1283 = vmatmul.mubr.bf16.gmra.mrb[28].mxu0 %v3734_v62 }
 0x29b   : > { %1292 = vmatprep.mubr.bf16.mxu0 %v4171_v35 }
 0x2a2   : > { %1293 = vmatmul.mubr.bf16.gmra.mrb[32].mxu0 %v3735_v0 }
 0x2a3   : > { %1302 = vmatprep.mubr.bf16.mxu0 %v4171_v35 }
 0x2aa   : > { %1303 = vmatmul.mubr.bf16.gmra.mrb[36].mxu0 %v3736_v22 }
 0x2ab   : > { %1312 = vmatprep.mubr.bf16.mxu0 %v4171_v35 }
 0x2b2   : > { %1313 = vmatmul.mubr.bf16.gmra.mrb[40].mxu0 %v3737_v44 }
 0x2b3   : > { %1322 = vmatprep.mubr.bf16.mxu0 %v4171_v35 }
 0x2ba   : > { %1323 = vmatmul.mubr.bf16.gmra.mrb[44].mxu0 %v3738_v25 }
 0x2bb   : > { %1934 = vmatprep.mubr.bf16.mxu0 %v4171_v35 }
 0x355   : > { %v1254_v63 = vpop.f32.mrb[16].mxu0 }
 0x356   : > { %v1255_v24 = vadd.f32 %v1254_v63, %v4847_v6  ;;  %v1256_v10 = vpop.f32.mrb[17].mxu0 }
 0x357   : > { %v1257_v7 = vadd.f32 %v1256_v10, %v4847_v6  ;;  %v1258_v8 = vpop.f32.mrb[18].mxu0 }
 0x358   : > { %3851 = vtanh.f32 %v1255_v24  ;;  %v1259_v2 = vadd.f32 %v1258_v8, %v4845_v3  ;;  %v1260_v12 = vpop.f32.mrb[19].mxu0 }
 0x359   : > { %3853 = vtanh.f32 %v1257_v7  ;;  %v1261_v19 = vadd.f32 %v1260_v12, %v4845_v3 }
 0x35a   : > { %3855 = vtanh.f32 %v1259_v2 }
 0x35b   : > { %3857 = vtanh.f32 %v1261_v19 }
 0x35d   : > { %v1264_v23 = vpop.f32.mrb[20].mxu0 }
 0x35e   : > { %v1265_v31 = vadd.f32 %v1264_v23, %v4863_v16  ;;  %v1266_v26 = vpop.f32.mrb[21].mxu0 }
 0x35f   : > { %v1267_v30 = vadd.f32 %v1266_v26, %v4863_v16  ;;  %v1268_v49 = vpop.f32.mrb[22].mxu0 }
 0x360   : > { %3859 = vtanh.f32 %v1265_v31  ;;  %v1269_v6 = vadd.f32 %v1268_v49, %v4861_v13  ;;  %v1270_v5 = vpop.f32.mrb[23].mxu0 }
 0x361   : > { %3861 = vtanh.f32 %v1267_v30  ;;  %v1271_v28 = vadd.f32 %v1270_v5, %v4861_v13 }
 0x362   : > { %v3852_v1 = vpop.eup %3851  ;;  %3863 = vtanh.f32 %v1269_v6 }
 0x363   : > { %v3854_v32 = vpop.eup %3853  ;;  %3865 = vtanh.f32 %v1271_v28 }
 0x364   : > { %v3856_v3 = vpop.eup %3855 }
 0x365   : > { %v3858_v42 = vpop.eup %3857  ;;  %v1274_v39 = vpop.f32.mrb[24].mxu0  ;;  %v1365_v36 = vpack.c.bf16 %v3856_v3, %v3852_v1 }
 0x366   : > { %v1275_v15 = vadd.f32 %v1274_v39, %v4887_v57  ;;  %v1276_v34 = vpop.f32.mrb[25].mxu0  ;;  %v1366_v16 = vpack.c.bf16 %v3858_v42, %v3854_v32 }
 0x367   : > { %v1277_v33 = vadd.f32 %v1276_v34, %v4887_v57  ;;  %v1278_v14 = vpop.f32.mrb[26].mxu0 }
 0x368   : > { %3867 = vtanh.f32 %v1275_v15  ;;  %v1279_v53 = vadd.f32 %v1278_v14, %v4885_v45  ;;  %v1280_v60 = vpop.f32.mrb[27].mxu0  ;;  %1509 = vmatprep.subr.bf16.mxu1 %v1366_v16 }
 0x369   : > { %3869 = vtanh.f32 %v1277_v33  ;;  %v1281_v13 = vadd.f32 %v1280_v60, %v4885_v45  ;;  %1510 = vmatpush1.bf16.msra.mxu1 %v1365_v36 }
 0x36a   : > { %v3860_v54 = vpop.eup %3859  ;;  %3871 = vtanh.f32 %v1279_v53 }
 0x36b   : > { %v3862_v40 = vpop.eup %3861  ;;  %3873 = vtanh.f32 %v1281_v13 }
 0x36c   : > { %v3864_v56 = vpop.eup %3863 }
 0x36d   : > { %v3866_v46 = vpop.eup %3865  ;;  %v1284_v47 = vpop.f32.mrb[28].mxu0  ;;  %v1367_v43 = vpack.c.bf16 %v3864_v56, %v3860_v54 }
 0x36e   : > { %v1285_v57 = vadd.f32 %v1284_v47, %v4913_v50  ;;  %v1286_v59 = vpop.f32.mrb[29].mxu0  ;;  %v1368_v21 = vpack.c.bf16 %v3866_v46, %v3862_v40  ;;  %v1170_v47 = vpop.permute.xlu1 %1169 }
 0x36f   : > { %v1287_v58 = vadd.f32 %v1286_v59, %v4913_v50  ;;  %v1288_v20 = vpop.f32.mrb[30].mxu0 }
 0x370   : > { %3875 = vtanh.f32 %v1285_v57  ;;  %v1289_v18 = vadd.f32 %v1288_v20, %v4909_v41  ;;  %v1290_v45 = vpop.f32.mrb[31].mxu0  ;;  %1511 = vmatprep.subr.bf16.mxu1 %v1368_v21 }
 0x371   : > { %3877 = vtanh.f32 %v1287_v58  ;;  %v1291_v27 = vadd.f32 %v1290_v45, %v4909_v41  ;;  %1512 = vmatpush1.bf16.msra.mxu1 %v1367_v43 }
 0x372   : > { %v3868_v29 = vpop.eup %3867  ;;  %3879 = vtanh.f32 %v1289_v18 }
 0x373   : > { %v3870_v52 = vpop.eup %3869  ;;  %3881 = vtanh.f32 %v1291_v27 }
 0x374   : > { %v3872_v51 = vpop.eup %3871 }
 0x375   : > { %v3874_v38 = vpop.eup %3873  ;;  %v1294_v61 = vpop.f32.mrb[32].mxu0  ;;  %v1369_v62 = vpack.c.bf16 %v3872_v51, %v3868_v29 }
 0x376   : > { %v1295_v50 = vadd.f32 %v1294_v61, %v4949_v48  ;;  %v1296_v0 = vpop.f32.mrb[33].mxu0  ;;  %v1370_v22 = vpack.c.bf16 %v3874_v38, %v3870_v52 }
 0x377   : > { %v1297_v44 = vadd.f32 %v1296_v0, %v4949_v48  ;;  %v1298_v25 = vpop.f32.mrb[34].mxu0  ;;  %v3740_v0 = vld [vmem:[%s5377_s1 + $0xc8] sm:$0xff]  }
 0x378   : > { %3883 = vtanh.f32 %v1295_v50  ;;  %v1299_v63 = vadd.f32 %v1298_v25, %v4947_v37  ;;  %v1300_v41 = vpop.f32.mrb[35].mxu0  ;;  %1513 = vmatprep.subr.bf16.mxu1 %v1370_v22  ;;  %v3739_v50 = vld [vmem:[%s5377_s1 + $0xc0] sm:$0xff]   ;;  %v3741_v22 = vld [vmem:[%s5377_s1 + $0xd0] sm:$0xff]  }
 0x379   : > { %3885 = vtanh.f32 %v1297_v44  ;;  %v1301_v24 = vadd.f32 %v1300_v41, %v4947_v37  ;;  %1514 = vmatpush1.bf16.msra.mxu1 %v1369_v62  ;;  %v3742_v44 = vld [vmem:[%s5377_s1 + $0xd8] sm:$0xff]   ;;  %v3743_v25 = vld [vmem:[%s5377_s1 + $0xe0] sm:$0xff]   ;;  %v3745_v41 = vld [vmem:[%s5377_s1 + $0xf0] sm:$0xff]  }
 0x37a   : > { %v3876_v10 = vpop.eup %3875  ;;  %3887 = vtanh.f32 %v1299_v63  ;;  %v3744_v63 = vld [vmem:[%s5377_s1 + $0xe8] sm:$0xff]  }
 0x37b   : > { %v3878_v7 = vpop.eup %3877  ;;  %3889 = vtanh.f32 %v1301_v24  ;;  %v3746_v24 = vld [vmem:[%s5377_s1 + $0xf8] sm:$0xff]  }
 0x37c   : > { %v3880_v8 = vpop.eup %3879 }
 0x37d   : > { %v3882_v2 = vpop.eup %3881  ;;  %v1304_v12 = vpop.f32.mrb[36].mxu0  ;;  %v1371_v19 = vpack.c.bf16 %v3880_v8, %v3876_v10 }
 0x37e   : > { %v1305_v48 = vadd.f32 %v1304_v12, %v4971_v55  ;;  %v1306_v23 = vpop.f32.mrb[37].mxu0  ;;  %v1372_v31 = vpack.c.bf16 %v3882_v2, %v3878_v7  ;;  %v1389_v7 = vpop.permute.xlu1 %1388 }
 0x37f   : > { %v1307_v26 = vadd.f32 %v1306_v23, %v4971_v55  ;;  %v1308_v30 = vpop.f32.mrb[38].mxu0  ;;  %v1384_v2 = vpop.permute.xlu0 %1383 }
 0x380   : > { %3891 = vtanh.f32 %v1305_v48  ;;  %v1309_v49 = vadd.f32 %v1308_v30, %v4979_v4  ;;  %v1310_v37 = vpop.f32.mrb[39].mxu0  ;;  %1515 = vmatprep.subr.bf16.mxu1 %v1372_v31 }
 0x381   : > { %3893 = vtanh.f32 %v1307_v26  ;;  %v1311_v6 = vadd.f32 %v1310_v37, %v4979_v4  ;;  %1516 = vmatpush1.bf16.msra.mxu1 %v1371_v19 }
 0x382   : > { %v3884_v5 = vpop.eup %3883  ;;  %3895 = vtanh.f32 %v1309_v49 }
 0x383   : > { %v3886_v28 = vpop.eup %3885  ;;  %3897 = vtanh.f32 %v1311_v6  ;;  %v1399_v6 = vpop.permute.xlu1 %1398 }
 0x384   : > { %v3888_v1 = vpop.eup %3887 }
 0x385   : > { %v3890_v32 = vpop.eup %3889  ;;  %v1314_v3 = vpop.f32.mrb[40].mxu0  ;;  %v1373_v42 = vpack.c.bf16 %v3888_v1, %v3884_v5 }
 0x386   : > { %v1315_v55 = vadd.f32 %v1314_v3, %v4991_v9  ;;  %v1316_v39 = vpop.f32.mrb[41].mxu0  ;;  %v1374_v36 = vpack.c.bf16 %v3890_v32, %v3886_v28  ;;  %v1394_v28 = vpop.permute.xlu0 %1393 }
 0x387   : > { %v1317_v15 = vadd.f32 %v1316_v39, %v4991_v9  ;;  %v1318_v34 = vpop.f32.mrb[42].mxu0 }
 0x388   : > { %3899 = vtanh.f32 %v1315_v55  ;;  %v1319_v16 = vadd.f32 %v1318_v34, %v4993_v17  ;;  %v1320_v4 = vpop.f32.mrb[43].mxu0  ;;  %1517 = vmatprep.subr.bf16.mxu1 %v1374_v36 }
 0x389   : > { %3901 = vtanh.f32 %v1317_v15  ;;  %v1321_v33 = vadd.f32 %v1320_v4, %v4993_v17  ;;  %1518 = vmatpush1.bf16.msra.mxu1 %v1373_v42 }
 0x38a   : > { %v3892_v14 = vpop.eup %3891  ;;  %3903 = vtanh.f32 %v1319_v16  ;;  %v1409_v16 = vpop.permute.xlu1 %1408 }
 0x38b   : > { %v3894_v53 = vpop.eup %3893  ;;  %3905 = vtanh.f32 %v1321_v33  ;;  %v1404_v33 = vpop.permute.xlu0 %1403 }
 0x38c   : > { %v3896_v60 = vpop.eup %3895 }
 0x38d   : > { %v3898_v13 = vpop.eup %3897  ;;  %v1324_v54 = vpop.f32.mrb[44].mxu0  ;;  %v1375_v40 = vpack.c.bf16 %v3896_v60, %v3892_v14 }
 0x38e   : > { %v1325_v9 = vadd.f32 %v1324_v54, %v4995_v11  ;;  %v1326_v56 = vpop.f32.mrb[45].mxu0  ;;  %v1376_v46 = vpack.c.bf16 %v3898_v13, %v3894_v53 }
 0x38f   : > { %v1327_v43 = vadd.f32 %v1326_v56, %v4995_v11  ;;  %v1328_v57 = vpop.f32.mrb[46].mxu0 }
 0x390   : > { %3907 = vtanh.f32 %v1325_v9  ;;  %v1329_v59 = vadd.f32 %v1328_v57, %v1170_v47  ;;  %v1330_v17 = vpop.f32.mrb[47].mxu0  ;;  %1519 = vmatprep.subr.bf16.mxu1 %v1376_v46  ;;  %v1414_v57 = vpop.permute.xlu0 %1413 }
 0x391   : > { %3909 = vtanh.f32 %v1327_v43  ;;  %v1331_v21 = vadd.f32 %v1330_v17, %v1170_v47  ;;  %1520 = vmatpush1.bf16.msra.mxu1 %v1375_v40  ;;  %v1419_v47 = vpop.permute.xlu1 %1418 }
 0x392   : > { %v3900_v58 = vpop.eup %3899  ;;  %3911 = vtanh.f32 %v1329_v59 }
 0x393   : > { %v3902_v20 = vpop.eup %3901  ;;  %3913 = vtanh.f32 %v1331_v21 }
 0x394   : > { %v3904_v18 = vpop.eup %3903 }
 0x395   : > { %v3906_v45 = vpop.eup %3905  ;;  %v1377_v27 = vpack.c.bf16 %v3904_v18, %v3900_v58 }
 0x396   : > { %v1378_v29 = vpack.c.bf16 %v3906_v45, %v3902_v20 }
 0x398   : > { %1521 = vmatprep.subr.bf16.mxu1 %v1378_v29 }
 0x399   : > { %1522 = vmatpush1.bf16.msra.mxu1 %v1377_v27 }
 0x39a   : > { %v3908_v52 = vpop.eup %3907 }
 0x39b   : > { %v3910_v11 = vpop.eup %3909 }
 0x39c   : > { %v3912_v51 = vpop.eup %3911 }
 0x39d   : > { %v3914_v38 = vpop.eup %3913  ;;  %v1379_v61 = vpack.c.bf16 %v3912_v51, %v3908_v52  ;;  %v1429_v52 = vpop.permute.xlu1 %1428 }
 0x39e   : > { %v1380_v62 = vpack.c.bf16 %v3914_v38, %v3910_v11  ;;  %v1424_v51 = vpop.permute.xlu0 %1423 }
 0x3a0   : > { %1523 = vmatprep.subr.bf16.mxu1 %v1380_v62 }
 0x3a1   : > { %1524 = vmatpush1.bf16.msra.mxu1 %v1379_v61 }
 0x3a4   : > { %1542 = vmatmul.mubr.bf16.vlgmr.msra.gmra.mrb[48].mxu1 %v3739_v50 }
 0x3a5   : > { %1551 = vmatprep.mubr.bf16.mxu1 %v4171_v35 }
 0x3ac   : > { %1552 = vmatmul.mubr.bf16.gmra.mrb[52].mxu1 %v3740_v0 }
 0x3ad   : > { %1561 = vmatprep.mubr.bf16.mxu1 %v4171_v35 }
 0x3b4   : > { %1562 = vmatmul.mubr.bf16.gmra.mrb[56].mxu1 %v3741_v22 }
 0x3b5   : > { %1571 = vmatprep.mubr.bf16.mxu1 %v4171_v35 }
 0x3bc   : > { %1572 = vmatmul.mubr.bf16.gmra.mrb[60].mxu1 %v3742_v44 }
 0x3bd   : > { %1581 = vmatprep.mubr.bf16.mxu1 %v4171_v35 }
 0x3c4   : > { %1582 = vmatmul.mubr.bf16.gmra.mrb[64].mxu1 %v3743_v25 }
 0x3c5   : > { %1591 = vmatprep.mubr.bf16.mxu1 %v4171_v35 }
 0x3cc   : > { %1592 = vmatmul.mubr.bf16.gmra.mrb[68].mxu1 %v3744_v63 }
 0x3cd   : > { %1601 = vmatprep.mubr.bf16.mxu1 %v4171_v35 }
 0x3d4   : > { %1602 = vmatmul.mubr.bf16.gmra.mrb[72].mxu1 %v3745_v41  ;;  %v1439_v41 = vpop.permute.xlu1 %1438 }
 0x3d5   : > { %1611 = vmatprep.mubr.bf16.mxu1 %v4171_v35 }
 0x3dc   : > { %1612 = vmatmul.mubr.bf16.gmra.mrb[76].mxu1 %v3746_v24 }
 0x3dd   : > { %2223 = vmatprep.mubr.bf16.mxu1 %v4171_v35 }
 0x477   : > { %v1543_v10 = vpop.f32.mrb[48].mxu1 }
 0x478   : > { %v1545_v8 = vpop.f32.mrb[49].mxu1  ;;  %v1544_v19 = vadd.f32 %v1543_v10, %v1384_v2  ;;  %v1434_v10 = vpop.permute.xlu0 %1433 }
 0x479   : > { %v1547_v12 = vpop.f32.mrb[50].mxu1  ;;  %v1546_v31 = vadd.f32 %v1545_v8, %v1384_v2 }
 0x47a   : > { %v1548_v48 = vadd.f32 %v1547_v12, %v1389_v7  ;;  %v1549_v23 = vpop.f32.mrb[51].mxu1 }
 0x47b   : > { %v1550_v26 = vadd.f32 %v1549_v23, %v1389_v7 }
 0x47c   : > { %v1758_v30 = vpack.c.bf16 %v1548_v48, %v1544_v19 }
 0x47d   : > { %v1759_v49 = vpack.c.bf16 %v1550_v26, %v1546_v31 }
 0x47f   : > { %v1553_v37 = vpop.f32.mrb[52].mxu1  ;;  %1902 = vmatprep.subr.bf16.mxu0 %v1759_v49 }
 0x480   : > { %v1555_v5 = vpop.f32.mrb[53].mxu1  ;;  %1903 = vmatpush1.bf16.msra.mxu0 %v1758_v30  ;;  %v1554_v32 = vadd.f32 %v1553_v37, %v1394_v28  ;;  %v1449_v30 = vpop.permute.xlu1 %1448 }
 0x481   : > { %v1557_v1 = vpop.f32.mrb[54].mxu1  ;;  %v1556_v55 = vadd.f32 %v1555_v5, %v1394_v28  ;;  %v1444_v37 = vpop.permute.xlu0 %1443 }
 0x482   : > { %v1558_v3 = vadd.f32 %v1557_v1, %v1399_v6  ;;  %v1559_v42 = vpop.f32.mrb[55].mxu1 }
 0x483   : > { %v1560_v39 = vadd.f32 %v1559_v42, %v1399_v6 }
 0x484   : > { %v1760_v36 = vpack.c.bf16 %v1558_v3, %v1554_v32 }
 0x485   : > { %v1761_v15 = vpack.c.bf16 %v1560_v39, %v1556_v55 }
 0x487   : > { %v1563_v34 = vpop.f32.mrb[56].mxu1  ;;  %1904 = vmatprep.subr.bf16.mxu0 %v1761_v15 }
 0x488   : > { %v1565_v4 = vpop.f32.mrb[57].mxu1  ;;  %1905 = vmatpush1.bf16.msra.mxu0 %v1760_v36  ;;  %v1564_v53 = vadd.f32 %v1563_v34, %v1404_v33  ;;  %v1459_v36 = vpop.permute.xlu1 %1458 }
 0x489   : > { %v1567_v14 = vpop.f32.mrb[58].mxu1  ;;  %v1566_v54 = vadd.f32 %v1565_v4, %v1404_v33  ;;  %v1454_v34 = vpop.permute.xlu0 %1453 }
 0x48a   : > { %v1568_v60 = vadd.f32 %v1567_v14, %v1409_v16  ;;  %v1569_v13 = vpop.f32.mrb[59].mxu1 }
 0x48b   : > { %v1570_v40 = vadd.f32 %v1569_v13, %v1409_v16 }
 0x48c   : > { %v1762_v9 = vpack.c.bf16 %v1568_v60, %v1564_v53 }
 0x48d   : > { %v1763_v56 = vpack.c.bf16 %v1570_v40, %v1566_v54  ;;  %v3747_v40 = vld [vmem:[%s5377_s1 + $0x100] sm:$0xff]  }
 0x48f   : > { %v1573_v46 = vpop.f32.mrb[60].mxu1  ;;  %1906 = vmatprep.subr.bf16.mxu0 %v1763_v56  ;;  %v3749_v56 = vld [vmem:[%s5377_s1 + $0x110] sm:$0xff]  }
 0x490   : > { %v1575_v43 = vpop.f32.mrb[61].mxu1  ;;  %1907 = vmatpush1.bf16.msra.mxu0 %v1762_v9  ;;  %v1574_v17 = vadd.f32 %v1573_v46, %v1414_v57  ;;  %v3748_v9 = vld [vmem:[%s5377_s1 + $0x108] sm:$0xff]   ;;  %v3750_v46 = vld [vmem:[%s5377_s1 + $0x118] sm:$0xff]  }
 0x491   : > { %v1577_v59 = vpop.f32.mrb[62].mxu1  ;;  %v1576_v20 = vadd.f32 %v1575_v43, %v1414_v57  ;;  %v3752_v43 = vld [vmem:[%s5377_s1 + $0x128] sm:$0xff]   ;;  %v3753_v57 = vld [vmem:[%s5377_s1 + $0x130] sm:$0xff]  }
 0x492   : > { %v1578_v21 = vadd.f32 %v1577_v59, %v1419_v47  ;;  %v1579_v58 = vpop.f32.mrb[63].mxu1  ;;  %v3754_v59 = vld [vmem:[%s5377_s1 + $0x138] sm:$0xff]  }
 0x493   : > { %v1580_v18 = vadd.f32 %v1579_v58, %v1419_v47  ;;  %v3751_v47 = vld [vmem:[%s5377_s1 + $0x120] sm:$0xff]  }
 0x494   : > { %v1764_v45 = vpack.c.bf16 %v1578_v21, %v1574_v17  ;;  %v1777_v17 = vpop.permute.xlu0 %1776 }
 0x495   : > { %v1765_v27 = vpack.c.bf16 %v1580_v18, %v1576_v20  ;;  %v1782_v18 = vpop.permute.xlu1 %1781 }
 0x497   : > { %v1583_v29 = vpop.f32.mrb[64].mxu1  ;;  %1908 = vmatprep.subr.bf16.mxu0 %v1765_v27 }
 0x498   : > { %v1585_v11 = vpop.f32.mrb[65].mxu1  ;;  %1909 = vmatpush1.bf16.msra.mxu0 %v1764_v45  ;;  %v1584_v61 = vadd.f32 %v1583_v29, %v1424_v51 }
 0x499   : > { %v1587_v38 = vpop.f32.mrb[66].mxu1  ;;  %v1586_v0 = vadd.f32 %v1585_v11, %v1424_v51  ;;  %v1787_v51 = vpop.permute.xlu0 %1786 }
 0x49a   : > { %v1588_v62 = vadd.f32 %v1587_v38, %v1429_v52  ;;  %v1589_v50 = vpop.f32.mrb[67].mxu1 }
 0x49b   : > { %v1590_v22 = vadd.f32 %v1589_v50, %v1429_v52  ;;  %v1792_v50 = vpop.permute.xlu1 %1791 }
 0x49c   : > { %v1766_v44 = vpack.c.bf16 %v1588_v62, %v1584_v61 }
 0x49d   : > { %v1767_v25 = vpack.c.bf16 %v1590_v22, %v1586_v0 }
 0x49f   : > { %v1593_v63 = vpop.f32.mrb[68].mxu1  ;;  %1910 = vmatprep.subr.bf16.mxu0 %v1767_v25 }
 0x4a0   : > { %v1595_v24 = vpop.f32.mrb[69].mxu1  ;;  %1911 = vmatpush1.bf16.msra.mxu0 %v1766_v44  ;;  %v1594_v8 = vadd.f32 %v1593_v63, %v1434_v10 }
 0x4a1   : > { %v1597_v7 = vpop.f32.mrb[70].mxu1  ;;  %v1596_v19 = vadd.f32 %v1595_v24, %v1434_v10 }
 0x4a2   : > { %v1598_v2 = vadd.f32 %v1597_v7, %v1439_v41  ;;  %v1599_v12 = vpop.f32.mrb[71].mxu1 }
 0x4a3   : > { %v1600_v48 = vadd.f32 %v1599_v12, %v1439_v41 }
 0x4a4   : > { %v1768_v23 = vpack.c.bf16 %v1598_v2, %v1594_v8  ;;  %v1797_v8 = vpop.permute.xlu0 %1796 }
 0x4a5   : > { %v1769_v31 = vpack.c.bf16 %v1600_v48, %v1596_v19 }
 0x4a7   : > { %v1603_v26 = vpop.f32.mrb[72].mxu1  ;;  %1912 = vmatprep.subr.bf16.mxu0 %v1769_v31  ;;  %v1802_v31 = vpop.permute.xlu1 %1801 }
 0x4a8   : > { %v1605_v49 = vpop.f32.mrb[73].mxu1  ;;  %1913 = vmatpush1.bf16.msra.mxu0 %v1768_v23  ;;  %v1604_v5 = vadd.f32 %v1603_v26, %v1444_v37 }
 0x4a9   : > { %v1607_v6 = vpop.f32.mrb[74].mxu1  ;;  %v1606_v32 = vadd.f32 %v1605_v49, %v1444_v37 }
 0x4aa   : > { %v1608_v28 = vadd.f32 %v1607_v6, %v1449_v30  ;;  %v1609_v1 = vpop.f32.mrb[75].mxu1 }
 0x4ab   : > { %v1610_v3 = vadd.f32 %v1609_v1, %v1449_v30 }
 0x4ac   : > { %v1770_v42 = vpack.c.bf16 %v1608_v28, %v1604_v5 }
 0x4ad   : > { %v1771_v55 = vpack.c.bf16 %v1610_v3, %v1606_v32  ;;  %v1807_v3 = vpop.permute.xlu0 %1806 }
 0x4af   : > { %v1613_v39 = vpop.f32.mrb[76].mxu1  ;;  %1914 = vmatprep.subr.bf16.mxu0 %v1771_v55 }
 0x4b0   : > { %v1615_v15 = vpop.f32.mrb[77].mxu1  ;;  %1915 = vmatpush1.bf16.msra.mxu0 %v1770_v42  ;;  %v1614_v4 = vadd.f32 %v1613_v39, %v1454_v34 }
 0x4b1   : > { %v1617_v16 = vpop.f32.mrb[78].mxu1  ;;  %v1616_v53 = vadd.f32 %v1615_v15, %v1454_v34  ;;  %v1812_v34 = vpop.permute.xlu1 %1811 }
 0x4b2   : > { %v1618_v33 = vadd.f32 %v1617_v16, %v1459_v36  ;;  %v1619_v14 = vpop.f32.mrb[79].mxu1 }
 0x4b3   : > { %v1620_v60 = vadd.f32 %v1619_v14, %v1459_v36 }
 0x4b4   : > { %v1772_v13 = vpack.c.bf16 %v1618_v33, %v1614_v4 }
 0x4b5   : > { %v1773_v54 = vpack.c.bf16 %v1620_v60, %v1616_v53 }
 0x4b7   : > { %1916 = vmatprep.subr.bf16.mxu0 %v1773_v54 }
 0x4b8   : > { %1917 = vmatpush1.bf16.msra.mxu0 %v1772_v13 }
 0x4bb   : > { %1935 = vmatmul.mubr.bf16.vlgmr.msra.gmra.mrb[48].mxu0 %v3747_v40 }
 0x4bc   : > { %1944 = vmatprep.mubr.bf16.mxu0 %v4171_v35 }
 0x4c3   : > { %1945 = vmatmul.mubr.bf16.gmra.mrb[52].mxu0 %v3748_v9  ;;  %v1817_v9 = vpop.permute.xlu0 %1816 }
 0x4c4   : > { %1954 = vmatprep.mubr.bf16.mxu0 %v4171_v35 }
 0x4cb   : > { %1955 = vmatmul.mubr.bf16.gmra.mrb[56].mxu0 %v3749_v56 }
 0x4cc   : > { %1964 = vmatprep.mubr.bf16.mxu0 %v4171_v35 }
 0x4d3   : > { %1965 = vmatmul.mubr.bf16.gmra.mrb[60].mxu0 %v3750_v46 }
 0x4d4   : > { %1974 = vmatprep.mubr.bf16.mxu0 %v4171_v35 }
 0x4db   : > { %1975 = vmatmul.mubr.bf16.gmra.mrb[64].mxu0 %v3751_v47 }
 0x4dc   : > { %1984 = vmatprep.mubr.bf16.mxu0 %v4171_v35 }
 0x4e3   : > { %1985 = vmatmul.mubr.bf16.gmra.mrb[68].mxu0 %v3752_v43 }
 0x4e4   : > { %1994 = vmatprep.mubr.bf16.mxu0 %v4171_v35 }
 0x4eb   : > { %1995 = vmatmul.mubr.bf16.gmra.mrb[72].mxu0 %v3753_v57 }
 0x4ec   : > { %2004 = vmatprep.mubr.bf16.mxu0 %v4171_v35 }
 0x4f3   : > { %2005 = vmatmul.mubr.bf16.gmra.mrb[76].mxu0 %v3754_v59  ;;  %v1822_v59 = vpop.permute.xlu1 %1821 }
 0x4f4   : > { %2480 = vmatprep.mubr.bf16.mxu0 %v4171_v35 }
 0x58e   : > { %v1936_v21 = vpop.f32.mrb[48].mxu0 }
 0x58f   : > { %v1937_v58 = vadd.f32 %v1936_v21, %v1777_v17  ;;  %v1938_v20 = vpop.f32.mrb[49].mxu0 }
 0x590   : > { %v1939_v45 = vadd.f32 %v1938_v20, %v1777_v17  ;;  %v1940_v27 = vpop.f32.mrb[50].mxu0 }
 0x591   : > { %3915 = vtanh.f32 %v1937_v58  ;;  %v1941_v29 = vadd.f32 %v1940_v27, %v1782_v18  ;;  %v1942_v52 = vpop.f32.mrb[51].mxu0 }
 0x592   : > { %3917 = vtanh.f32 %v1939_v45  ;;  %v1943_v11 = vadd.f32 %v1942_v52, %v1782_v18 }
 0x593   : > { %3919 = vtanh.f32 %v1941_v29 }
 0x594   : > { %3921 = vtanh.f32 %v1943_v11  ;;  %v1827_v11 = vpop.permute.xlu0 %1826 }
 0x596   : > { %v1946_v38 = vpop.f32.mrb[52].mxu0 }
 0x597   : > { %v1947_v61 = vadd.f32 %v1946_v38, %v1787_v51  ;;  %v1948_v62 = vpop.f32.mrb[53].mxu0 }
 0x598   : > { %v1949_v0 = vadd.f32 %v1948_v62, %v1787_v51  ;;  %v1950_v22 = vpop.f32.mrb[54].mxu0 }
 0x599   : > { %3923 = vtanh.f32 %v1947_v61  ;;  %v1951_v44 = vadd.f32 %v1950_v22, %v1792_v50  ;;  %v1952_v25 = vpop.f32.mrb[55].mxu0 }
 0x59a   : > { %3925 = vtanh.f32 %v1949_v0  ;;  %v1953_v63 = vadd.f32 %v1952_v25, %v1792_v50  ;;  %v1832_v0 = vpop.permute.xlu1 %1831 }
 0x59b   : > { %v3916_v41 = vpop.eup %3915  ;;  %3927 = vtanh.f32 %v1951_v44 }
 0x59c   : > { %v3918_v24 = vpop.eup %3917  ;;  %3929 = vtanh.f32 %v1953_v63 }
 0x59d   : > { %v3920_v10 = vpop.eup %3919 }
 0x59e   : > { %v3922_v7 = vpop.eup %3921  ;;  %v1956_v2 = vpop.f32.mrb[56].mxu0  ;;  %v2047_v12 = vpack.c.bf16 %v3920_v10, %v3916_v41 }
 0x59f   : > { %v1957_v19 = vadd.f32 %v1956_v2, %v1797_v8  ;;  %v1958_v48 = vpop.f32.mrb[57].mxu0  ;;  %v2048_v23 = vpack.c.bf16 %v3922_v7, %v3918_v24  ;;  %v1837_v2 = vpop.permute.xlu0 %1836 }
 0x5a0   : > { %v1959_v26 = vadd.f32 %v1958_v48, %v1797_v8  ;;  %v1960_v30 = vpop.f32.mrb[58].mxu0 }
 0x5a1   : > { %3931 = vtanh.f32 %v1957_v19  ;;  %v1961_v49 = vadd.f32 %v1960_v30, %v1802_v31  ;;  %v1962_v37 = vpop.f32.mrb[59].mxu0  ;;  %2191 = vmatprep.subr.bf16.mxu1 %v2048_v23 }
 0x5a2   : > { %3933 = vtanh.f32 %v1959_v26  ;;  %v1963_v6 = vadd.f32 %v1962_v37, %v1802_v31  ;;  %2192 = vmatpush1.bf16.msra.mxu1 %v2047_v12  ;;  %v1842_v26 = vpop.permute.xlu1 %1841 }
 0x5a3   : > { %v3924_v5 = vpop.eup %3923  ;;  %3935 = vtanh.f32 %v1961_v49 }
 0x5a4   : > { %v3926_v28 = vpop.eup %3925  ;;  %3937 = vtanh.f32 %v1963_v6 }
 0x5a5   : > { %v3928_v1 = vpop.eup %3927 }
 0x5a6   : > { %v3930_v32 = vpop.eup %3929  ;;  %v1966_v42 = vpop.f32.mrb[60].mxu0  ;;  %v2049_v55 = vpack.c.bf16 %v3928_v1, %v3924_v5 }
 0x5a7   : > { %v1967_v39 = vadd.f32 %v1966_v42, %v1807_v3  ;;  %v1968_v36 = vpop.f32.mrb[61].mxu0  ;;  %v2050_v15 = vpack.c.bf16 %v3930_v32, %v3926_v28  ;;  %v1847_v42 = vpop.permute.xlu0 %1846 }
 0x5a8   : > { %v1969_v16 = vadd.f32 %v1968_v36, %v1807_v3  ;;  %v1970_v4 = vpop.f32.mrb[62].mxu0 }
 0x5a9   : > { %3939 = vtanh.f32 %v1967_v39  ;;  %v1971_v33 = vadd.f32 %v1970_v4, %v1812_v34  ;;  %v1972_v14 = vpop.f32.mrb[63].mxu0  ;;  %2193 = vmatprep.subr.bf16.mxu1 %v2050_v15 }
 0x5aa   : > { %3941 = vtanh.f32 %v1969_v16  ;;  %v1973_v53 = vadd.f32 %v1972_v14, %v1812_v34  ;;  %2194 = vmatpush1.bf16.msra.mxu1 %v2049_v55  ;;  %v1852_v16 = vpop.permute.xlu1 %1851 }
 0x5ab   : > { %v3932_v60 = vpop.eup %3931  ;;  %3943 = vtanh.f32 %v1971_v33 }
 0x5ac   : > { %v3934_v13 = vpop.eup %3933  ;;  %3945 = vtanh.f32 %v1973_v53 }
 0x5ad   : > { %v3936_v54 = vpop.eup %3935 }
 0x5ae   : > { %v3938_v40 = vpop.eup %3937  ;;  %v1976_v56 = vpop.f32.mrb[64].mxu0  ;;  %v2051_v46 = vpack.c.bf16 %v3936_v54, %v3932_v60 }
 0x5af   : > { %v1977_v47 = vadd.f32 %v1976_v56, %v1817_v9  ;;  %v1978_v43 = vpop.f32.mrb[65].mxu0  ;;  %v2052_v57 = vpack.c.bf16 %v3938_v40, %v3934_v13 }
 0x5b0   : > { %v1979_v17 = vadd.f32 %v1978_v43, %v1817_v9  ;;  %v1980_v21 = vpop.f32.mrb[66].mxu0 }
 0x5b1   : > { %3947 = vtanh.f32 %v1977_v47  ;;  %v1981_v58 = vadd.f32 %v1980_v21, %v1822_v59  ;;  %v1982_v20 = vpop.f32.mrb[67].mxu0  ;;  %2195 = vmatprep.subr.bf16.mxu1 %v2052_v57 }
 0x5b2   : > { %3949 = vtanh.f32 %v1979_v17  ;;  %v1983_v18 = vadd.f32 %v1982_v20, %v1822_v59  ;;  %2196 = vmatpush1.bf16.msra.mxu1 %v2051_v46  ;;  %v3756_v20 = vld [vmem:[%s5377_s1 + $0x148] sm:$0xff]  }
 0x5b3   : > { %v3940_v45 = vpop.eup %3939  ;;  %3951 = vtanh.f32 %v1981_v58  ;;  %v3755_v58 = vld [vmem:[%s5377_s1 + $0x140] sm:$0xff]  }
 0x5b4   : > { %v3942_v27 = vpop.eup %3941  ;;  %3953 = vtanh.f32 %v1983_v18  ;;  %v3757_v18 = vld [vmem:[%s5377_s1 + $0x150] sm:$0xff]  }
 0x5b5   : > { %v3944_v29 = vpop.eup %3943 }
 0x5b6   : > { %v3946_v52 = vpop.eup %3945  ;;  %v1986_v51 = vpop.f32.mrb[68].mxu0  ;;  %v2053_v38 = vpack.c.bf16 %v3944_v29, %v3940_v45  ;;  %v3758_v45 = vld [vmem:[%s5377_s1 + $0x158] sm:$0xff]   ;;  %v3760_v29 = vld [vmem:[%s5377_s1 + $0x168] sm:$0xff]  }
 0x5b7   : > { %v1987_v61 = vadd.f32 %v1986_v51, %v1827_v11  ;;  %v1988_v62 = vpop.f32.mrb[69].mxu0  ;;  %v2054_v50 = vpack.c.bf16 %v3946_v52, %v3942_v27  ;;  %v3759_v27 = vld [vmem:[%s5377_s1 + $0x160] sm:$0xff]   ;;  %v3761_v52 = vld [vmem:[%s5377_s1 + $0x170] sm:$0xff]  }
 0x5b8   : > { %v1989_v22 = vadd.f32 %v1988_v62, %v1827_v11  ;;  %v1990_v44 = vpop.f32.mrb[70].mxu0  ;;  %v3762_v11 = vld [vmem:[%s5377_s1 + $0x178] sm:$0xff]   ;;  %v2066_v62 = vpop.permute.xlu0 %2065 }
 0x5b9   : > { %3955 = vtanh.f32 %v1987_v61  ;;  %v1991_v25 = vadd.f32 %v1990_v44, %v1832_v0  ;;  %v1992_v63 = vpop.f32.mrb[71].mxu0  ;;  %2197 = vmatprep.subr.bf16.mxu1 %v2054_v50 }
 0x5ba   : > { %3957 = vtanh.f32 %v1989_v22  ;;  %v1993_v41 = vadd.f32 %v1992_v63, %v1832_v0  ;;  %2198 = vmatpush1.bf16.msra.mxu1 %v2053_v38  ;;  %v2071_v38 = vpop.permute.xlu1 %2070 }
 0x5bb   : > { %v3948_v24 = vpop.eup %3947  ;;  %3959 = vtanh.f32 %v1991_v25 }
 0x5bc   : > { %v3950_v10 = vpop.eup %3949  ;;  %3961 = vtanh.f32 %v1993_v41 }
 0x5bd   : > { %v3952_v7 = vpop.eup %3951 }
 0x5be   : > { %v3954_v8 = vpop.eup %3953  ;;  %v1996_v12 = vpop.f32.mrb[72].mxu0  ;;  %v2055_v19 = vpack.c.bf16 %v3952_v7, %v3948_v24 }
 0x5bf   : > { %v1997_v48 = vadd.f32 %v1996_v12, %v1837_v2  ;;  %v1998_v23 = vpop.f32.mrb[73].mxu0  ;;  %v2056_v31 = vpack.c.bf16 %v3954_v8, %v3950_v10  ;;  %v2081_v7 = vpop.permute.xlu1 %2080 }
 0x5c0   : > { %v1999_v30 = vadd.f32 %v1998_v23, %v1837_v2  ;;  %v2000_v49 = vpop.f32.mrb[74].mxu0  ;;  %v2076_v2 = vpop.permute.xlu0 %2075 }
 0x5c1   : > { %3963 = vtanh.f32 %v1997_v48  ;;  %v2001_v37 = vadd.f32 %v2000_v49, %v1842_v26  ;;  %v2002_v6 = vpop.f32.mrb[75].mxu0  ;;  %2199 = vmatprep.subr.bf16.mxu1 %v2056_v31 }
 0x5c2   : > { %3965 = vtanh.f32 %v1999_v30  ;;  %v2003_v5 = vadd.f32 %v2002_v6, %v1842_v26  ;;  %2200 = vmatpush1.bf16.msra.mxu1 %v2055_v19 }
 0x5c3   : > { %v3956_v28 = vpop.eup %3955  ;;  %3967 = vtanh.f32 %v2001_v37  ;;  %v2091_v6 = vpop.permute.xlu1 %2090 }
 0x5c4   : > { %v3958_v1 = vpop.eup %3957  ;;  %3969 = vtanh.f32 %v2003_v5 }
 0x5c5   : > { %v3960_v32 = vpop.eup %3959 }
 0x5c6   : > { %v3962_v3 = vpop.eup %3961  ;;  %v2006_v55 = vpop.f32.mrb[76].mxu0  ;;  %v2057_v39 = vpack.c.bf16 %v3960_v32, %v3956_v28 }
 0x5c7   : > { %v2007_v36 = vadd.f32 %v2006_v55, %v1847_v42  ;;  %v2008_v15 = vpop.f32.mrb[77].mxu0  ;;  %v2058_v34 = vpack.c.bf16 %v3962_v3, %v3958_v1  ;;  %v2086_v28 = vpop.permute.xlu0 %2085 }
 0x5c8   : > { %v2009_v4 = vadd.f32 %v2008_v15, %v1847_v42  ;;  %v2010_v33 = vpop.f32.mrb[78].mxu0 }
 0x5c9   : > { %3971 = vtanh.f32 %v2007_v36  ;;  %v2011_v14 = vadd.f32 %v2010_v33, %v1852_v16  ;;  %v2012_v53 = vpop.f32.mrb[79].mxu0  ;;  %2201 = vmatprep.subr.bf16.mxu1 %v2058_v34 }
 0x5ca   : > { %3973 = vtanh.f32 %v2009_v4  ;;  %v2013_v60 = vadd.f32 %v2012_v53, %v1852_v16  ;;  %2202 = vmatpush1.bf16.msra.mxu1 %v2057_v39  ;;  %v2101_v16 = vpop.permute.xlu1 %2100 }
 0x5cb   : > { %v3964_v13 = vpop.eup %3963  ;;  %3975 = vtanh.f32 %v2011_v14  ;;  %v2096_v33 = vpop.permute.xlu0 %2095 }
 0x5cc   : > { %v3966_v54 = vpop.eup %3965  ;;  %3977 = vtanh.f32 %v2013_v60 }
 0x5cd   : > { %v3968_v40 = vpop.eup %3967 }
 0x5ce   : > { %v3970_v9 = vpop.eup %3969  ;;  %v2059_v56 = vpack.c.bf16 %v3968_v40, %v3964_v13 }
 0x5cf   : > { %v2060_v46 = vpack.c.bf16 %v3970_v9, %v3966_v54 }
 0x5d1   : > { %2203 = vmatprep.subr.bf16.mxu1 %v2060_v46 }
 0x5d2   : > { %2204 = vmatpush1.bf16.msra.mxu1 %v2059_v56 }
 0x5d3   : > { %v3972_v47 = vpop.eup %3971 }
 0x5d4   : > { %v3974_v43 = vpop.eup %3973 }
 0x5d5   : > { %v3976_v57 = vpop.eup %3975 }
 0x5d6   : > { %v3978_v59 = vpop.eup %3977  ;;  %v2061_v17 = vpack.c.bf16 %v3976_v57, %v3972_v47  ;;  %v2111_v47 = vpop.permute.xlu1 %2110 }
 0x5d7   : > { %v2062_v21 = vpack.c.bf16 %v3978_v59, %v3974_v43  ;;  %v2106_v57 = vpop.permute.xlu0 %2105 }
 0x5d9   : > { %2205 = vmatprep.subr.bf16.mxu1 %v2062_v21 }
 0x5da   : > { %2206 = vmatpush1.bf16.msra.mxu1 %v2061_v17 }
 0x5dd   : > { %2224 = vmatmul.mubr.bf16.vlgmr.msra.gmra.mrb[80].mxu1 %v3755_v58 }
 0x5de   : > { %2233 = vmatprep.mubr.bf16.mxu1 %v4171_v35 }
 0x5e5   : > { %2234 = vmatmul.mubr.bf16.gmra.mrb[84].mxu1 %v3756_v20 }
 0x5e6   : > { %2243 = vmatprep.mubr.bf16.mxu1 %v4171_v35 }
 0x5ed   : > { %2244 = vmatmul.mubr.bf16.gmra.mrb[88].mxu1 %v3757_v18 }
 0x5ee   : > { %2253 = vmatprep.mubr.bf16.mxu1 %v4171_v35 }
 0x5f5   : > { %2254 = vmatmul.mubr.bf16.gmra.mrb[92].mxu1 %v3758_v45 }
 0x5f6   : > { %2263 = vmatprep.mubr.bf16.mxu1 %v4171_v35 }
 0x5fd   : > { %2264 = vmatmul.mubr.bf16.gmra.mrb[96].mxu1 %v3759_v27 }
 0x5fe   : > { %2273 = vmatprep.mubr.bf16.mxu1 %v4171_v35 }
 0x605   : > { %2274 = vmatmul.mubr.bf16.gmra.mrb[100].mxu1 %v3760_v29 }
 0x606   : > { %2283 = vmatprep.mubr.bf16.mxu1 %v4171_v35 }
 0x60d   : > { %2284 = vmatmul.mubr.bf16.gmra.mrb[104].mxu1 %v3761_v52  ;;  %v2121_v52 = vpop.permute.xlu1 %2120 }
 0x60e   : > { %2293 = vmatprep.mubr.bf16.mxu1 %v4171_v35 }
 0x615   : > { %2294 = vmatmul.mubr.bf16.gmra.mrb[108].mxu1 %v3762_v11 }
 0x616   : > { %2769 = vmatprep.mubr.bf16.mxu1 %v4171_v35 }
 0x6b0   : > { %v2225_v51 = vpop.f32.mrb[80].mxu1 }
 0x6b1   : > { %v2227_v61 = vpop.f32.mrb[81].mxu1  ;;  %v2226_v0 = vadd.f32 %v2225_v51, %v2066_v62  ;;  %v2116_v51 = vpop.permute.xlu0 %2115 }
 0x6b2   : > { %v2229_v50 = vpop.f32.mrb[82].mxu1  ;;  %v2228_v25 = vadd.f32 %v2227_v61, %v2066_v62 }
 0x6b3   : > { %v2230_v22 = vadd.f32 %v2229_v50, %v2071_v38  ;;  %v2231_v44 = vpop.f32.mrb[83].mxu1 }
 0x6b4   : > { %v2232_v63 = vadd.f32 %v2231_v44, %v2071_v38 }
 0x6b5   : > { %v2304_v41 = vpack.c.bf16 %v2230_v22, %v2226_v0 }
 0x6b6   : > { %v2305_v24 = vpack.c.bf16 %v2232_v63, %v2228_v25 }
 0x6b8   : > { %v2235_v10 = vpop.f32.mrb[84].mxu1  ;;  %2448 = vmatprep.subr.bf16.mxu0 %v2305_v24 }
 0x6b9   : > { %v2237_v8 = vpop.f32.mrb[85].mxu1  ;;  %2449 = vmatpush1.bf16.msra.mxu0 %v2304_v41  ;;  %v2236_v19 = vadd.f32 %v2235_v10, %v2076_v2  ;;  %v2131_v41 = vpop.permute.xlu1 %2130 }
 0x6ba   : > { %v2239_v12 = vpop.f32.mrb[86].mxu1  ;;  %v2238_v31 = vadd.f32 %v2237_v8, %v2076_v2  ;;  %v2126_v10 = vpop.permute.xlu0 %2125 }
 0x6bb   : > { %v2240_v48 = vadd.f32 %v2239_v12, %v2081_v7  ;;  %v2241_v23 = vpop.f32.mrb[87].mxu1 }
 0x6bc   : > { %v2242_v26 = vadd.f32 %v2241_v23, %v2081_v7 }
 0x6bd   : > { %v2306_v30 = vpack.c.bf16 %v2240_v48, %v2236_v19 }
 0x6be   : > { %v2307_v49 = vpack.c.bf16 %v2242_v26, %v2238_v31 }
 0x6c0   : > { %v2245_v37 = vpop.f32.mrb[88].mxu1  ;;  %2450 = vmatprep.subr.bf16.mxu0 %v2307_v49 }
 0x6c1   : > { %v2247_v5 = vpop.f32.mrb[89].mxu1  ;;  %2451 = vmatpush1.bf16.msra.mxu0 %v2306_v30  ;;  %v2246_v32 = vadd.f32 %v2245_v37, %v2086_v28  ;;  %v2141_v30 = vpop.permute.xlu1 %2140 }
 0x6c2   : > { %v2249_v1 = vpop.f32.mrb[90].mxu1  ;;  %v2248_v55 = vadd.f32 %v2247_v5, %v2086_v28  ;;  %v2136_v37 = vpop.permute.xlu0 %2135 }
 0x6c3   : > { %v2250_v3 = vadd.f32 %v2249_v1, %v2091_v6  ;;  %v2251_v42 = vpop.f32.mrb[91].mxu1 }
 0x6c4   : > { %v2252_v39 = vadd.f32 %v2251_v42, %v2091_v6 }
 0x6c5   : > { %v2308_v36 = vpack.c.bf16 %v2250_v3, %v2246_v32 }
 0x6c6   : > { %v2309_v15 = vpack.c.bf16 %v2252_v39, %v2248_v55  ;;  %v3763_v39 = vld [vmem:[%s5377_s1 + $0x180] sm:$0xff]  }
 0x6c8   : > { %v2255_v34 = vpop.f32.mrb[92].mxu1  ;;  %2452 = vmatprep.subr.bf16.mxu0 %v2309_v15  ;;  %v3765_v15 = vld [vmem:[%s5377_s1 + $0x190] sm:$0xff]  }
 0x6c9   : > { %v2257_v4 = vpop.f32.mrb[93].mxu1  ;;  %2453 = vmatpush1.bf16.msra.mxu0 %v2308_v36  ;;  %v2256_v53 = vadd.f32 %v2255_v34, %v2096_v33  ;;  %v3764_v36 = vld [vmem:[%s5377_s1 + $0x188] sm:$0xff]   ;;  %v3766_v34 = vld [vmem:[%s5377_s1 + $0x198] sm:$0xff]  }
 0x6ca   : > { %v2259_v14 = vpop.f32.mrb[94].mxu1  ;;  %v2258_v54 = vadd.f32 %v2257_v4, %v2096_v33  ;;  %v3768_v4 = vld [vmem:[%s5377_s1 + $0x1a8] sm:$0xff]   ;;  %v3769_v33 = vld [vmem:[%s5377_s1 + $0x1b0] sm:$0xff]  }
 0x6cb   : > { %v2260_v60 = vadd.f32 %v2259_v14, %v2101_v16  ;;  %v2261_v13 = vpop.f32.mrb[95].mxu1  ;;  %v3770_v14 = vld [vmem:[%s5377_s1 + $0x1b8] sm:$0xff]  }
 0x6cc   : > { %v2262_v40 = vadd.f32 %v2261_v13, %v2101_v16  ;;  %v3767_v16 = vld [vmem:[%s5377_s1 + $0x1a0] sm:$0xff]  }
 0x6cd   : > { %v2310_v9 = vpack.c.bf16 %v2260_v60, %v2256_v53  ;;  %v2323_v53 = vpop.permute.xlu0 %2322 }
 0x6ce   : > { %v2311_v56 = vpack.c.bf16 %v2262_v40, %v2258_v54  ;;  %v2328_v40 = vpop.permute.xlu1 %2327 }
 0x6d0   : > { %v2265_v46 = vpop.f32.mrb[96].mxu1  ;;  %2454 = vmatprep.subr.bf16.mxu0 %v2311_v56 }
 0x6d1   : > { %v2267_v43 = vpop.f32.mrb[97].mxu1  ;;  %2455 = vmatpush1.bf16.msra.mxu0 %v2310_v9  ;;  %v2266_v17 = vadd.f32 %v2265_v46, %v2106_v57 }
 0x6d2   : > { %v2269_v59 = vpop.f32.mrb[98].mxu1  ;;  %v2268_v20 = vadd.f32 %v2267_v43, %v2106_v57  ;;  %v2333_v57 = vpop.permute.xlu0 %2332 }
 0x6d3   : > { %v2270_v21 = vadd.f32 %v2269_v59, %v2111_v47  ;;  %v2271_v58 = vpop.f32.mrb[99].mxu1 }
 0x6d4   : > { %v2272_v18 = vadd.f32 %v2271_v58, %v2111_v47  ;;  %v2338_v58 = vpop.permute.xlu1 %2337 }
 0x6d5   : > { %v2312_v45 = vpack.c.bf16 %v2270_v21, %v2266_v17 }
 0x6d6   : > { %v2313_v27 = vpack.c.bf16 %v2272_v18, %v2268_v20 }
 0x6d8   : > { %v2275_v29 = vpop.f32.mrb[100].mxu1  ;;  %2456 = vmatprep.subr.bf16.mxu0 %v2313_v27 }
 0x6d9   : > { %v2277_v11 = vpop.f32.mrb[101].mxu1  ;;  %2457 = vmatpush1.bf16.msra.mxu0 %v2312_v45  ;;  %v2276_v61 = vadd.f32 %v2275_v29, %v2116_v51 }
 0x6da   : > { %v2279_v38 = vpop.f32.mrb[102].mxu1  ;;  %v2278_v0 = vadd.f32 %v2277_v11, %v2116_v51 }
 0x6db   : > { %v2280_v62 = vadd.f32 %v2279_v38, %v2121_v52  ;;  %v2281_v50 = vpop.f32.mrb[103].mxu1 }
 0x6dc   : > { %v2282_v22 = vadd.f32 %v2281_v50, %v2121_v52 }
 0x6dd   : > { %v2314_v44 = vpack.c.bf16 %v2280_v62, %v2276_v61  ;;  %v2343_v61 = vpop.permute.xlu0 %2342 }
 0x6de   : > { %v2315_v25 = vpack.c.bf16 %v2282_v22, %v2278_v0 }
 0x6e0   : > { %v2285_v63 = vpop.f32.mrb[104].mxu1  ;;  %2458 = vmatprep.subr.bf16.mxu0 %v2315_v25  ;;  %v2348_v25 = vpop.permute.xlu1 %2347 }
 0x6e1   : > { %v2287_v24 = vpop.f32.mrb[105].mxu1  ;;  %2459 = vmatpush1.bf16.msra.mxu0 %v2314_v44  ;;  %v2286_v8 = vadd.f32 %v2285_v63, %v2126_v10 }
 0x6e2   : > { %v2289_v7 = vpop.f32.mrb[106].mxu1  ;;  %v2288_v19 = vadd.f32 %v2287_v24, %v2126_v10 }
 0x6e3   : > { %v2290_v2 = vadd.f32 %v2289_v7, %v2131_v41  ;;  %v2291_v12 = vpop.f32.mrb[107].mxu1 }
 0x6e4   : > { %v2292_v48 = vadd.f32 %v2291_v12, %v2131_v41 }
 0x6e5   : > { %v2316_v23 = vpack.c.bf16 %v2290_v2, %v2286_v8 }
 0x6e6   : > { %v2317_v31 = vpack.c.bf16 %v2292_v48, %v2288_v19  ;;  %v2353_v48 = vpop.permute.xlu0 %2352 }
 0x6e8   : > { %v2295_v26 = vpop.f32.mrb[108].mxu1  ;;  %2460 = vmatprep.subr.bf16.mxu0 %v2317_v31 }
 0x6e9   : > { %v2297_v49 = vpop.f32.mrb[109].mxu1  ;;  %2461 = vmatpush1.bf16.msra.mxu0 %v2316_v23  ;;  %v2296_v5 = vadd.f32 %v2295_v26, %v2136_v37 }
 0x6ea   : > { %v2299_v6 = vpop.f32.mrb[110].mxu1  ;;  %v2298_v32 = vadd.f32 %v2297_v49, %v2136_v37  ;;  %v2358_v37 = vpop.permute.xlu1 %2357 }
 0x6eb   : > { %v2300_v28 = vadd.f32 %v2299_v6, %v2141_v30  ;;  %v2301_v1 = vpop.f32.mrb[111].mxu1 }
 0x6ec   : > { %v2302_v3 = vadd.f32 %v2301_v1, %v2141_v30 }
 0x6ed   : > { %v2318_v42 = vpack.c.bf16 %v2300_v28, %v2296_v5 }
 0x6ee   : > { %v2319_v55 = vpack.c.bf16 %v2302_v3, %v2298_v32 }
 0x6f0   : > { %2462 = vmatprep.subr.bf16.mxu0 %v2319_v55 }
 0x6f1   : > { %2463 = vmatpush1.bf16.msra.mxu0 %v2318_v42 }
 0x6f4   : > { %2481 = vmatmul.mubr.bf16.vlgmr.msra.gmra.mrb[80].mxu0 %v3763_v39 }
 0x6f5   : > { %2490 = vmatprep.mubr.bf16.mxu0 %v4171_v35 }
 0x6fc   : > { %2491 = vmatmul.mubr.bf16.gmra.mrb[84].mxu0 %v3764_v36  ;;  %v2363_v36 = vpop.permute.xlu0 %2362 }
 0x6fd   : > { %2500 = vmatprep.mubr.bf16.mxu0 %v4171_v35 }
 0x704   : > { %2501 = vmatmul.mubr.bf16.gmra.mrb[88].mxu0 %v3765_v15 }
 0x705   : > { %2510 = vmatprep.mubr.bf16.mxu0 %v4171_v35 }
 0x70c   : > { %2511 = vmatmul.mubr.bf16.gmra.mrb[92].mxu0 %v3766_v34 }
 0x70d   : > { %2520 = vmatprep.mubr.bf16.mxu0 %v4171_v35 }
 0x714   : > { %2521 = vmatmul.mubr.bf16.gmra.mrb[96].mxu0 %v3767_v16 }
 0x715   : > { %2530 = vmatprep.mubr.bf16.mxu0 %v4171_v35 }
 0x71c   : > { %2531 = vmatmul.mubr.bf16.gmra.mrb[100].mxu0 %v3768_v4 }
 0x71d   : > { %2540 = vmatprep.mubr.bf16.mxu0 %v4171_v35 }
 0x724   : > { %2541 = vmatmul.mubr.bf16.gmra.mrb[104].mxu0 %v3769_v33 }
 0x725   : > { %2550 = vmatprep.mubr.bf16.mxu0 %v4171_v35 }
 0x72c   : > { %2551 = vmatmul.mubr.bf16.gmra.mrb[108].mxu0 %v3770_v14  ;;  %v2368_v14 = vpop.permute.xlu1 %2367 }
 0x72d   : > { %3058 = vmatprep.mubr.bf16.mxu0 %v4171_v35 }
 0x7c7   : > { %v2482_v60 = vpop.f32.mrb[80].mxu0 }
 0x7c8   : > { %v2483_v13 = vadd.f32 %v2482_v60, %v2323_v53  ;;  %v2484_v54 = vpop.f32.mrb[81].mxu0 }
 0x7c9   : > { %v2485_v9 = vadd.f32 %v2484_v54, %v2323_v53  ;;  %v2486_v56 = vpop.f32.mrb[82].mxu0 }
 0x7ca   : > { %3979 = vtanh.f32 %v2483_v13  ;;  %v2487_v46 = vadd.f32 %v2486_v56, %v2328_v40  ;;  %v2488_v47 = vpop.f32.mrb[83].mxu0 }
 0x7cb   : > { %3981 = vtanh.f32 %v2485_v9  ;;  %v2489_v43 = vadd.f32 %v2488_v47, %v2328_v40 }
 0x7cc   : > { %3983 = vtanh.f32 %v2487_v46 }
 0x7cd   : > { %3985 = vtanh.f32 %v2489_v43  ;;  %v2373_v43 = vpop.permute.xlu0 %2372 }
 0x7cf   : > { %v2492_v59 = vpop.f32.mrb[84].mxu0 }
 0x7d0   : > { %v2493_v17 = vadd.f32 %v2492_v59, %v2333_v57  ;;  %v2494_v21 = vpop.f32.mrb[85].mxu0 }
 0x7d1   : > { %v2495_v20 = vadd.f32 %v2494_v21, %v2333_v57  ;;  %v2496_v18 = vpop.f32.mrb[86].mxu0 }
 0x7d2   : > { %3987 = vtanh.f32 %v2493_v17  ;;  %v2497_v45 = vadd.f32 %v2496_v18, %v2338_v58  ;;  %v2498_v27 = vpop.f32.mrb[87].mxu0 }
 0x7d3   : > { %3989 = vtanh.f32 %v2495_v20  ;;  %v2499_v29 = vadd.f32 %v2498_v27, %v2338_v58  ;;  %v2378_v20 = vpop.permute.xlu1 %2377 }
 0x7d4   : > { %v3980_v52 = vpop.eup %3979  ;;  %3991 = vtanh.f32 %v2497_v45 }
 0x7d5   : > { %v3982_v11 = vpop.eup %3981  ;;  %3993 = vtanh.f32 %v2499_v29 }
 0x7d6   : > { %v3984_v51 = vpop.eup %3983 }
 0x7d7   : > { %v3986_v38 = vpop.eup %3985  ;;  %v2502_v62 = vpop.f32.mrb[88].mxu0  ;;  %v2593_v50 = vpack.c.bf16 %v3984_v51, %v3980_v52 }
 0x7d8   : > { %v2503_v0 = vadd.f32 %v2502_v62, %v2343_v61  ;;  %v2504_v22 = vpop.f32.mrb[89].mxu0  ;;  %v2594_v44 = vpack.c.bf16 %v3986_v38, %v3982_v11  ;;  %v2383_v62 = vpop.permute.xlu0 %2382 }
 0x7d9   : > { %v2505_v63 = vadd.f32 %v2504_v22, %v2343_v61  ;;  %v2506_v41 = vpop.f32.mrb[90].mxu0 }
 0x7da   : > { %3995 = vtanh.f32 %v2503_v0  ;;  %v2507_v24 = vadd.f32 %v2506_v41, %v2348_v25  ;;  %v2508_v10 = vpop.f32.mrb[91].mxu0  ;;  %2737 = vmatprep.subr.bf16.mxu1 %v2594_v44 }
 0x7db   : > { %3997 = vtanh.f32 %v2505_v63  ;;  %v2509_v7 = vadd.f32 %v2508_v10, %v2348_v25  ;;  %2738 = vmatpush1.bf16.msra.mxu1 %v2593_v50  ;;  %v2388_v63 = vpop.permute.xlu1 %2387 }
 0x7dc   : > { %v3988_v8 = vpop.eup %3987  ;;  %3999 = vtanh.f32 %v2507_v24 }
 0x7dd   : > { %v3990_v2 = vpop.eup %3989  ;;  %4001 = vtanh.f32 %v2509_v7 }
 0x7de   : > { %v3992_v12 = vpop.eup %3991 }
 0x7df   : > { %v3994_v19 = vpop.eup %3993  ;;  %v2512_v23 = vpop.f32.mrb[92].mxu0  ;;  %v2595_v31 = vpack.c.bf16 %v3992_v12, %v3988_v8 }
 0x7e0   : > { %v2513_v26 = vadd.f32 %v2512_v23, %v2353_v48  ;;  %v2514_v30 = vpop.f32.mrb[93].mxu0  ;;  %v2596_v49 = vpack.c.bf16 %v3994_v19, %v3990_v2  ;;  %v2393_v23 = vpop.permute.xlu0 %2392 }
 0x7e1   : > { %v2515_v6 = vadd.f32 %v2514_v30, %v2353_v48  ;;  %v2516_v5 = vpop.f32.mrb[94].mxu0 }
 0x7e2   : > { %4003 = vtanh.f32 %v2513_v26  ;;  %v2517_v28 = vadd.f32 %v2516_v5, %v2358_v37  ;;  %v2518_v1 = vpop.f32.mrb[95].mxu0  ;;  %2739 = vmatprep.subr.bf16.mxu1 %v2596_v49 }
 0x7e3   : > { %4005 = vtanh.f32 %v2515_v6  ;;  %v2519_v32 = vadd.f32 %v2518_v1, %v2358_v37  ;;  %2740 = vmatpush1.bf16.msra.mxu1 %v2595_v31  ;;  %v2398_v6 = vpop.permute.xlu1 %2397 }
 0x7e4   : > { %v3996_v3 = vpop.eup %3995  ;;  %4007 = vtanh.f32 %v2517_v28 }
 0x7e5   : > { %v3998_v42 = vpop.eup %3997  ;;  %4009 = vtanh.f32 %v2519_v32 }
 0x7e6   : > { %v4000_v55 = vpop.eup %3999 }
 0x7e7   : > { %v4002_v39 = vpop.eup %4001  ;;  %v2522_v15 = vpop.f32.mrb[96].mxu0  ;;  %v2597_v34 = vpack.c.bf16 %v4000_v55, %v3996_v3 }
 0x7e8   : > { %v2523_v16 = vadd.f32 %v2522_v15, %v2363_v36  ;;  %v2524_v4 = vpop.f32.mrb[97].mxu0  ;;  %v2598_v33 = vpack.c.bf16 %v4002_v39, %v3998_v42 }
 0x7e9   : > { %v2525_v53 = vadd.f32 %v2524_v4, %v2363_v36  ;;  %v2526_v60 = vpop.f32.mrb[98].mxu0 }
 0x7ea   : > { %4011 = vtanh.f32 %v2523_v16  ;;  %v2527_v13 = vadd.f32 %v2526_v60, %v2368_v14  ;;  %v2528_v54 = vpop.f32.mrb[99].mxu0  ;;  %2741 = vmatprep.subr.bf16.mxu1 %v2598_v33 }
 0x7eb   : > { %4013 = vtanh.f32 %v2525_v53  ;;  %v2529_v40 = vadd.f32 %v2528_v54, %v2368_v14  ;;  %2742 = vmatpush1.bf16.msra.mxu1 %v2597_v34  ;;  %v3772_v54 = vld [vmem:[%s5377_s1 + $0x1c8] sm:$0xff]  }
 0x7ec   : > { %v4004_v9 = vpop.eup %4003  ;;  %4015 = vtanh.f32 %v2527_v13  ;;  %v3771_v13 = vld [vmem:[%s5377_s1 + $0x1c0] sm:$0xff]  }
 0x7ed   : > { %v4006_v56 = vpop.eup %4005  ;;  %4017 = vtanh.f32 %v2529_v40  ;;  %v3773_v40 = vld [vmem:[%s5377_s1 + $0x1d0] sm:$0xff]  }
 0x7ee   : > { %v4008_v46 = vpop.eup %4007 }
 0x7ef   : > { %v4010_v47 = vpop.eup %4009  ;;  %v2532_v57 = vpop.f32.mrb[100].mxu0  ;;  %v2599_v59 = vpack.c.bf16 %v4008_v46, %v4004_v9  ;;  %v3774_v9 = vld [vmem:[%s5377_s1 + $0x1d8] sm:$0xff]   ;;  %v3776_v46 = vld [vmem:[%s5377_s1 + $0x1e8] sm:$0xff]  }
 0x7f0   : > { %v2533_v17 = vadd.f32 %v2532_v57, %v2373_v43  ;;  %v2534_v21 = vpop.f32.mrb[101].mxu0  ;;  %v2600_v58 = vpack.c.bf16 %v4010_v47, %v4006_v56  ;;  %v3775_v56 = vld [vmem:[%s5377_s1 + $0x1e0] sm:$0xff]   ;;  %v3777_v47 = vld [vmem:[%s5377_s1 + $0x1f0] sm:$0xff]  }
 0x7f1   : > { %v2535_v18 = vadd.f32 %v2534_v21, %v2373_v43  ;;  %v2536_v45 = vpop.f32.mrb[102].mxu0  ;;  %v3778_v43 = vld [vmem:[%s5377_s1 + $0x1f8] sm:$0xff]   ;;  %v2612_v21 = vpop.permute.xlu0 %2611 }
 0x7f2   : > { %4019 = vtanh.f32 %v2533_v17  ;;  %v2537_v27 = vadd.f32 %v2536_v45, %v2378_v20  ;;  %v2538_v29 = vpop.f32.mrb[103].mxu0  ;;  %2743 = vmatprep.subr.bf16.mxu1 %v2600_v58 }
 0x7f3   : > { %4021 = vtanh.f32 %v2535_v18  ;;  %v2539_v52 = vadd.f32 %v2538_v29, %v2378_v20  ;;  %2744 = vmatpush1.bf16.msra.mxu1 %v2599_v59  ;;  %v2617_v59 = vpop.permute.xlu1 %2616 }
 0x7f4   : > { %v4012_v11 = vpop.eup %4011  ;;  %4023 = vtanh.f32 %v2537_v27 }
 0x7f5   : > { %v4014_v51 = vpop.eup %4013  ;;  %4025 = vtanh.f32 %v2539_v52 }
 0x7f6   : > { %v4016_v38 = vpop.eup %4015 }
 0x7f7   : > { %v4018_v61 = vpop.eup %4017  ;;  %v2542_v50 = vpop.f32.mrb[104].mxu0  ;;  %v2601_v0 = vpack.c.bf16 %v4016_v38, %v4012_v11 }
 0x7f8   : > { %v2543_v22 = vadd.f32 %v2542_v50, %v2383_v62  ;;  %v2544_v44 = vpop.f32.mrb[105].mxu0  ;;  %v2602_v25 = vpack.c.bf16 %v4018_v61, %v4014_v51  ;;  %v2627_v38 = vpop.permute.xlu1 %2626 }
 0x7f9   : > { %v2545_v41 = vadd.f32 %v2544_v44, %v2383_v62  ;;  %v2546_v24 = vpop.f32.mrb[106].mxu0  ;;  %v2622_v62 = vpop.permute.xlu0 %2621 }
 0x7fa   : > { %4027 = vtanh.f32 %v2543_v22  ;;  %v2547_v10 = vadd.f32 %v2546_v24, %v2388_v63  ;;  %v2548_v7 = vpop.f32.mrb[107].mxu0  ;;  %2745 = vmatprep.subr.bf16.mxu1 %v2602_v25 }
 0x7fb   : > { %4029 = vtanh.f32 %v2545_v41  ;;  %v2549_v8 = vadd.f32 %v2548_v7, %v2388_v63  ;;  %2746 = vmatpush1.bf16.msra.mxu1 %v2601_v0 }
 0x7fc   : > { %v4020_v2 = vpop.eup %4019  ;;  %4031 = vtanh.f32 %v2547_v10  ;;  %v2637_v7 = vpop.permute.xlu1 %2636 }
 0x7fd   : > { %v4022_v12 = vpop.eup %4021  ;;  %4033 = vtanh.f32 %v2549_v8 }
 0x7fe   : > { %v4024_v19 = vpop.eup %4023 }
 0x7ff   : > { %v4026_v48 = vpop.eup %4025  ;;  %v2552_v31 = vpop.f32.mrb[108].mxu0  ;;  %v2603_v26 = vpack.c.bf16 %v4024_v19, %v4020_v2 }
 0x800   : > { %v2553_v30 = vadd.f32 %v2552_v31, %v2393_v23  ;;  %v2554_v49 = vpop.f32.mrb[109].mxu0  ;;  %v2604_v37 = vpack.c.bf16 %v4026_v48, %v4022_v12  ;;  %v2632_v2 = vpop.permute.xlu0 %2631 }
 0x801   : > { %v2555_v5 = vadd.f32 %v2554_v49, %v2393_v23  ;;  %v2556_v28 = vpop.f32.mrb[110].mxu0 }
 0x802   : > { %4035 = vtanh.f32 %v2553_v30  ;;  %v2557_v1 = vadd.f32 %v2556_v28, %v2398_v6  ;;  %v2558_v32 = vpop.f32.mrb[111].mxu0  ;;  %2747 = vmatprep.subr.bf16.mxu1 %v2604_v37 }
 0x803   : > { %4037 = vtanh.f32 %v2555_v5  ;;  %v2559_v3 = vadd.f32 %v2558_v32, %v2398_v6  ;;  %2748 = vmatpush1.bf16.msra.mxu1 %v2603_v26  ;;  %v2647_v6 = vpop.permute.xlu1 %2646 }
 0x804   : > { %v4028_v42 = vpop.eup %4027  ;;  %4039 = vtanh.f32 %v2557_v1  ;;  %v2642_v28 = vpop.permute.xlu0 %2641 }
 0x805   : > { %v4030_v55 = vpop.eup %4029  ;;  %4041 = vtanh.f32 %v2559_v3 }
 0x806   : > { %v4032_v39 = vpop.eup %4031 }
 0x807   : > { %v4034_v36 = vpop.eup %4033  ;;  %v2605_v15 = vpack.c.bf16 %v4032_v39, %v4028_v42 }
 0x808   : > { %v2606_v34 = vpack.c.bf16 %v4034_v36, %v4030_v55 }
 0x80a   : > { %2749 = vmatprep.subr.bf16.mxu1 %v2606_v34 }
 0x80b   : > { %2750 = vmatpush1.bf16.msra.mxu1 %v2605_v15 }
 0x80c   : > { %v4036_v16 = vpop.eup %4035 }
 0x80d   : > { %v4038_v4 = vpop.eup %4037 }
 0x80e   : > { %v4040_v33 = vpop.eup %4039 }
 0x80f   : > { %v4042_v14 = vpop.eup %4041  ;;  %v2607_v53 = vpack.c.bf16 %v4040_v33, %v4036_v16  ;;  %v2657_v16 = vpop.permute.xlu1 %2656 }
 0x810   : > { %v2608_v60 = vpack.c.bf16 %v4042_v14, %v4038_v4  ;;  %v2652_v33 = vpop.permute.xlu0 %2651 }
 0x812   : > { %2751 = vmatprep.subr.bf16.mxu1 %v2608_v60 }
 0x813   : > { %2752 = vmatpush1.bf16.msra.mxu1 %v2607_v53 }
 0x816   : > { %2770 = vmatmul.mubr.bf16.vlgmr.msra.gmra.mrb[112].mxu1 %v3771_v13 }
 0x817   : > { %2779 = vmatprep.mubr.bf16.mxu1 %v4171_v35 }
 0x81e   : > { %2780 = vmatmul.mubr.bf16.gmra.mrb[116].mxu1 %v3772_v54 }
 0x81f   : > { %2789 = vmatprep.mubr.bf16.mxu1 %v4171_v35 }
 0x826   : > { %2790 = vmatmul.mubr.bf16.gmra.mrb[120].mxu1 %v3773_v40 }
 0x827   : > { %2799 = vmatprep.mubr.bf16.mxu1 %v4171_v35 }
 0x82e   : > { %2800 = vmatmul.mubr.bf16.gmra.mrb[124].mxu1 %v3774_v9 }
 0x82f   : > { %2809 = vmatprep.mubr.bf16.mxu1 %v4171_v35 }
 0x836   : > { %2810 = vmatmul.mubr.bf16.gmra.mrb[128].mxu1 %v3775_v56 }
 0x837   : > { %2819 = vmatprep.mubr.bf16.mxu1 %v4171_v35 }
 0x83e   : > { %2820 = vmatmul.mubr.bf16.gmra.mrb[132].mxu1 %v3776_v46 }
 0x83f   : > { %2829 = vmatprep.mubr.bf16.mxu1 %v4171_v35 }
 0x846   : > { %2830 = vmatmul.mubr.bf16.gmra.mrb[136].mxu1 %v3777_v47  ;;  %v2667_v47 = vpop.permute.xlu1 %2666 }
 0x847   : > { %2839 = vmatprep.mubr.bf16.mxu1 %v4171_v35 }
 0x84e   : > { %2840 = vmatmul.mubr.bf16.gmra.mrb[140].mxu1 %v3778_v43 }
 0x84f   : > { %3220 = vmatprep.mubr.bf16.mxu1 %v4171_v35 }
 0x8e9   : > { %v2771_v57 = vpop.f32.mrb[112].mxu1 }
 0x8ea   : > { %v2773_v17 = vpop.f32.mrb[113].mxu1  ;;  %v2772_v20 = vadd.f32 %v2771_v57, %v2612_v21  ;;  %v2662_v57 = vpop.permute.xlu0 %2661 }
 0x8eb   : > { %v2775_v58 = vpop.f32.mrb[114].mxu1  ;;  %v2774_v27 = vadd.f32 %v2773_v17, %v2612_v21 }
 0x8ec   : > { %v2776_v18 = vadd.f32 %v2775_v58, %v2617_v59  ;;  %v2777_v45 = vpop.f32.mrb[115].mxu1 }
 0x8ed   : > { %v2778_v29 = vadd.f32 %v2777_v45, %v2617_v59 }
 0x8ee   : > { %v2866_v52 = vpack.c.bf16 %v2776_v18, %v2772_v20 }
 0x8ef   : > { %v2867_v11 = vpack.c.bf16 %v2778_v29, %v2774_v27 }
 0x8f1   : > { %v2781_v51 = vpop.f32.mrb[116].mxu1  ;;  %3026 = vmatprep.subr.bf16.mxu0 %v2867_v11 }
 0x8f2   : > { %v2783_v61 = vpop.f32.mrb[117].mxu1  ;;  %3027 = vmatpush1.bf16.msra.mxu0 %v2866_v52  ;;  %v2782_v0 = vadd.f32 %v2781_v51, %v2622_v62  ;;  %v2677_v52 = vpop.permute.xlu1 %2676 }
 0x8f3   : > { %v2785_v50 = vpop.f32.mrb[118].mxu1  ;;  %v2784_v25 = vadd.f32 %v2783_v61, %v2622_v62  ;;  %v2672_v51 = vpop.permute.xlu0 %2671 }
 0x8f4   : > { %v2786_v22 = vadd.f32 %v2785_v50, %v2627_v38  ;;  %v2787_v44 = vpop.f32.mrb[119].mxu1 }
 0x8f5   : > { %v2788_v63 = vadd.f32 %v2787_v44, %v2627_v38 }
 0x8f6   : > { %v2868_v41 = vpack.c.bf16 %v2786_v22, %v2782_v0 }
 0x8f7   : > { %v2869_v24 = vpack.c.bf16 %v2788_v63, %v2784_v25 }
 0x8f9   : > { %v2791_v10 = vpop.f32.mrb[120].mxu1  ;;  %3028 = vmatprep.subr.bf16.mxu0 %v2869_v24 }
 0x8fa   : > { %v2793_v8 = vpop.f32.mrb[121].mxu1  ;;  %3029 = vmatpush1.bf16.msra.mxu0 %v2868_v41  ;;  %v2792_v19 = vadd.f32 %v2791_v10, %v2632_v2  ;;  %v2687_v41 = vpop.permute.xlu1 %2686 }
 0x8fb   : > { %v2795_v12 = vpop.f32.mrb[122].mxu1  ;;  %v2794_v31 = vadd.f32 %v2793_v8, %v2632_v2  ;;  %v2682_v10 = vpop.permute.xlu0 %2681 }
 0x8fc   : > { %v2796_v48 = vadd.f32 %v2795_v12, %v2637_v7  ;;  %v2797_v23 = vpop.f32.mrb[123].mxu1 }
 0x8fd   : > { %v2798_v26 = vadd.f32 %v2797_v23, %v2637_v7 }
 0x8fe   : > { %v2870_v30 = vpack.c.bf16 %v2796_v48, %v2792_v19 }
 0x8ff   : > { %v2871_v49 = vpack.c.bf16 %v2798_v26, %v2794_v31  ;;  %v3779_v26 = vld [vmem:[%s5379_s3] sm:$0xff]  }
 0x901   : > { %v2801_v37 = vpop.f32.mrb[124].mxu1  ;;  %3030 = vmatprep.subr.bf16.mxu0 %v2871_v49  ;;  %v3781_v49 = vld [vmem:[%s5379_s3 + $0x10] sm:$0xff]  }
 0x902   : > { %v2803_v5 = vpop.f32.mrb[125].mxu1  ;;  %3031 = vmatpush1.bf16.msra.mxu0 %v2870_v30  ;;  %v2802_v32 = vadd.f32 %v2801_v37, %v2642_v28  ;;  %v3780_v30 = vld [vmem:[%s5379_s3 + $0x8] sm:$0xff]   ;;  %v3782_v37 = vld [vmem:[%s5379_s3 + $0x18] sm:$0xff]  }
 0x903   : > { %v2805_v1 = vpop.f32.mrb[126].mxu1  ;;  %v2804_v55 = vadd.f32 %v2803_v5, %v2642_v28  ;;  %v3784_v5 = vld [vmem:[%s5379_s3 + $0x28] sm:$0xff]   ;;  %v3785_v28 = vld [vmem:[%s5379_s3 + $0x30] sm:$0xff]  }
 0x904   : > { %v2806_v3 = vadd.f32 %v2805_v1, %v2647_v6  ;;  %v2807_v42 = vpop.f32.mrb[127].mxu1  ;;  %v3786_v1 = vld [vmem:[%s5379_s3 + $0x38] sm:$0xff]  }
 0x905   : > { %v2808_v39 = vadd.f32 %v2807_v42, %v2647_v6  ;;  %v3783_v6 = vld [vmem:[%s5379_s3 + $0x20] sm:$0xff]  }
 0x906   : > { %v2872_v36 = vpack.c.bf16 %v2806_v3, %v2802_v32  ;;  %v2901_v32 = vpop.permute.xlu0 %2900 }
 0x907   : > { %v2873_v15 = vpack.c.bf16 %v2808_v39, %v2804_v55  ;;  %v2906_v39 = vpop.permute.xlu1 %2905 }
 0x909   : > { %v2811_v34 = vpop.f32.mrb[128].mxu1  ;;  %3032 = vmatprep.subr.bf16.mxu0 %v2873_v15 }
 0x90a   : > { %v2813_v4 = vpop.f32.mrb[129].mxu1  ;;  %3033 = vmatpush1.bf16.msra.mxu0 %v2872_v36  ;;  %v2812_v53 = vadd.f32 %v2811_v34, %v2652_v33 }
 0x90b   : > { %v2815_v14 = vpop.f32.mrb[130].mxu1  ;;  %v2814_v54 = vadd.f32 %v2813_v4, %v2652_v33 }
 0x90c   : > { %v2816_v60 = vadd.f32 %v2815_v14, %v2657_v16  ;;  %v2817_v13 = vpop.f32.mrb[131].mxu1 }
 0x90d   : > { %v2818_v40 = vadd.f32 %v2817_v13, %v2657_v16 }
 0x90e   : > { %v2874_v9 = vpack.c.bf16 %v2816_v60, %v2812_v53  ;;  %v2916_v60 = vpop.permute.xlu1 %2915 }
 0x90f   : > { %v2875_v56 = vpack.c.bf16 %v2818_v40, %v2814_v54 }
 0x911   : > { %v2821_v46 = vpop.f32.mrb[132].mxu1  ;;  %3034 = vmatprep.subr.bf16.mxu0 %v2875_v56 }
 0x912   : > { %v2823_v43 = vpop.f32.mrb[133].mxu1  ;;  %3035 = vmatpush1.bf16.msra.mxu0 %v2874_v9  ;;  %v2822_v17 = vadd.f32 %v2821_v46, %v2662_v57 }
 0x913   : > { %v2825_v59 = vpop.f32.mrb[134].mxu1  ;;  %v2824_v20 = vadd.f32 %v2823_v43, %v2662_v57 }
 0x914   : > { %v2826_v21 = vadd.f32 %v2825_v59, %v2667_v47  ;;  %v2827_v58 = vpop.f32.mrb[135].mxu1 }
 0x915   : > { %v2828_v18 = vadd.f32 %v2827_v58, %v2667_v47 }
 0x916   : > { %v2876_v45 = vpack.c.bf16 %v2826_v21, %v2822_v17 }
 0x917   : > { %v2877_v27 = vpack.c.bf16 %v2828_v18, %v2824_v20 }
 0x919   : > { %v2831_v29 = vpop.f32.mrb[136].mxu1  ;;  %3036 = vmatprep.subr.bf16.mxu0 %v2877_v27 }
 0x91a   : > { %v2833_v11 = vpop.f32.mrb[137].mxu1  ;;  %3037 = vmatpush1.bf16.msra.mxu0 %v2876_v45  ;;  %v2832_v61 = vadd.f32 %v2831_v29, %v2672_v51  ;;  %v2926_v45 = vpop.permute.xlu1 %2925 }
 0x91b   : > { %v2835_v38 = vpop.f32.mrb[138].mxu1  ;;  %v2834_v0 = vadd.f32 %v2833_v11, %v2672_v51 }
 0x91c   : > { %v2836_v62 = vadd.f32 %v2835_v38, %v2677_v52  ;;  %v2837_v50 = vpop.f32.mrb[139].mxu1 }
 0x91d   : > { %v2838_v22 = vadd.f32 %v2837_v50, %v2677_v52 }
 0x91e   : > { %v2878_v44 = vpack.c.bf16 %v2836_v62, %v2832_v61 }
 0x91f   : > { %v2879_v25 = vpack.c.bf16 %v2838_v22, %v2834_v0 }
 0x921   : > { %v2841_v63 = vpop.f32.mrb[140].mxu1  ;;  %3038 = vmatprep.subr.bf16.mxu0 %v2879_v25 }
 0x922   : > { %v2843_v24 = vpop.f32.mrb[141].mxu1  ;;  %3039 = vmatpush1.bf16.msra.mxu0 %v2878_v44  ;;  %v2842_v8 = vadd.f32 %v2841_v63, %v2682_v10 }
 0x923   : > { %v2845_v7 = vpop.f32.mrb[142].mxu1  ;;  %v2844_v19 = vadd.f32 %v2843_v24, %v2682_v10  ;;  %v2936_v24 = vpop.permute.xlu1 %2935 }
 0x924   : > { %v2846_v2 = vadd.f32 %v2845_v7, %v2687_v41  ;;  %v2847_v12 = vpop.f32.mrb[143].mxu1 }
 0x925   : > { %v2848_v48 = vadd.f32 %v2847_v12, %v2687_v41 }
 0x926   : > { %v2880_v23 = vpack.c.bf16 %v2846_v2, %v2842_v8 }
 0x927   : > { %v2881_v31 = vpack.c.bf16 %v2848_v48, %v2844_v19 }
 0x929   : > { %3040 = vmatprep.subr.bf16.mxu0 %v2881_v31 }
 0x92a   : > { %3041 = vmatpush1.bf16.msra.mxu0 %v2880_v23 }
 0x92d   : > { %3059 = vmatmul.mubr.bf16.vlgmr.msra.gmra.mrb[112].mxu0 %v3779_v26 }
 0x92e   : > { %3068 = vmatprep.mubr.bf16.mxu0 %v4171_v35 }
 0x935   : > { %3069 = vmatmul.mubr.bf16.gmra.mrb[116].mxu0 %v3780_v30 }
 0x936   : > { %3078 = vmatprep.mubr.bf16.mxu0 %v4171_v35 }
 0x93d   : > { %3079 = vmatmul.mubr.bf16.gmra.mrb[120].mxu0 %v3781_v49 }
 0x93e   : > { %3088 = vmatprep.mubr.bf16.mxu0 %v4171_v35 }
 0x945   : > { %3089 = vmatmul.mubr.bf16.gmra.mrb[124].mxu0 %v3782_v37 }
 0x946   : > { %3098 = vmatprep.mubr.bf16.mxu0 %v4171_v35 }
 0x94d   : > { %3099 = vmatmul.mubr.bf16.gmra.mrb[128].mxu0 %v3783_v6 }
 0x94e   : > { %3108 = vmatprep.mubr.bf16.mxu0 %v4171_v35 }
 0x955   : > { %3109 = vmatmul.mubr.bf16.gmra.mrb[132].mxu0 %v3784_v5 }
 0x956   : > { %3118 = vmatprep.mubr.bf16.mxu0 %v4171_v35 }
 0x95d   : > { %3119 = vmatmul.mubr.bf16.gmra.mrb[136].mxu0 %v3785_v28  ;;  %v2946_v28 = vpop.permute.xlu1 %2945 }
 0x95e   : > { %3128 = vmatprep.mubr.bf16.mxu0 %v4171_v35  ;;  %v2911_v35 = vpop.permute.xlu0 %2910 }
 0x962   : > { %v2921_v59 = vpop.permute.xlu0 %2920 }
 0x965   : > { %3129 = vmatmul.mubr.bf16.gmra.mrb[140].mxu0 %v3786_v1 }
 0x966   : > { %v2931_v0 = vpop.permute.xlu0 %2930 }
 0x96a   : > { %v2941_v26 = vpop.permute.xlu0 %2940 }
 0xa00   : > { %v3060_v3 = vpop.f32.mrb[112].mxu0 }
 0xa01   : > { %v3061_v42 = vadd.f32 %v3060_v3, %v2901_v32  ;;  %v3062_v55 = vpop.f32.mrb[113].mxu0 }
 0xa02   : > { %v3063_v36 = vadd.f32 %v3062_v55, %v2901_v32  ;;  %v3064_v15 = vpop.f32.mrb[114].mxu0 }
 0xa03   : > { %4043 = vtanh.f32 %v3061_v42  ;;  %v3065_v34 = vadd.f32 %v3064_v15, %v2906_v39  ;;  %v3066_v16 = vpop.f32.mrb[115].mxu0 }
 0xa04   : > { %4045 = vtanh.f32 %v3063_v36  ;;  %v3067_v4 = vadd.f32 %v3066_v16, %v2906_v39  ;;  %v2951_v16 = vpop.permute.xlu0 %2950 }
 0xa05   : > { %4047 = vtanh.f32 %v3065_v34 }
 0xa06   : > { %4049 = vtanh.f32 %v3067_v4 }
 0xa08   : > { %v3070_v33 = vpop.f32.mrb[116].mxu0 }
 0xa09   : > { %v3071_v14 = vadd.f32 %v3070_v33, %v2911_v35  ;;  %v3072_v53 = vpop.f32.mrb[117].mxu0 }
 0xa0a   : > { %v3073_v13 = vadd.f32 %v3072_v53, %v2911_v35  ;;  %v3074_v54 = vpop.f32.mrb[118].mxu0 }
 0xa0b   : > { %4051 = vtanh.f32 %v3071_v14  ;;  %v3075_v40 = vadd.f32 %v3074_v54, %v2916_v60  ;;  %v3076_v9 = vpop.f32.mrb[119].mxu0 }
 0xa0c   : > { %4053 = vtanh.f32 %v3073_v13  ;;  %v3077_v56 = vadd.f32 %v3076_v9, %v2916_v60  ;;  %v2956_v60 = vpop.permute.xlu1 %2955 }
 0xa0d   : > { %v4044_v46 = vpop.eup %4043  ;;  %4055 = vtanh.f32 %v3075_v40 }
 0xa0e   : > { %v4046_v47 = vpop.eup %4045  ;;  %4057 = vtanh.f32 %v3077_v56 }
 0xa0f   : > { %v4048_v43 = vpop.eup %4047 }
 0xa10   : > { %v4050_v57 = vpop.eup %4049  ;;  %v3080_v17 = vpop.f32.mrb[120].mxu0  ;;  %v3172_v21 = vpack.c.bf16 %v4048_v43, %v4044_v46 }
 0xa11   : > { %v3081_v58 = vadd.f32 %v3080_v17, %v2921_v59  ;;  %v3082_v20 = vpop.f32.mrb[121].mxu0  ;;  %v3173_v18 = vpack.c.bf16 %v4050_v57, %v4046_v47 }
 0xa12   : > { %v3083_v27 = vadd.f32 %v3082_v20, %v2921_v59  ;;  %v3084_v29 = vpop.f32.mrb[122].mxu0  ;;  %v2961_v59 = vpop.permute.xlu0 %2960 }
 0xa13   : > { %4059 = vtanh.f32 %v3081_v58  ;;  %v3085_v52 = vadd.f32 %v3084_v29, %v2926_v45  ;;  %v3086_v11 = vpop.f32.mrb[123].mxu0  ;;  %3188 = vmatprep.subr.bf16.mxu1 %v3173_v18 }
 0xa14   : > { %4061 = vtanh.f32 %v3083_v27  ;;  %v3087_v51 = vadd.f32 %v3086_v11, %v2926_v45  ;;  %3189 = vmatpush1.bf16.msra.mxu1 %v3172_v21  ;;  %v2966_v45 = vpop.permute.xlu1 %2965 }
 0xa15   : > { %v4052_v38 = vpop.eup %4051  ;;  %4063 = vtanh.f32 %v3085_v52 }
 0xa16   : > { %v4054_v61 = vpop.eup %4053  ;;  %4065 = vtanh.f32 %v3087_v51 }
 0xa17   : > { %v4056_v62 = vpop.eup %4055 }
 0xa18   : > { %v4058_v50 = vpop.eup %4057  ;;  %v3090_v22 = vpop.f32.mrb[124].mxu0  ;;  %v3174_v44 = vpack.c.bf16 %v4056_v62, %v4052_v38 }
 0xa19   : > { %v3091_v25 = vadd.f32 %v3090_v22, %v2931_v0  ;;  %v3092_v63 = vpop.f32.mrb[125].mxu0  ;;  %v3175_v41 = vpack.c.bf16 %v4058_v50, %v4054_v61 }
 0xa1a   : > { %v3093_v10 = vadd.f32 %v3092_v63, %v2931_v0  ;;  %v3094_v7 = vpop.f32.mrb[126].mxu0  ;;  %v2971_v0 = vpop.permute.xlu0 %2970 }
 0xa1b   : > { %4067 = vtanh.f32 %v3091_v25  ;;  %v3095_v8 = vadd.f32 %v3094_v7, %v2936_v24  ;;  %v3096_v2 = vpop.f32.mrb[127].mxu0  ;;  %3190 = vmatprep.subr.bf16.mxu1 %v3175_v41 }
 0xa1c   : > { %4069 = vtanh.f32 %v3093_v10  ;;  %v3097_v12 = vadd.f32 %v3096_v2, %v2936_v24  ;;  %3191 = vmatpush1.bf16.msra.mxu1 %v3174_v44  ;;  %v2976_v24 = vpop.permute.xlu1 %2975 }
 0xa1d   : > { %v4060_v19 = vpop.eup %4059  ;;  %4071 = vtanh.f32 %v3095_v8 }
 0xa1e   : > { %v4062_v48 = vpop.eup %4061  ;;  %4073 = vtanh.f32 %v3097_v12 }
 0xa1f   : > { %v4064_v23 = vpop.eup %4063 }
 0xa20   : > { %v4066_v31 = vpop.eup %4065  ;;  %v3100_v30 = vpop.f32.mrb[128].mxu0  ;;  %v3176_v49 = vpack.c.bf16 %v4064_v23, %v4060_v19 }
 0xa21   : > { %v3101_v37 = vadd.f32 %v3100_v30, %v2941_v26  ;;  %v3102_v6 = vpop.f32.mrb[129].mxu0  ;;  %v3177_v5 = vpack.c.bf16 %v4066_v31, %v4062_v48 }
 0xa22   : > { %v3103_v1 = vadd.f32 %v3102_v6, %v2941_v26  ;;  %v3104_v32 = vpop.f32.mrb[130].mxu0 }
 0xa23   : > { %4075 = vtanh.f32 %v3101_v37  ;;  %v3105_v3 = vadd.f32 %v3104_v32, %v2946_v28  ;;  %v3106_v42 = vpop.f32.mrb[131].mxu0  ;;  %3192 = vmatprep.subr.bf16.mxu1 %v3177_v5  ;;  %v3171_v32 = vld [vmem:[%s5381_s5] sm:$0xf] }
 0xa24   : > { %4077 = vtanh.f32 %v3103_v1  ;;  %v3107_v55 = vadd.f32 %v3106_v42, %v2946_v28  ;;  %3193 = vmatpush1.bf16.msra.mxu1 %v3176_v49 }
 0xa25   : > { %v4068_v39 = vpop.eup %4067  ;;  %4079 = vtanh.f32 %v3105_v3  ;;  %v3235_v3 = vlaneseq }
 0xa26   : > { %v4070_v36 = vpop.eup %4069  ;;  %4081 = vtanh.f32 %v3107_v55  ;;  %v4172_v55 = vmov 1966171168  }
 0xa27   : > { %v4072_v15 = vpop.eup %4071  ;;  %v3236_v42 = vshrl.u32 %v3235_v3, 7  ;;  %vm3261_vm0 = vcmp.lt.s32.totalorder %v3235_v3, 256 }
 0xa28   : > { %v4074_v34 = vpop.eup %4073  ;;  %v3110_v4 = vpop.f32.mrb[132].mxu0  ;;  %v3178_v35 = vpack.c.bf16 %v4072_v15, %v4068_v39  ;;  %v3245_v39 = vunpack.c.l.s4 %v4172_v55 }
 0xa29   : > { %v3111_v33 = vadd.f32 %v3110_v4, %v2951_v16  ;;  %v3112_v14 = vpop.f32.mrb[133].mxu0  ;;  %v3179_v53 = vpack.c.bf16 %v4074_v34, %v4070_v36  ;;  %v3237_v36 = vsub.s32 0, %v3236_v42  ;;  %v3233_v15 = vpop.permute.xlu0 %3232 }
 0xa2a   : > { %v3113_v13 = vadd.f32 %v3112_v14, %v2951_v16  ;;  %v3114_v54 = vpop.f32.mrb[134].mxu0  ;;  %v3246_v34 = vunpack.c.0.s8 %v3245_v39 }
 0xa2b   : > { %4083 = vtanh.f32 %v3111_v33  ;;  %v3115_v40 = vadd.f32 %v3114_v54, %v2956_v60  ;;  %v3116_v9 = vpop.f32.mrb[135].mxu0  ;;  %3194 = vmatprep.subr.bf16.mxu1 %v3179_v53  ;;  %v3238_v16 = vrot.slane %v3233_v15, %v3237_v36 }
 0xa2c   : > { %4085 = vtanh.f32 %v3113_v13  ;;  %v3117_v56 = vadd.f32 %v3116_v9, %v2956_v60  ;;  %3195 = vmatpush1.bf16.msra.mxu1 %v3178_v35  ;;  %v3249_v53 = vsub.s32 %v3246_v34, %v3236_v42 }
 0xa2d   : > { %v4076_v46 = vpop.eup %4075  ;;  %4087 = vtanh.f32 %v3115_v40 }
 0xa2e   : > { %v4078_v47 = vpop.eup %4077  ;;  %4089 = vtanh.f32 %v3117_v56 }
 0xa2f   : > { %v4080_v43 = vpop.eup %4079 }
 0xa30   : > { %v4082_v57 = vpop.eup %4081  ;;  %v3120_v17 = vpop.f32.mrb[136].mxu0  ;;  %v3180_v21 = vpack.c.bf16 %v4080_v43, %v4076_v46 }
 0xa31   : > { %v3121_v58 = vadd.f32 %v3120_v17, %v2961_v59  ;;  %v3122_v20 = vpop.f32.mrb[137].mxu0  ;;  %v3181_v18 = vpack.c.bf16 %v4082_v57, %v4078_v47 }
 0xa32   : > { %v3123_v27 = vadd.f32 %v3122_v20, %v2961_v59  ;;  %v3124_v29 = vpop.f32.mrb[138].mxu0 }
 0xa33   : > { %4091 = vtanh.f32 %v3121_v58  ;;  %v3125_v52 = vadd.f32 %v3124_v29, %v2966_v45  ;;  %v3126_v11 = vpop.f32.mrb[139].mxu0  ;;  %3196 = vmatprep.subr.bf16.mxu1 %v3181_v18 }
 0xa34   : > { %4093 = vtanh.f32 %v3123_v27  ;;  %v3127_v51 = vadd.f32 %v3126_v11, %v2966_v45  ;;  %3197 = vmatpush1.bf16.msra.mxu1 %v3180_v21 }
 0xa35   : > { %v4084_v38 = vpop.eup %4083  ;;  %4095 = vtanh.f32 %v3125_v52 }
 0xa36   : > { %v4086_v61 = vpop.eup %4085  ;;  %4097 = vtanh.f32 %v3127_v51 }
 0xa37   : > { %v4088_v62 = vpop.eup %4087 }
 0xa38   : > { %v4090_v50 = vpop.eup %4089  ;;  %v3130_v22 = vpop.f32.mrb[140].mxu0  ;;  %v3182_v44 = vpack.c.bf16 %v4088_v62, %v4084_v38 }
 0xa39   : > { %v3131_v25 = vadd.f32 %v3130_v22, %v2971_v0  ;;  %v3132_v63 = vpop.f32.mrb[141].mxu0  ;;  %v3183_v41 = vpack.c.bf16 %v4090_v50, %v4086_v61 }
 0xa3a   : > { %v3133_v10 = vadd.f32 %v3132_v63, %v2971_v0  ;;  %v3134_v7 = vpop.f32.mrb[142].mxu0 }
 0xa3b   : > { %4099 = vtanh.f32 %v3131_v25  ;;  %v3135_v8 = vadd.f32 %v3134_v7, %v2976_v24  ;;  %v3136_v2 = vpop.f32.mrb[143].mxu0  ;;  %3198 = vmatprep.subr.bf16.mxu1 %v3183_v41 }
 0xa3c   : > { %4101 = vtanh.f32 %v3133_v10  ;;  %v3137_v12 = vadd.f32 %v3136_v2, %v2976_v24  ;;  %3199 = vmatpush1.bf16.msra.mxu1 %v3182_v44 }
 0xa3d   : > { %v4092_v19 = vpop.eup %4091  ;;  %4103 = vtanh.f32 %v3135_v8 }
 0xa3e   : > { %v4094_v48 = vpop.eup %4093  ;;  %4105 = vtanh.f32 %v3137_v12 }
 0xa3f   : > { %v4096_v23 = vpop.eup %4095 }
 0xa40   : > { %v4098_v31 = vpop.eup %4097  ;;  %v3184_v26 = vpack.c.bf16 %v4096_v23, %v4092_v19 }
 0xa41   : > { %v3185_v30 = vpack.c.bf16 %v4098_v31, %v4094_v48 }
 0xa43   : > { %3200 = vmatprep.subr.bf16.mxu1 %v3185_v30 }
 0xa44   : > { %3201 = vmatpush1.bf16.msra.mxu1 %v3184_v26 }
 0xa45   : > { %v4100_v49 = vpop.eup %4099 }
 0xa46   : > { %v4102_v37 = vpop.eup %4101 }
 0xa47   : > { %v4104_v6 = vpop.eup %4103 }
 0xa48   : > { %v4106_v5 = vpop.eup %4105  ;;  %v3186_v28 = vpack.c.bf16 %v4104_v6, %v4100_v49 }
 0xa49   : > { %v3187_v1 = vpack.c.bf16 %v4106_v5, %v4102_v37 }
 0xa4b   : > { %3202 = vmatprep.subr.bf16.mxu1 %v3187_v1 }
 0xa4c   : > { %3203 = vmatpush1.bf16.msra.mxu1 %v3186_v28 }
 0xa4f   : > { %3221 = vmatmul.mubr.bf16.vlgmr.msra.gmra.mrb[144].mxu1 %v3171_v32 }
 0xb22   : > { %v3222_v4 = vpop.f32.mrb[144].mxu1 }
 0xb23   : > { %v3239_v35 = vadd.f32 %v3238_v16, %v3222_v4  ;;  %v3224_v33 = vpop.f32.mrb[145].mxu1 }
 0xb24   : > { %v3240_v14 = vadd.f32 %v3238_v16, %v3224_v33  ;;  %v3226_v60 = vpop.f32.mrb[146].mxu1 }
 0xb25   : > { %v3227_v13 = vpop.f32.mrb[147].mxu1 }
 0xb26   : > { %v3243_v54 = vcombine.low %v3239_v35, %v3240_v14 }
 0xb28   : > { %v3250_v40 = vrot.slane %v3243_v54, %v3249_v53 }
 0xb2a   : > { %v3257_v9 = vrot.slane %v3250_v40, %v3249_v53 }
 0xb2c   : > { %3263 = vst.msk [vmem:[%s360_s9] sm:$0x3] %vm3261_vm0, %v3257_v9 }
 0xb2d   : > { %4120 = shalt.err (!%p4117_p5)
}
 0xb2e   : > { %s4121_s25 = scalar_lea.hbm %s5332_s17, 32  ;;  %s4125_s23 = scalar_lea.hbm %s5383_s7, 64 }
 0xb2f   : > { %p4122_p7 = scmp.ne.s32.totalorder %s5332_s17, %s4121_s25  ;;  %p4126_p12 = scmp.lt.u32.totalorder %s5332_s17, %s5383_s7 }
 0xb30   : > { %p4127_p13 = scmp.lt.u32.totalorder %s4125_s23, %s4121_s25  ;;  %p4129_p1 = scmp.lt.u32.totalorder %s4121_s25, %s5332_s17 }
 0xb31   : > { %p4123_p10 = pnand %p4122_p7, %p4255_p6 }
 0xb32   : > { %p4128_p0 = por %p4127_p13, %p4126_p12 }
 0xb33   : > { %p4124_p11 = pneg %p4123_p10 }
 0xb34   : > { %p4130_p2 = por %p4129_p1, %p4128_p0 }
 0xb36   : > { %p4131_p3 = pnand %p4130_p2, %p4124_p11 }
 0xb38   : > { %4134 = shalt.err (!%p4131_p3)
}
 0xb39   : > { %3672 = dma.vmem_to_hbm [thread:$0]  (%p4255_p6), %s5334_s10, 32, %s5332_s17, %s3265_s18  }
 0xb3a PF: > { %s3291_s9 = sand.u32 1, %s4157_s26   ;;  %p3675_p4 = pnand %p3346_p9, %p4259_p8 }
 0xb3b   : > { %s3292_s14 = scalar_lea.sflag [#allocation5], %s3291_s9 }
 0xb3c   : > { %4152 = dma.done.wait (!%p3675_p4), %s3292_s14, 32  }
 0xb3d   : > { %4154 = vsyncadd (!%p3675_p4), %s3292_s14, 4294967264  ;;  %p19_p5 = scmp.ge.s32.totalorder %s4240_s8, 4   ;;  %s5386_s26 = smov %s4161_s27 }
 0xb3e   : > { %s5387_s27 = smov %s4165_s28  ;;  %s5388_s28 = smov %s4253_s11 }
 0xb3f   : > { %s5389_s29 = smov %s4240_s8  ;;  %21 = sbr.rel (!%p19_p5) target bundleno = 6 (0x6), region = 125 }
 0xb46   :  { %3297 = vsyncpa [#allocation5], 1 }
 0xb47   :  { %3299 = vsyncpa [#allocation5 + $0x1], 1 }

</bundles_post_ra>
